<compile_context>
chip_gen: v7x
topology: tpu7x:2x2x1
jax: 0.10.0
libtpu: 0.0.40
codegen_flags: <defaults>
</compile_context>

<pallas_src>
import functools

import jax
import jax.numpy as jnp
from jax.experimental import pallas as pl
from jax.experimental.pallas import tpu as pltpu

# Encoder 784->512->256->128->64->16, decoder 16->64->128->256->512->784.
LAYER_DIMS = [784, 512, 256, 128, 64, 16, 64, 128, 256, 512, 784]
# ReLU after every Linear except the encoder bottleneck (layer 4) and the
# final decoder layer (layer 9) -- matches the nn.Sequential definitions.
RELU_AFTER = (True, True, True, True, False, True, True, True, True, False)
NUM_LAYERS = len(RELU_AFTER)


def _round_up(v, m):
    return ((v + m - 1) // m) * m


def autoencoder_kernel(*refs, relu_after):
    """refs = (x_ref, w0, b0, w1, b1, ..., out_ref); one batch tile per call."""
    x_ref = refs[0]
    out_ref = refs[-1]
    param_refs = refs[1:-1]

    h = x_ref[...].astype(jnp.bfloat16)       # bf16 activations between layers
    acc = None
    for li, relu in enumerate(relu_after):
        w = param_refs[2 * li][...]            # [in_pad, out_pad], bf16
        b = param_refs[2 * li + 1][...]        # [1, out_pad], f32
        # bf16 x bf16 on the MXU, f32 accumulate.
        acc = jnp.dot(h, w, preferred_element_type=jnp.float32) + b
        if relu:
            acc = jnp.maximum(acc, 0.0)
        if li + 1 < len(relu_after):
            h = acc.astype(jnp.bfloat16)       # halve inter-layer vld/vst bytes
    out_ref[...] = acc.astype(out_ref.dtype)   # bf16 lane-dense store


def init_params(key, dtype=jnp.float32):
    """Deterministic init mimicking PyTorch nn.Linear (U(-1/sqrt(fan_in), +))."""
    params = []
    for li in range(NUM_LAYERS):
        fan_in, fan_out = LAYER_DIMS[li], LAYER_DIMS[li + 1]
        key, kw, kb = jax.random.split(key, 3)
        bound = 1.0 / (fan_in ** 0.5)
        w = jax.random.uniform(kw, (fan_in, fan_out), dtype, -bound, bound)
        b = jax.random.uniform(kb, (1, fan_out), dtype, -bound, bound)
        params.append((w, b))
    return params


def prepare_params(params, *, weight_dtype=jnp.bfloat16):
    """Fuse the linear bottleneck pair, zero-pad feature dims to 128-lane
    multiples, cast weights to bf16 (biases stay f32, shaped [1, out])."""
    layers = [(w.astype(jnp.float32),
               b.reshape(-1).astype(jnp.float32),
               RELU_AFTER[li])
              for li, (w, b) in enumerate(params)]

    # Layers 4 (64->16, no ReLU) and 5 (16->64): pure linear composition.
    w4, b4, _ = layers[4]
    w5, b5, relu5 = layers[5]
    layers = layers[:4] + [(w4 @ w5, b4 @ w5 + b5, relu5)] + layers[6:]

    flat, relu_after = [], []
    for w, b, relu in layers:
        fi, fo = w.shape
        fi_p, fo_p = _round_up(fi, 128), _round_up(fo, 128)
        # Zero padding keeps the math exact: padded input cols are zero and
        # padded output cols get 0 bias -> 0 (ReLU(0)=0), sliced off at the end.
        w = jnp.pad(w, ((0, fi_p - fi), (0, fo_p - fo)))
        b = jnp.pad(b, (0, fo_p - fo))
        flat.append(w.astype(weight_dtype))
        flat.append(b.reshape(1, -1).astype(jnp.float32))
        relu_after.append(relu)
    return flat, tuple(relu_after)


def big_autoencoder_16(x, flat_params, relu_after, *, tile_b=512,
                       vmem_limit_bytes=40 << 20):
    """Forward pass. x: [B, 784] -> [B, 784] (same dtype as x).

    tile_b=512 is v7x-safe; on v5e/v6e (128 MiB VMEM) tile_b=1024 with
    vmem_limit_bytes up to ~64 MiB is a good setting for large batches.
    """
    B, f_in = x.shape
    out_dtype = x.dtype
    f_in_pad = flat_params[0].shape[0]     # 896
    f_out_pad = flat_params[-2].shape[1]   # 896
    f_out = LAYER_DIMS[-1]                 # 784

    # bf16 activations across the kernel boundary (MXU path is already bf16).
    xb = x.astype(jnp.bfloat16)
    if f_in_pad != f_in:
        xb = jnp.pad(xb, ((0, 0), (0, f_in_pad - f_in)))

    # Batch tile: multiple of 8 sublanes, no larger than needed, and prefer
    # >= 2 tiles so the "parallel" grid axis can feed both v7x TensorCores.
    tile_b = max(8, int(tile_b))
    if B >= 16:
        tile_b = min(tile_b, _round_up(pl.cdiv(B, 2), 8))
    else:
        tile_b = min(tile_b, _round_up(B, 8))
    tile_b = _round_up(tile_b, 8)
    b_pad = _round_up(B, tile_b)
    if b_pad != B:
        xb = jnp.pad(xb, ((0, b_pad - B), (0, 0)))
    num_tiles = b_pad // tile_b

    # x / out tile over the batch grid; weights & biases use a constant
    # index_map so they are fetched once and stay VMEM-resident.
    x_spec = pl.BlockSpec((tile_b, f_in_pad), lambda i: (i, 0))
    out_spec = pl.BlockSpec((tile_b, f_out_pad), lambda i: (i, 0))
    param_specs = [pl.BlockSpec(p.shape, lambda i: (0, 0)) for p in flat_params]

    flops = 2 * b_pad * sum(int(w.size) for w in flat_params[0::2])
    bytes_accessed = (
        sum(int(p.size) * p.dtype.itemsize for p in flat_params)
        + int(xb.size) * xb.dtype.itemsize
        + b_pad * f_out_pad * 2)

    kernel = functools.partial(autoencoder_kernel, relu_after=relu_after)
    out = pl.pallas_call(
        kernel,
        out_shape=jax.ShapeDtypeStruct((b_pad, f_out_pad), jnp.bfloat16),
        grid=(num_tiles,),
        in_specs=[x_spec] + param_specs,
        out_specs=out_spec,
        compiler_params=pltpu.CompilerParams(
            dimension_semantics=("parallel",),   # shard batch tiles across TCs
            vmem_limit_bytes=vmem_limit_bytes,   # safe on v7x's 64 MiB VMEM
        ),
        cost_estimate=pl.CostEstimate(
            flops=flops, transcendentals=0, bytes_accessed=bytes_accessed),
    )(xb, *flat_params)
    return out[:B, :f_out].astype(out_dtype)


def reference_forward_prepared(x, flat_params, relu_after):
    """Pure-JAX reference mirroring the kernel's bf16/padded numerics."""
    f_in_pad = flat_params[0].shape[0]
    h = x.astype(jnp.bfloat16)
    h = jnp.pad(h, ((0, 0), (0, f_in_pad - x.shape[1])))
    for li, relu in enumerate(relu_after):
        w = flat_params[2 * li]
        b = flat_params[2 * li + 1]
        a = jnp.dot(h, w, preferred_element_type=jnp.float32) + b
        if relu:
            a = jnp.maximum(a, 0.0)
        h = a.astype(jnp.bfloat16)
    return h[:, :LAYER_DIMS[-1]].astype(x.dtype)


def reference_forward_original(x, raw_params):
    """Unfused f32 reference matching the original PyTorch module exactly."""
    h = x.astype(jnp.float32)
    for li, (w, b) in enumerate(raw_params):
        h = h @ w + b.reshape(-1)
        if RELU_AFTER[li]:
            h = jnp.maximum(h, 0.0)
    return h.astype(x.dtype)


if __name__ == "__main__":
    key = jax.random.PRNGKey(0)
    k_params, k_x = jax.random.split(key)

    raw_params = init_params(k_params)
    flat_params, relu_after = prepare_params(raw_params)

    B = 32  # small batch for the smoke test (splits into 2 tiles of 16)
    x = jax.random.normal(k_x, (B, 784), dtype=jnp.float32)

    out = jax.block_until_ready(big_autoencoder_16(x, flat_params, relu_after))
    ref_prep = reference_forward_prepared(x, flat_params, relu_after)
    ref_f32 = reference_forward_original(x, raw_params)

    assert out.shape == (B, 784), out.shape
    # Tight check vs a reference built with the same fused/padded bf16 params.
    assert jnp.allclose(out, ref_prep, atol=1e-2, rtol=1e-2), \
        "mismatch vs prepared-params reference"
    # Looser check vs the original, unfused f32 10-layer model (bounds the
    # approximation error of the bf16 cast + bottleneck fusion).
    assert jnp.allclose(out, ref_f32, atol=3e-2, rtol=3e-2), \
        "mismatch vs original f32 model"

    print("KERNEL_OK")
</pallas_src>

<mosaic_0001>
module attributes {stable_mosaic.version = 11 : i64} {
  func.func @autoencoder_kernel(%arg0: i32, %arg1: memref<16x896xbf16, #tpu.memory_space<vmem>>, %arg2: memref<896x512xbf16, #tpu.memory_space<vmem>>, %arg3: memref<1x512xf32, #tpu.memory_space<vmem>>, %arg4: memref<512x256xbf16, #tpu.memory_space<vmem>>, %arg5: memref<1x256xf32, #tpu.memory_space<vmem>>, %arg6: memref<256x128xbf16, #tpu.memory_space<vmem>>, %arg7: memref<1x128xf32, #tpu.memory_space<vmem>>, %arg8: memref<128x128xbf16, #tpu.memory_space<vmem>>, %arg9: memref<1x128xf32, #tpu.memory_space<vmem>>, %arg10: memref<128x128xbf16, #tpu.memory_space<vmem>>, %arg11: memref<1x128xf32, #tpu.memory_space<vmem>>, %arg12: memref<128x128xbf16, #tpu.memory_space<vmem>>, %arg13: memref<1x128xf32, #tpu.memory_space<vmem>>, %arg14: memref<128x256xbf16, #tpu.memory_space<vmem>>, %arg15: memref<1x256xf32, #tpu.memory_space<vmem>>, %arg16: memref<256x512xbf16, #tpu.memory_space<vmem>>, %arg17: memref<1x512xf32, #tpu.memory_space<vmem>>, %arg18: memref<512x896xbf16, #tpu.memory_space<vmem>>, %arg19: memref<1x896xf32, #tpu.memory_space<vmem>>, %arg20: memref<16x896xbf16, #tpu.memory_space<vmem>>) attributes {dimension_semantics = [#tpu.dimension_semantics<parallel>], iteration_bounds = array<i64: 2>, scalar_prefetch = 0 : i64, scratch_operands = 0 : i64, tpu.core_type = #tpu.core_type<tc>, window_params = [{transform_indices = @transform_0, window_bounds = array<i64: 16, 896>}, {pipeline_mode = #tpu.pipeline_mode<synchronous>, transform_indices = @transform_1, window_bounds = array<i64: 896, 512>}, {pipeline_mode = #tpu.pipeline_mode<synchronous>, transform_indices = @transform_2, window_bounds = array<i64: 1, 512>}, {pipeline_mode = #tpu.pipeline_mode<synchronous>, transform_indices = @transform_3, window_bounds = array<i64: 512, 256>}, {pipeline_mode = #tpu.pipeline_mode<synchronous>, transform_indices = @transform_4, window_bounds = array<i64: 1, 256>}, {pipeline_mode = #tpu.pipeline_mode<synchronous>, transform_indices = @transform_5, window_bounds = array<i64: 256, 128>}, {pipeline_mode = #tpu.pipeline_mode<synchronous>, transform_indices = @transform_6, window_bounds = array<i64: 1, 128>}, {pipeline_mode = #tpu.pipeline_mode<synchronous>, transform_indices = @transform_7, window_bounds = array<i64: 128, 128>}, {pipeline_mode = #tpu.pipeline_mode<synchronous>, transform_indices = @transform_8, window_bounds = array<i64: 1, 128>}, {pipeline_mode = #tpu.pipeline_mode<synchronous>, transform_indices = @transform_9, window_bounds = array<i64: 128, 128>}, {pipeline_mode = #tpu.pipeline_mode<synchronous>, transform_indices = @transform_10, window_bounds = array<i64: 1, 128>}, {pipeline_mode = #tpu.pipeline_mode<synchronous>, transform_indices = @transform_11, window_bounds = array<i64: 128, 128>}, {pipeline_mode = #tpu.pipeline_mode<synchronous>, transform_indices = @transform_12, window_bounds = array<i64: 1, 128>}, {pipeline_mode = #tpu.pipeline_mode<synchronous>, transform_indices = @transform_13, window_bounds = array<i64: 128, 256>}, {pipeline_mode = #tpu.pipeline_mode<synchronous>, transform_indices = @transform_14, window_bounds = array<i64: 1, 256>}, {pipeline_mode = #tpu.pipeline_mode<synchronous>, transform_indices = @transform_15, window_bounds = array<i64: 256, 512>}, {pipeline_mode = #tpu.pipeline_mode<synchronous>, transform_indices = @transform_16, window_bounds = array<i64: 1, 512>}, {pipeline_mode = #tpu.pipeline_mode<synchronous>, transform_indices = @transform_17, window_bounds = array<i64: 512, 896>}, {pipeline_mode = #tpu.pipeline_mode<synchronous>, transform_indices = @transform_18, window_bounds = array<i64: 1, 896>}, {transform_indices = @transform_19, window_bounds = array<i64: 16, 896>}]} {
    %c0 = arith.constant 0 : index
    %c0_0 = arith.constant 0 : index
    %0 = vector.load %arg1[%c0, %c0_0] : memref<16x896xbf16, #tpu.memory_space<vmem>>, vector<16x896xbf16>
    %c0_1 = arith.constant 0 : index
    %c0_2 = arith.constant 0 : index
    %1 = vector.load %arg2[%c0_1, %c0_2] : memref<896x512xbf16, #tpu.memory_space<vmem>>, vector<896x512xbf16>
    %c0_3 = arith.constant 0 : index
    %c0_4 = arith.constant 0 : index
    %2 = vector.load %arg3[%c0_3, %c0_4] : memref<1x512xf32, #tpu.memory_space<vmem>>, vector<1x512xf32>
    %cst = arith.constant dense<0.000000e+00> : vector<16x512xf32>
    %3 = tpu.matmul %0, %1, %cst {dimension_numbers = #tpu.dot_dimension_numbers<[1], [0], [0], [1], [0, 0, 1, 1], [], []>} : vector<16x896xbf16>, vector<896x512xbf16>, vector<16x512xf32> -> vector<16x512xf32>
    %4 = vector.broadcast %2 : vector<1x512xf32> to vector<16x512xf32>
    %5 = arith.addf %3, %4 : vector<16x512xf32>
    %cst_5 = arith.constant 0.000000e+00 : f32
    %6 = vector.broadcast %cst_5 : f32 to vector<16x512xf32>
    %7 = arith.maximumf %5, %6 : vector<16x512xf32>
    %8 = arith.truncf %7 : vector<16x512xf32> to vector<16x512xbf16>
    %c0_6 = arith.constant 0 : index
    %c0_7 = arith.constant 0 : index
    %9 = vector.load %arg4[%c0_6, %c0_7] : memref<512x256xbf16, #tpu.memory_space<vmem>>, vector<512x256xbf16>
    %c0_8 = arith.constant 0 : index
    %c0_9 = arith.constant 0 : index
    %10 = vector.load %arg5[%c0_8, %c0_9] : memref<1x256xf32, #tpu.memory_space<vmem>>, vector<1x256xf32>
    %cst_10 = arith.constant dense<0.000000e+00> : vector<16x256xf32>
    %11 = tpu.matmul %8, %9, %cst_10 {dimension_numbers = #tpu.dot_dimension_numbers<[1], [0], [0], [1], [0, 0, 1, 1], [], []>} : vector<16x512xbf16>, vector<512x256xbf16>, vector<16x256xf32> -> vector<16x256xf32>
    %12 = vector.broadcast %10 : vector<1x256xf32> to vector<16x256xf32>
    %13 = arith.addf %11, %12 : vector<16x256xf32>
    %cst_11 = arith.constant 0.000000e+00 : f32
    %14 = vector.broadcast %cst_11 : f32 to vector<16x256xf32>
    %15 = arith.maximumf %13, %14 : vector<16x256xf32>
    %16 = arith.truncf %15 : vector<16x256xf32> to vector<16x256xbf16>
    %c0_12 = arith.constant 0 : index
    %c0_13 = arith.constant 0 : index
    %17 = vector.load %arg6[%c0_12, %c0_13] : memref<256x128xbf16, #tpu.memory_space<vmem>>, vector<256x128xbf16>
    %c0_14 = arith.constant 0 : index
    %c0_15 = arith.constant 0 : index
    %18 = vector.load %arg7[%c0_14, %c0_15] : memref<1x128xf32, #tpu.memory_space<vmem>>, vector<1x128xf32>
    %cst_16 = arith.constant dense<0.000000e+00> : vector<16x128xf32>
    %19 = tpu.matmul %16, %17, %cst_16 {dimension_numbers = #tpu.dot_dimension_numbers<[1], [0], [0], [1], [0, 0, 1, 1], [], []>} : vector<16x256xbf16>, vector<256x128xbf16>, vector<16x128xf32> -> vector<16x128xf32>
    %20 = vector.broadcast %18 : vector<1x128xf32> to vector<16x128xf32>
    %21 = arith.addf %19, %20 : vector<16x128xf32>
    %cst_17 = arith.constant 0.000000e+00 : f32
    %22 = vector.broadcast %cst_17 : f32 to vector<16x128xf32>
    %23 = arith.maximumf %21, %22 : vector<16x128xf32>
    %24 = arith.truncf %23 : vector<16x128xf32> to vector<16x128xbf16>
    %c0_18 = arith.constant 0 : index
    %c0_19 = arith.constant 0 : index
    %25 = vector.load %arg8[%c0_18, %c0_19] : memref<128x128xbf16, #tpu.memory_space<vmem>>, vector<128x128xbf16>
    %c0_20 = arith.constant 0 : index
    %c0_21 = arith.constant 0 : index
    %26 = vector.load %arg9[%c0_20, %c0_21] : memref<1x128xf32, #tpu.memory_space<vmem>>, vector<1x128xf32>
    %cst_22 = arith.constant dense<0.000000e+00> : vector<16x128xf32>
    %27 = tpu.matmul %24, %25, %cst_22 {dimension_numbers = #tpu.dot_dimension_numbers<[1], [0], [0], [1], [0, 0, 1, 1], [], []>} : vector<16x128xbf16>, vector<128x128xbf16>, vector<16x128xf32> -> vector<16x128xf32>
    %28 = vector.broadcast %26 : vector<1x128xf32> to vector<16x128xf32>
    %29 = arith.addf %27, %28 : vector<16x128xf32>
    %cst_23 = arith.constant 0.000000e+00 : f32
    %30 = vector.broadcast %cst_23 : f32 to vector<16x128xf32>
    %31 = arith.maximumf %29, %30 : vector<16x128xf32>
    %32 = arith.truncf %31 : vector<16x128xf32> to vector<16x128xbf16>
    %c0_24 = arith.constant 0 : index
    %c0_25 = arith.constant 0 : index
    %33 = vector.load %arg10[%c0_24, %c0_25] : memref<128x128xbf16, #tpu.memory_space<vmem>>, vector<128x128xbf16>
    %c0_26 = arith.constant 0 : index
    %c0_27 = arith.constant 0 : index
    %34 = vector.load %arg11[%c0_26, %c0_27] : memref<1x128xf32, #tpu.memory_space<vmem>>, vector<1x128xf32>
    %cst_28 = arith.constant dense<0.000000e+00> : vector<16x128xf32>
    %35 = tpu.matmul %32, %33, %cst_28 {dimension_numbers = #tpu.dot_dimension_numbers<[1], [0], [0], [1], [0, 0, 1, 1], [], []>} : vector<16x128xbf16>, vector<128x128xbf16>, vector<16x128xf32> -> vector<16x128xf32>
    %36 = vector.broadcast %34 : vector<1x128xf32> to vector<16x128xf32>
    %37 = arith.addf %35, %36 : vector<16x128xf32>
    %cst_29 = arith.constant 0.000000e+00 : f32
    %38 = vector.broadcast %cst_29 : f32 to vector<16x128xf32>
    %39 = arith.maximumf %37, %38 : vector<16x128xf32>
    %40 = arith.truncf %39 : vector<16x128xf32> to vector<16x128xbf16>
    %c0_30 = arith.constant 0 : index
    %c0_31 = arith.constant 0 : index
    %41 = vector.load %arg12[%c0_30, %c0_31] : memref<128x128xbf16, #tpu.memory_space<vmem>>, vector<128x128xbf16>
    %c0_32 = arith.constant 0 : index
    %c0_33 = arith.constant 0 : index
    %42 = vector.load %arg13[%c0_32, %c0_33] : memref<1x128xf32, #tpu.memory_space<vmem>>, vector<1x128xf32>
    %cst_34 = arith.constant dense<0.000000e+00> : vector<16x128xf32>
    %43 = tpu.matmul %40, %41, %cst_34 {dimension_numbers = #tpu.dot_dimension_numbers<[1], [0], [0], [1], [0, 0, 1, 1], [], []>} : vector<16x128xbf16>, vector<128x128xbf16>, vector<16x128xf32> -> vector<16x128xf32>
    %44 = vector.broadcast %42 : vector<1x128xf32> to vector<16x128xf32>
    %45 = arith.addf %43, %44 : vector<16x128xf32>
    %cst_35 = arith.constant 0.000000e+00 : f32
    %46 = vector.broadcast %cst_35 : f32 to vector<16x128xf32>
    %47 = arith.maximumf %45, %46 : vector<16x128xf32>
    %48 = arith.truncf %47 : vector<16x128xf32> to vector<16x128xbf16>
    %c0_36 = arith.constant 0 : index
    %c0_37 = arith.constant 0 : index
    %49 = vector.load %arg14[%c0_36, %c0_37] : memref<128x256xbf16, #tpu.memory_space<vmem>>, vector<128x256xbf16>
    %c0_38 = arith.constant 0 : index
    %c0_39 = arith.constant 0 : index
    %50 = vector.load %arg15[%c0_38, %c0_39] : memref<1x256xf32, #tpu.memory_space<vmem>>, vector<1x256xf32>
    %cst_40 = arith.constant dense<0.000000e+00> : vector<16x256xf32>
    %51 = tpu.matmul %48, %49, %cst_40 {dimension_numbers = #tpu.dot_dimension_numbers<[1], [0], [0], [1], [0, 0, 1, 1], [], []>} : vector<16x128xbf16>, vector<128x256xbf16>, vector<16x256xf32> -> vector<16x256xf32>
    %52 = vector.broadcast %50 : vector<1x256xf32> to vector<16x256xf32>
    %53 = arith.addf %51, %52 : vector<16x256xf32>
    %cst_41 = arith.constant 0.000000e+00 : f32
    %54 = vector.broadcast %cst_41 : f32 to vector<16x256xf32>
    %55 = arith.maximumf %53, %54 : vector<16x256xf32>
    %56 = arith.truncf %55 : vector<16x256xf32> to vector<16x256xbf16>
    %c0_42 = arith.constant 0 : index
    %c0_43 = arith.constant 0 : index
    %57 = vector.load %arg16[%c0_42, %c0_43] : memref<256x512xbf16, #tpu.memory_space<vmem>>, vector<256x512xbf16>
    %c0_44 = arith.constant 0 : index
    %c0_45 = arith.constant 0 : index
    %58 = vector.load %arg17[%c0_44, %c0_45] : memref<1x512xf32, #tpu.memory_space<vmem>>, vector<1x512xf32>
    %cst_46 = arith.constant dense<0.000000e+00> : vector<16x512xf32>
    %59 = tpu.matmul %56, %57, %cst_46 {dimension_numbers = #tpu.dot_dimension_numbers<[1], [0], [0], [1], [0, 0, 1, 1], [], []>} : vector<16x256xbf16>, vector<256x512xbf16>, vector<16x512xf32> -> vector<16x512xf32>
    %60 = vector.broadcast %58 : vector<1x512xf32> to vector<16x512xf32>
    %61 = arith.addf %59, %60 : vector<16x512xf32>
    %cst_47 = arith.constant 0.000000e+00 : f32
    %62 = vector.broadcast %cst_47 : f32 to vector<16x512xf32>
    %63 = arith.maximumf %61, %62 : vector<16x512xf32>
    %64 = arith.truncf %63 : vector<16x512xf32> to vector<16x512xbf16>
    %c0_48 = arith.constant 0 : index
    %c0_49 = arith.constant 0 : index
    %65 = vector.load %arg18[%c0_48, %c0_49] : memref<512x896xbf16, #tpu.memory_space<vmem>>, vector<512x896xbf16>
    %c0_50 = arith.constant 0 : index
    %c0_51 = arith.constant 0 : index
    %66 = vector.load %arg19[%c0_50, %c0_51] : memref<1x896xf32, #tpu.memory_space<vmem>>, vector<1x896xf32>
    %cst_52 = arith.constant dense<0.000000e+00> : vector<16x896xf32>
    %67 = tpu.matmul %64, %65, %cst_52 {dimension_numbers = #tpu.dot_dimension_numbers<[1], [0], [0], [1], [0, 0, 1, 1], [], []>} : vector<16x512xbf16>, vector<512x896xbf16>, vector<16x896xf32> -> vector<16x896xf32>
    %68 = vector.broadcast %66 : vector<1x896xf32> to vector<16x896xf32>
    %69 = arith.addf %67, %68 : vector<16x896xf32>
    %70 = arith.truncf %69 : vector<16x896xf32> to vector<16x896xbf16>
    %c0_53 = arith.constant 0 : index
    %c0_54 = arith.constant 0 : index
    %71 = vector.load %arg20[%c0_53, %c0_54] : memref<16x896xbf16, #tpu.memory_space<vmem>>, vector<16x896xbf16>
    tpu.vector_store %arg20[%c0_53, %c0_54], %70 {strides = array<i32>} : memref<16x896xbf16, #tpu.memory_space<vmem>>, vector<16x896xbf16>,
    return
  }
  func.func @transform_0(%arg0: i32) -> (i32, i32) {
    %c0_i32 = arith.constant 0 : i32
    %c0_i32_0 = arith.constant 0 : i32
    return %arg0, %c0_i32 : i32, i32
  }
  func.func @transform_1(%arg0: i32) -> (i32, i32) {
    %c0_i32 = arith.constant 0 : i32
    %c0_i32_0 = arith.constant 0 : i32
    %c0_i32_1 = arith.constant 0 : i32
    return %c0_i32, %c0_i32_0 : i32, i32
  }
  func.func @transform_2(%arg0: i32) -> (i32, i32) {
    %c0_i32 = arith.constant 0 : i32
    %c0_i32_0 = arith.constant 0 : i32
    %c0_i32_1 = arith.constant 0 : i32
    return %c0_i32, %c0_i32_0 : i32, i32
  }
  func.func @transform_3(%arg0: i32) -> (i32, i32) {
    %c0_i32 = arith.constant 0 : i32
    %c0_i32_0 = arith.constant 0 : i32
    %c0_i32_1 = arith.constant 0 : i32
    return %c0_i32, %c0_i32_0 : i32, i32
  }
  func.func @transform_4(%arg0: i32) -> (i32, i32) {
    %c0_i32 = arith.constant 0 : i32
    %c0_i32_0 = arith.constant 0 : i32
    %c0_i32_1 = arith.constant 0 : i32
    return %c0_i32, %c0_i32_0 : i32, i32
  }
  func.func @transform_5(%arg0: i32) -> (i32, i32) {
    %c0_i32 = arith.constant 0 : i32
    %c0_i32_0 = arith.constant 0 : i32
    %c0_i32_1 = arith.constant 0 : i32
    return %c0_i32, %c0_i32_0 : i32, i32
  }
  func.func @transform_6(%arg0: i32) -> (i32, i32) {
    %c0_i32 = arith.constant 0 : i32
    %c0_i32_0 = arith.constant 0 : i32
    %c0_i32_1 = arith.constant 0 : i32
    return %c0_i32, %c0_i32_0 : i32, i32
  }
  func.func @transform_7(%arg0: i32) -> (i32, i32) {
    %c0_i32 = arith.constant 0 : i32
    %c0_i32_0 = arith.constant 0 : i32
    %c0_i32_1 = arith.constant 0 : i32
    return %c0_i32, %c0_i32_0 : i32, i32
  }
  func.func @transform_8(%arg0: i32) -> (i32, i32) {
    %c0_i32 = arith.constant 0 : i32
    %c0_i32_0 = arith.constant 0 : i32
    %c0_i32_1 = arith.constant 0 : i32
    return %c0_i32, %c0_i32_0 : i32, i32
  }
  func.func @transform_9(%arg0: i32) -> (i32, i32) {
    %c0_i32 = arith.constant 0 : i32
    %c0_i32_0 = arith.constant 0 : i32
    %c0_i32_1 = arith.constant 0 : i32
    return %c0_i32, %c0_i32_0 : i32, i32
  }
  func.func @transform_10(%arg0: i32) -> (i32, i32) {
    %c0_i32 = arith.constant 0 : i32
    %c0_i32_0 = arith.constant 0 : i32
    %c0_i32_1 = arith.constant 0 : i32
    return %c0_i32, %c0_i32_0 : i32, i32
  }
  func.func @transform_11(%arg0: i32) -> (i32, i32) {
    %c0_i32 = arith.constant 0 : i32
    %c0_i32_0 = arith.constant 0 : i32
    %c0_i32_1 = arith.constant 0 : i32
    return %c0_i32, %c0_i32_0 : i32, i32
  }
  func.func @transform_12(%arg0: i32) -> (i32, i32) {
    %c0_i32 = arith.constant 0 : i32
    %c0_i32_0 = arith.constant 0 : i32
    %c0_i32_1 = arith.constant 0 : i32
    return %c0_i32, %c0_i32_0 : i32, i32
  }
  func.func @transform_13(%arg0: i32) -> (i32, i32) {
    %c0_i32 = arith.constant 0 : i32
    %c0_i32_0 = arith.constant 0 : i32
    %c0_i32_1 = arith.constant 0 : i32
    return %c0_i32, %c0_i32_0 : i32, i32
  }
  func.func @transform_14(%arg0: i32) -> (i32, i32) {
    %c0_i32 = arith.constant 0 : i32
    %c0_i32_0 = arith.constant 0 : i32
    %c0_i32_1 = arith.constant 0 : i32
    return %c0_i32, %c0_i32_0 : i32, i32
  }
  func.func @transform_15(%arg0: i32) -> (i32, i32) {
    %c0_i32 = arith.constant 0 : i32
    %c0_i32_0 = arith.constant 0 : i32
    %c0_i32_1 = arith.constant 0 : i32
    return %c0_i32, %c0_i32_0 : i32, i32
  }
  func.func @transform_16(%arg0: i32) -> (i32, i32) {
    %c0_i32 = arith.constant 0 : i32
    %c0_i32_0 = arith.constant 0 : i32
    %c0_i32_1 = arith.constant 0 : i32
    return %c0_i32, %c0_i32_0 : i32, i32
  }
  func.func @transform_17(%arg0: i32) -> (i32, i32) {
    %c0_i32 = arith.constant 0 : i32
    %c0_i32_0 = arith.constant 0 : i32
    %c0_i32_1 = arith.constant 0 : i32
    return %c0_i32, %c0_i32_0 : i32, i32
  }
  func.func @transform_18(%arg0: i32) -> (i32, i32) {
    %c0_i32 = arith.constant 0 : i32
    %c0_i32_0 = arith.constant 0 : i32
    %c0_i32_1 = arith.constant 0 : i32
    return %c0_i32, %c0_i32_0 : i32, i32
  }
  func.func @transform_19(%arg0: i32) -> (i32, i32) {
    %c0_i32 = arith.constant 0 : i32
    %c0_i32_0 = arith.constant 0 : i32
    return %arg0, %c0_i32 : i32, i32
  }
}

</mosaic_0001>

<bundles_post_ra>
// kernel: tpu_custom_call.1
= control target key start
LH: loop header
LB: loop body
LE: loop exit
PB: predicated region body
PF: predicated region fallthrough
CT: control target
= control target key end

     0   :  { %s9324_s0 = inlined_call_operand.hbm [shape: bf16[32,896], index: 0, kind: input, shape index: {}]   ;;  %s9325_s1 = inlined_call_operand.hbm [shape: bf16[896,512], index: 1, kind: input, shape index: {}]   ;;  %s9326_s2 = inlined_call_operand.vmem [shape: f32[1,512], index: 2, kind: input, shape index: {}]   ;;  %s9327_s3 = inlined_call_operand.hbm [shape: bf16[512,256], index: 3, kind: input, shape index: {}]   ;;  %s9328_s4 = inlined_call_operand.hbm [shape: f32[1,256], index: 4, kind: input, shape index: {}]   ;;  %s9329_s5 = inlined_call_operand.hbm [shape: bf16[256,128], index: 5, kind: input, shape index: {}]   ;;  %s9330_s6 = inlined_call_operand.vmem [shape: f32[1,128], index: 6, kind: input, shape index: {}]   ;;  %s9331_s7 = inlined_call_operand.hbm [shape: bf16[128,128], index: 7, kind: input, shape index: {}]   ;;  %s9332_s8 = inlined_call_operand.vmem [shape: f32[1,128], index: 8, kind: input, shape index: {}]   ;;  %s9333_s9 = inlined_call_operand.hbm [shape: bf16[128,128], index: 9, kind: input, shape index: {}]   ;;  %s9334_s10 = inlined_call_operand.vmem [shape: f32[1,128], index: 10, kind: input, shape index: {}]   ;;  %s9335_s11 = inlined_call_operand.hbm [shape: bf16[128,128], index: 11, kind: input, shape index: {}]   ;;  %s9336_s12 = inlined_call_operand.vmem [shape: f32[1,128], index: 12, kind: input, shape index: {}]   ;;  %s9337_s13 = inlined_call_operand.hbm [shape: bf16[128,256], index: 13, kind: input, shape index: {}]   ;;  %s9338_s14 = inlined_call_operand.vmem [shape: f32[1,256], index: 14, kind: input, shape index: {}]   ;;  %s9339_s15 = inlined_call_operand.hbm [shape: bf16[256,512], index: 15, kind: input, shape index: {}]   ;;  %s9340_s16 = inlined_call_operand.vmem [shape: f32[1,512], index: 16, kind: input, shape index: {}]   ;;  %s9341_s17 = inlined_call_operand.hbm [shape: bf16[512,896], index: 17, kind: input, shape index: {}]   ;;  %s9342_s18 = inlined_call_operand.vmem [shape: f32[1,896], index: 18, kind: input, shape index: {}]   ;;  %s9343_s19 = inlined_call_operand.hbm [shape: bf16[32,896], index: 19, kind: output, shape index: {}]  }
   0x1   :  { %9359 = sst [smem:[#allocation28_spill]] %s9324_s0 }
   0x2   :  { %9360 = sst [smem:[#allocation29_spill]] %s9325_s1 }
   0x3   :  { %9361 = sst [smem:[#allocation30_spill]] %s9326_s2 }
   0x4   :  { %9362 = sst [smem:[#allocation31_spill]] %s9327_s3 }
   0x5   :  { %9363 = sst [smem:[#allocation32_spill]] %s9328_s4 }
   0x6   :  { %9364 = sst [smem:[#allocation33_spill]] %s9329_s5 }
   0x7   :  { %9365 = sst [smem:[#allocation34_spill]] %s9330_s6 }
   0x8   :  { %9366 = sst [smem:[#allocation35_spill]] %s9331_s7 }
   0x9   :  { %9367 = sst [smem:[#allocation36_spill]] %s9332_s8 }
   0xa   :  { %9368 = sst [smem:[#allocation37_spill]] %s9334_s10 }
   0xb   :  { %9369 = sst [smem:[#allocation38_spill]] %s9336_s12 }
   0xc   :  { %9370 = sst [smem:[#allocation39_spill]] %s9338_s14 }
   0xd   :  { %9371 = sst [smem:[#allocation40_spill]] %s9340_s16 }
   0xe   :  { %9372 = sst [smem:[#allocation41_spill]] %s9342_s18 }
   0xf   :  { %9373 = sst [smem:[#allocation42_spill]] %s9343_s19 }
  0x10   :  { %24 = vsyncpa [#allocation3], 0 }
  0x11   :  { %26 = vsyncpa [#allocation3 + $0x1], 0 }
  0x12   :  { %27 = vsyncpa [#allocation6], 0 }
  0x13   :  { %28 = vsyncpa [#allocation9], 0 }
  0x14   :  { %29 = vsyncpa [#allocation12], 0 }
  0x15   :  { %30 = vsyncpa [#allocation15], 0 }
  0x16   :  { %31 = vsyncpa [#allocation18], 0 }
  0x17   :  { %32 = vsyncpa [#allocation4], 0 }
  0x18   :  { %34 = vsyncpa [#allocation4 + $0x1], 0  ;;  %s8744_s0 = smov 0   ;;  %s8746_s30 = smov 0  }
  0x19   :  { %s8748_s20 = smov 0   ;;  %s8750_s21 = smov 0  }
  0x1a LB: > { %s8619_s1 = smov [#allocation5]   ;;  %s8765_s2 = sadd.s32 4294967295, %s8617_s21   ;;  %s8617_s21 = sphi %s8750_s21, %s9420_s21   ;;  %s8613_s20 = sphi %s8748_s20, %s9419_s20   ;;  %s8609_s30 = sphi %s8746_s30, %s9418_s30   ;;  %s8605_s0 = sphi %s8744_s0, %s9417_s0  }
  0x1b   : > { %s487_s22 = sshll.u32 %s8619_s1, 4  ;;  %p6228_p0 = scmp.ge.s32.totalorder %s8617_s21, 1  ;;  %s8770_s22 = int_to_ptr.vmem [resolvable:$true] %s487_s22 }
  0x1c   : > { %p9348_p1 = scmp.eq.s32.totalorder %s8765_s2, 0  ;;  %p475_p2 = scmp.lt.s32.totalorder %s8617_s21, 3 }
  0x1d   : > { %s8620_s24 = smov [#allocation8]   ;;  %s8621_s26 = smov [#allocation11]  }
  0x1e   : > { %p8772_p3 = pnand %p6228_p0, %p475_p2  ;;  %s517_s25 = sshll.u32 %s8620_s24, 4  ;;  %s8785_s25 = int_to_ptr.vmem [resolvable:$true] %s517_s25 }
  0x1f   : > { %s8787_s27 = sshll.u32 %s8621_s26, 4  ;;  %s9376_s1 = sld [smem:[#allocation29_spill]]  ;;  %s544_s27 = int_to_ptr.vmem [resolvable:$true] %s8787_s27 }
  0x20   : > { %s9374_s23 = scalar_select %p8772_p3, 1, 0 }
  0x21   : > { %p7183_p5 = pneg %p8772_p3 }
  0x23   : > { %p8781_p6 = pnand %p7183_p5, %p9348_p1 }
  0x25   : > { %s8221_s19 = scalar_lea.hbm %s9376_s1, 28672  ;;  %p8797_p8 = pneg %p8781_p6 }
  0x26   : > { %p8222_p7 = scmp.ne.s32.totalorder %s9376_s1, %s8221_s19  ;;  %p8228_p11 = scmp.lt.u32.totalorder %s8221_s19, %s9376_s1 }
  0x28   : > { %p8224_p9 = pnand %p8797_p8, %p8222_p7 }
  0x2a   : > { %p8225_p10 = pneg %p8224_p9 }
  0x2c   : > { %p8230_p12 = pnand %p8228_p11, %p8225_p10 }
  0x2e   : > { %8233 = shalt.err (!%p8230_p12)
}
  0x2f   : > { %s8234_s16 = scalar_lea.vmem %s8770_s22, 28672  ;;  %p8242_p5 = scmp.lt.s32.totalorder %s8770_s22, %s8770_s22 }
  0x30   : > { %p8235_p13 = scmp.ne.s32.totalorder %s8770_s22, %s8234_s16  ;;  %p8243_p4 = scmp.lt.s32.totalorder %s8234_s16, %s8234_s16 }
  0x32   : > { %p8237_p0 = pnand %p8235_p13, %p8797_p8  ;;  %p8244_p7 = por %p8243_p4, %p8242_p5 }
  0x34   : > { %p8238_p2 = pneg %p8237_p0 }
  0x36   : > { %p8245_p9 = pnand %p8244_p7, %p8238_p2 }
  0x38   : > { %8248 = shalt.err (!%p8245_p9)
}
  0x39   : > { %s9350_s18 = smov 256   ;;  %s9351_s14 = smov 16  }
  0x3a   : > { %7186 = dma.hbm_to_vmem [thread:$0]  (!%p8781_p6), %s9376_s1, 28672, %s8770_s22, [#allocation6], %s9350_s18, %s9350_s18, %s9351_s14  }
  0x3b   : > { %s9378_s4 = sld [smem:[#allocation32_spill]] }
  0x41   : > { %s8249_s16 = scalar_lea.hbm %s9378_s4, 32 }
  0x42   : > { %p8250_p4 = scmp.ne.s32.totalorder %s9378_s4, %s8249_s16  ;;  %p8256_p12 = scmp.lt.u32.totalorder %s8249_s16, %s9378_s4 }
  0x44   : > { %p8252_p10 = pnand %p8250_p4, %p8797_p8 }
  0x46   : > { %p8253_p11 = pneg %p8252_p10 }
  0x48   : > { %p8258_p13 = pnand %p8256_p12, %p8253_p11 }
  0x4a   : > { %8261 = shalt.err (!%p8258_p13)
}
  0x4b   : > { %s8262_s22 = scalar_lea.vmem %s8785_s25, 32  ;;  %p8270_p7 = scmp.lt.s32.totalorder %s8785_s25, %s8785_s25 }
  0x4c   : > { %p8263_p0 = scmp.ne.s32.totalorder %s8785_s25, %s8262_s22  ;;  %p8271_p9 = scmp.lt.s32.totalorder %s8262_s22, %s8262_s22 }
  0x4e   : > { %p8265_p2 = pnand %p8263_p0, %p8797_p8  ;;  %p8272_p4 = por %p8271_p9, %p8270_p7 }
  0x50   : > { %p8266_p5 = pneg %p8265_p2 }
  0x52   : > { %p8273_p10 = pnand %p8272_p4, %p8266_p5 }
  0x54   : > { %8276 = shalt.err (!%p8273_p10)
}
  0x55   : > { %7192 = dma.hbm_to_vmem [thread:$0]  (!%p8781_p6), %s9378_s4, 32, %s8785_s25, [#allocation9]  }
  0x56   : > { %s9379_s7 = sld [smem:[#allocation35_spill]] }
  0x5c   : > { %s8277_s19 = scalar_lea.hbm %s9379_s7, 1024 }
  0x5d   : > { %p8278_p11 = scmp.ne.s32.totalorder %s9379_s7, %s8277_s19  ;;  %p8284_p0 = scmp.lt.u32.totalorder %s8277_s19, %s9379_s7 }
  0x5f   : > { %p8280_p12 = pnand %p8278_p11, %p8797_p8 }
  0x61   : > { %p8281_p13 = pneg %p8280_p12 }
  0x63   : > { %p8286_p2 = pnand %p8284_p0, %p8281_p13 }
  0x65   : > { %8289 = shalt.err (!%p8286_p2)
}
  0x66   : > { %s8290_s22 = scalar_lea.vmem %s544_s27, 1024  ;;  %p8298_p4 = scmp.lt.s32.totalorder %s544_s27, %s544_s27 }
  0x67   : > { %p8291_p5 = scmp.ne.s32.totalorder %s544_s27, %s8290_s22  ;;  %p8299_p10 = scmp.lt.s32.totalorder %s8290_s22, %s8290_s22 }
  0x69   : > { %p8293_p7 = pnand %p8291_p5, %p8797_p8  ;;  %p8300_p1 = por %p8299_p10, %p8298_p4 }
  0x6b   : > { %p8294_p9 = pneg %p8293_p7 }
  0x6d   : > { %p8301_p3 = pnand %p8300_p1, %p8294_p9 }
  0x6f   : > { %8304 = shalt.err (!%p8301_p3)
}
  0x70   : > { %s9353_s25 = smov 64   ;;  %s8625_s6 = smov 4  }
  0x71   : > { %7198 = dma.hbm_to_vmem [thread:$0]  (!%p8781_p6), %s9379_s7, 1024, %s544_s27, [#allocation12], %s9353_s25, %s9353_s25, %s8625_s6  }
  0x72   : > { %s8626_s12 = smov [#allocation14]   ;;  %s8627_s28 = smov [#allocation17]  }
  0x73   : > { %s575_s19 = sshll.u32 %s8626_s12, 4  ;;  %s607_s29 = sshll.u32 %s8627_s28, 4  ;;  %s576_s19 = int_to_ptr.vmem [resolvable:$true] %s575_s19  ;;  %s608_s29 = int_to_ptr.vmem [resolvable:$true] %s607_s29 }
  0x74   : > { %s8305_s22 = scalar_lea.hbm %s9335_s11, 1024 }
  0x75   : > { %p8306_p1 = scmp.ne.s32.totalorder %s9335_s11, %s8305_s22  ;;  %p8312_p12 = scmp.lt.u32.totalorder %s8305_s22, %s9335_s11 }
  0x77   : > { %p8308_p3 = pnand %p8306_p1, %p8797_p8 }
  0x79   : > { %p8309_p11 = pneg %p8308_p3 }
  0x7b   : > { %p8314_p13 = pnand %p8312_p12, %p8309_p11 }
  0x7d   : > { %8317 = shalt.err (!%p8314_p13)
}
  0x7e   : > { %s8318_s27 = scalar_lea.vmem %s576_s19, 1024  ;;  %p8326_p7 = scmp.lt.s32.totalorder %s576_s19, %s576_s19 }
  0x7f   : > { %p8319_p0 = scmp.ne.s32.totalorder %s576_s19, %s8318_s27  ;;  %p8327_p9 = scmp.lt.s32.totalorder %s8318_s27, %s8318_s27 }
  0x81   : > { %p8321_p2 = pnand %p8319_p0, %p8797_p8  ;;  %p8328_p4 = por %p8327_p9, %p8326_p7 }
  0x83   : > { %p8322_p5 = pneg %p8321_p2 }
  0x85   : > { %p8329_p10 = pnand %p8328_p4, %p8322_p5 }
  0x87   : > { %8332 = shalt.err (!%p8329_p10)
}
  0x88   : > { %7204 = dma.hbm_to_vmem [thread:$0]  (!%p8781_p6), %s9335_s11, 1024, %s576_s19, [#allocation15], %s9353_s25, %s9353_s25, %s8625_s6  }
  0x89   : > { %s8333_s8 = scalar_lea.hbm %s9339_s15, 8192 }
  0x8a   : > { %p8334_p1 = scmp.ne.s32.totalorder %s9339_s15, %s8333_s8  ;;  %p8340_p12 = scmp.lt.u32.totalorder %s8333_s8, %s9339_s15 }
  0x8c   : > { %p8336_p3 = pnand %p8334_p1, %p8797_p8 }
  0x8e   : > { %p8337_p11 = pneg %p8336_p3 }
  0x90   : > { %p8342_p13 = pnand %p8340_p12, %p8337_p11 }
  0x92   : > { %8345 = shalt.err (!%p8342_p13)
}
  0x93   : > { %s8346_s16 = scalar_lea.vmem %s608_s29, 8192  ;;  %p8354_p7 = scmp.lt.s32.totalorder %s608_s29, %s608_s29 }
  0x94   : > { %p8347_p0 = scmp.ne.s32.totalorder %s608_s29, %s8346_s16  ;;  %p8355_p9 = scmp.lt.s32.totalorder %s8346_s16, %s8346_s16 }
  0x96   : > { %p8349_p2 = pnand %p8347_p0, %p8797_p8  ;;  %p8356_p4 = por %p8355_p9, %p8354_p7 }
  0x98   : > { %p8350_p5 = pneg %p8349_p2 }
  0x9a   : > { %p8357_p10 = pnand %p8356_p4, %p8350_p5 }
  0x9c   : > { %8360 = shalt.err (!%p8357_p10)
}
  0x9d   : > { %s9380_s19 = smov 16   ;;  %s9381_s22 = smov 256  }
  0x9e   : > { %7210 = dma.hbm_to_vmem [thread:$0]  (!%p8781_p6), %s9339_s15, 8192, %s608_s29, [#allocation18], %s9381_s22, %s9381_s22, %s9380_s19  }
  0x9f   : > { %s8628_s1 = smov [#allocation7]   ;;  %s9382_s10 = sld [smem:[#allocation31_spill]] }
  0xa0   : > { %s503_s18 = sshll.u32 %s8628_s1, 4  ;;  %s504_s18 = int_to_ptr.vmem [resolvable:$true] %s503_s18 }
  0xa5   : > { %s8361_s12 = scalar_lea.hbm %s9382_s10, 8192 }
  0xa6   : > { %p8362_p1 = scmp.ne.s32.totalorder %s9382_s10, %s8361_s12  ;;  %p8368_p12 = scmp.lt.u32.totalorder %s8361_s12, %s9382_s10 }
  0xa8   : > { %p8364_p3 = pnand %p8362_p1, %p8797_p8 }
  0xaa   : > { %p8365_p11 = pneg %p8364_p3 }
  0xac   : > { %p8370_p13 = pnand %p8368_p12, %p8365_p11 }
  0xae   : > { %8373 = shalt.err (!%p8370_p13)
}
  0xaf   : > { %s8374_s29 = scalar_lea.vmem %s504_s18, 8192  ;;  %p8382_p7 = scmp.lt.s32.totalorder %s504_s18, %s504_s18 }
  0xb0   : > { %p8375_p0 = scmp.ne.s32.totalorder %s504_s18, %s8374_s29  ;;  %p8383_p9 = scmp.lt.s32.totalorder %s8374_s29, %s8374_s29 }
  0xb2   : > { %p8377_p2 = pnand %p8375_p0, %p8797_p8  ;;  %p8384_p4 = por %p8383_p9, %p8382_p7 }
  0xb4   : > { %p8378_p5 = pneg %p8377_p2 }
  0xb6   : > { %p8385_p10 = pnand %p8384_p4, %p8378_p5 }
  0xb8   : > { %8388 = shalt.err (!%p8385_p10)
}
  0xb9   : > { %s9355_s19 = smov 128   ;;  %s8630_s22 = smov 8  }
  0xba   : > { %7189 = dma.hbm_to_vmem [thread:$0]  (!%p8781_p6), %s9382_s10, 8192, %s504_s18, [#allocation6], %s9355_s19, %s9355_s19, %s8630_s22  }
  0xbb   : > { %s8631_s4 = smov [#allocation10]   ;;  %s8632_s14 = smov [#allocation13]  }
  0xbc   : > { %s527_s1 = sshll.u32 %s8631_s4, 4  ;;  %s559_s8 = sshll.u32 %s8632_s14, 4  ;;  %s528_s1 = int_to_ptr.vmem [resolvable:$true] %s527_s1  ;;  %s8929_s8 = int_to_ptr.vmem [resolvable:$true] %s559_s8 }
  0xbd   : > { %s9383_s5 = sld [smem:[#allocation33_spill]] }
  0xc3   : > { %s8389_s26 = scalar_lea.hbm %s9383_s5, 2048 }
  0xc4   : > { %p8390_p1 = scmp.ne.s32.totalorder %s9383_s5, %s8389_s26  ;;  %p8396_p12 = scmp.lt.u32.totalorder %s8389_s26, %s9383_s5 }
  0xc6   : > { %p8392_p3 = pnand %p8390_p1, %p8797_p8 }
  0xc8   : > { %p8393_p11 = pneg %p8392_p3 }
  0xca   : > { %p8398_p13 = pnand %p8396_p12, %p8393_p11 }
  0xcc   : > { %8401 = shalt.err (!%p8398_p13)
}
  0xcd   : > { %s8402_s27 = scalar_lea.vmem %s528_s1, 2048  ;;  %p8410_p7 = scmp.lt.s32.totalorder %s528_s1, %s528_s1 }
  0xce   : > { %p8403_p0 = scmp.ne.s32.totalorder %s528_s1, %s8402_s27  ;;  %p8411_p9 = scmp.lt.s32.totalorder %s8402_s27, %s8402_s27 }
  0xd0   : > { %p8405_p2 = pnand %p8403_p0, %p8797_p8  ;;  %p8412_p4 = por %p8411_p9, %p8410_p7 }
  0xd2   : > { %p8406_p5 = pneg %p8405_p2 }
  0xd4   : > { %p8413_p10 = pnand %p8412_p4, %p8406_p5 }
  0xd6   : > { %8416 = shalt.err (!%p8413_p10)
}
  0xd7   : > { %s9384_s4 = smov 64   ;;  %s8417_s16 = scalar_lea.hbm %s9333_s9, 1024 }
  0xd8   : > { %7195 = dma.hbm_to_vmem [thread:$0]  (!%p8781_p6), %s9383_s5, 2048, %s528_s1, [#allocation9], %s9384_s4, %s9384_s4, %s8625_s6  }
  0xd9   : > { %p8418_p1 = scmp.ne.s32.totalorder %s9333_s9, %s8417_s16  ;;  %p8424_p12 = scmp.lt.u32.totalorder %s8417_s16, %s9333_s9 }
  0xdb   : > { %p8420_p3 = pnand %p8418_p1, %p8797_p8 }
  0xdd   : > { %p8421_p11 = pneg %p8420_p3 }
  0xdf   : > { %p8426_p13 = pnand %p8424_p12, %p8421_p11 }
  0xe1   : > { %8429 = shalt.err (!%p8426_p13)
}
  0xe2   : > { %s8430_s1 = scalar_lea.vmem %s8929_s8, 1024  ;;  %p8438_p7 = scmp.lt.s32.totalorder %s8929_s8, %s8929_s8 }
  0xe3   : > { %p8431_p0 = scmp.ne.s32.totalorder %s8929_s8, %s8430_s1  ;;  %p8439_p9 = scmp.lt.s32.totalorder %s8430_s1, %s8430_s1 }
  0xe5   : > { %p8433_p2 = pnand %p8431_p0, %p8797_p8  ;;  %p8440_p4 = por %p8439_p9, %p8438_p7 }
  0xe7   : > { %p8434_p5 = pneg %p8433_p2 }
  0xe9   : > { %p8441_p10 = pnand %p8440_p4, %p8434_p5 }
  0xeb   : > { %8444 = shalt.err (!%p8441_p10)
}
  0xec   : > { %7201 = dma.hbm_to_vmem [thread:$0]  (!%p8781_p6), %s9333_s9, 1024, %s8929_s8, [#allocation12], %s9384_s4, %s9384_s4, %s8625_s6  }
  0xed   : > { %s8633_s28 = smov [#allocation16]   ;;  %s8634_s16 = smov [#allocation19]  }
  0xee   : > { %s591_s26 = sshll.u32 %s8633_s28, 4  ;;  %s623_s29 = sshll.u32 %s8634_s16, 4  ;;  %s592_s26 = int_to_ptr.vmem [resolvable:$true] %s591_s26  ;;  %s8978_s29 = int_to_ptr.vmem [resolvable:$true] %s623_s29 }
  0xef   : > { %s8445_s27 = scalar_lea.hbm %s9337_s13, 2048 }
  0xf0   : > { %p8446_p1 = scmp.ne.s32.totalorder %s9337_s13, %s8445_s27  ;;  %p8452_p12 = scmp.lt.u32.totalorder %s8445_s27, %s9337_s13 }
  0xf2   : > { %p8448_p3 = pnand %p8446_p1, %p8797_p8 }
  0xf4   : > { %p8449_p11 = pneg %p8448_p3 }
  0xf6   : > { %p8454_p13 = pnand %p8452_p12, %p8449_p11 }
  0xf8   : > { %8457 = shalt.err (!%p8454_p13)
}
  0xf9   : > { %s8458_s8 = scalar_lea.vmem %s592_s26, 2048  ;;  %p8466_p7 = scmp.lt.s32.totalorder %s592_s26, %s592_s26 }
  0xfa   : > { %p8459_p0 = scmp.ne.s32.totalorder %s592_s26, %s8458_s8  ;;  %p8467_p9 = scmp.lt.s32.totalorder %s8458_s8, %s8458_s8 }
  0xfc   : > { %p8461_p2 = pnand %p8459_p0, %p8797_p8  ;;  %p8468_p4 = por %p8467_p9, %p8466_p7 }
  0xfe   : > { %p8462_p5 = pneg %p8461_p2 }
 0x100   : > { %p8469_p10 = pnand %p8468_p4, %p8462_p5 }
 0x102   : > { %8472 = shalt.err (!%p8469_p10)
}
 0x103   : > { %s9385_s19 = smov 128   ;;  %s8473_s25 = scalar_lea.hbm %s9341_s17, 28672 }
 0x104   : > { %7207 = dma.hbm_to_vmem [thread:$0]  (!%p8781_p6), %s9337_s13, 2048, %s592_s26, [#allocation15], %s9385_s19, %s9385_s19, %s8630_s22  }
 0x105   : > { %p8474_p1 = scmp.ne.s32.totalorder %s9341_s17, %s8473_s25  ;;  %p8480_p12 = scmp.lt.u32.totalorder %s8473_s25, %s9341_s17 }
 0x107   : > { %p8476_p3 = pnand %p8474_p1, %p8797_p8 }
 0x109   : > { %p8477_p11 = pneg %p8476_p3 }
 0x10b   : > { %p8482_p13 = pnand %p8480_p12, %p8477_p11 }
 0x10d   : > { %8485 = shalt.err (!%p8482_p13)
}
 0x10e   : > { %s8486_s22 = scalar_lea.vmem %s8978_s29, 28672  ;;  %p8494_p7 = scmp.lt.s32.totalorder %s8978_s29, %s8978_s29 }
 0x10f   : > { %p8487_p0 = scmp.ne.s32.totalorder %s8978_s29, %s8486_s22  ;;  %p8495_p9 = scmp.lt.s32.totalorder %s8486_s22, %s8486_s22 }
 0x111   : > { %p8489_p2 = pnand %p8487_p0, %p8797_p8  ;;  %p8496_p4 = por %p8495_p9, %p8494_p7 }
 0x113   : > { %p8490_p5 = pneg %p8489_p2 }
 0x115   : > { %p8497_p10 = pnand %p8496_p4, %p8490_p5 }
 0x117   : > { %8500 = shalt.err (!%p8497_p10)
}
 0x118   : > { %s9356_s26 = smov 448   ;;  %s9357_s24 = smov 28  }
 0x119   : > { %7213 = dma.hbm_to_vmem [thread:$0]  (!%p8781_p6), %s9341_s17, 28672, %s8978_s29, [#allocation18], %s9356_s26, %s9356_s26, %s9357_s24  }
 0x11a   : > { %s6227_s19 = sadd.s32 4294967294, %s8617_s21   ;;  %s9029_s4 = sadd.s32 1, %s8617_s21  }
 0x11b   : > { %s44_s12 = ssub.s32 %s8617_s21, %s9029_s4  ;;  %s47_s28 = sadd.s32 1, %s8613_s20 }
 0x11c   : > { %p45_p8 = scmp.eq.s32.totalorder %s44_s12, 0  ;;  %p54_p1 = scmp.ne.s32.totalorder %s8613_s20, %s8609_s30 }
 0x11d   : > { %p55_p3 = scmp.eq.s32.totalorder %s8617_s21, 0  ;;  %p60_p11 = scmp.ne.s32.totalorder %s8609_s30, %s8605_s0 }
 0x11e   : > { %s9040_s3 = scalar_select %p45_p8, %s8613_s20, %s47_s28  }
 0x11f   : > { %p56_p12 = por %p55_p3, %p54_p1  ;;  %p9386_p13 = scmp.eq.s32.totalorder %s8765_s2, 0 }
 0x120   : > { %p462_p6 = scmp.eq.s32.totalorder %s8765_s2, 1  ;;  %p468_p2 = scmp.eq.s32.totalorder %s6227_s19, 1 }
 0x121   : > { %p9044_p0 = por %p9386_p13, %p60_p11  ;;  %p7232_p5 = scmp.lt.s32.totalorder %s8617_s21, 2 }
 0x122   : > { %s640_s29 = sand.u32 1, %s8613_s20   ;;  %p9051_p7 = por %p462_p6, %p54_p1 }
 0x123   : > { %p9055_p9 = por %p468_p2, %p60_p11  ;;  %s7135_s27 = smul.u32 56, %s640_s29 }
 0x124   : > { %s9388_s25 = scalar_select %p9051_p7, 1, 0 }
 0x125   : > { %s9389_s18 = scalar_select %p9055_p9, 1, 0 }
 0x126   : > { %s7136_s1 = smul.u32 896, %s8617_s21  ;;  %p9060_p4 = pnand %p7232_p5, %p56_p12 }
 0x127   : > { %s9391_s8 = sld [smem:[#allocation28_spill]]  ;;  %s644_s12 = scalar_lea.vmem [#allocation2], %s7135_s27 }
 0x128   : > { %s652_s28 = sshll.u32 %s644_s12, 4  ;;  %s9071_s26 = scalar_lea.sflag [#allocation3], %s640_s29  ;;  %s9069_s28 = int_to_ptr.vmem [resolvable:$true] %s652_s28 }
 0x129   : > { %p8503_p8 = pneg %p9060_p4 }
 0x12d   : > { %s9067_s19 = scalar_lea.hbm %s9391_s8, %s7136_s1  ;;  %s8506_s6 = scalar_lea.hbm %s9391_s8, 1792 }
 0x12e   : > { %s8501_s24 = scalar_lea.hbm %s9067_s19, 896  ;;  %p8507_p11 = scmp.lt.u32.totalorder %s9067_s19, %s9391_s8 }
 0x12f   : > { %p8502_p10 = scmp.ne.s32.totalorder %s9067_s19, %s8501_s24  ;;  %p8508_p12 = scmp.lt.u32.totalorder %s8506_s6, %s8501_s24 }
 0x130   : > { %p8510_p6 = scmp.lt.u32.totalorder %s8501_s24, %s9067_s19 }
 0x131   : > { %p8504_p1 = pnand %p8503_p8, %p8502_p10  ;;  %p8509_p13 = por %p8508_p12, %p8507_p11 }
 0x133   : > { %p8505_p3 = pneg %p8504_p1  ;;  %p8511_p2 = por %p8510_p6, %p8509_p13 }
 0x135   : > { %p8512_p5 = pnand %p8511_p2, %p8505_p3 }
 0x137   : > { %8515 = shalt.err (!%p8512_p5)
}
 0x138   : > { %s8516_s29 = scalar_lea.vmem %s9069_s28, 896  ;;  %s8637_s27 = smov [#allocation2]  }
 0x139   : > { %p8517_p10 = scmp.ne.s32.totalorder %s9069_s28, %s8516_s29  ;;  %s8521_s12 = sshll.u32 %s8637_s27, 4  ;;  %s8522_s12 = int_to_ptr.vmem [resolvable:$false] %s8521_s12 }
 0x13a   : > { %s8523_s5 = scalar_lea.vmem %s8522_s12, 1792  ;;  %p8524_p7 = scmp.lt.s32.totalorder %s9069_s28, %s8522_s12 }
 0x13b   : > { %p8519_p1 = pnand %p8517_p10, %p8503_p8  ;;  %p8525_p11 = scmp.lt.s32.totalorder %s8523_s5, %s8516_s29 }
 0x13d   : > { %p8520_p9 = pneg %p8519_p1  ;;  %p8526_p12 = por %p8525_p11, %p8524_p7 }
 0x13f   : > { %p8527_p13 = pnand %p8526_p12, %p8520_p9 }
 0x141   : > { %8530 = shalt.err (!%p8527_p13)
}
 0x142   : > { %s9392_s7 = smov 28   ;;  %s9393_s24 = smov 448  }
 0x143   : > { %7217 = dma.hbm_to_vmem [thread:$0]  (!%p9060_p4), %s9067_s19, 896, %s9069_s28, %s9071_s26, %s9393_s24, %s9393_s24, %s9392_s7  }
 0x144   : > { %p9394_p8 = scmp.ne.s32.totalorder %s9374_s23, 0 }
 0x145   : > { %s9105_s1 = sand.u32 (!%p9394_p8), 1, %s8609_s30  }
 0x146   : > { %664 = sbr.rel (%p9394_p8) target bundleno = 2836 (0xb14), region = 96  ;;  %s667_s6 = scalar_lea.sflag (!%p9394_p8), [#allocation3], %s9105_s1 }
 0x147   : > { %s7137_s22 = smul.u32 (!%p9394_p8), 56, %s9105_s1 }
 0x149   : > { %s9111_s14 = scalar_lea.vmem (!%p9394_p8), [#allocation2], %s7137_s22 }
 0x14d   : > { %8576 = dma.done.wait (%p9044_p0), %s667_s6, 896  }
 0x14e   : > { %8578 = vsyncadd (%p9044_p0), %s667_s6, 4294966400  ;;  %p9395_p7 = scmp.eq.s32.totalorder %s8765_s2, 0 }
 0x150   : > { %8580 = dma.done.wait (%p9395_p7), [#allocation6], 36864   ;;  %p9396_p9 = pmov %p9395_p7 }
 0x151   : > { %p9397_p4 = pmov %p9395_p7 }
 0x152   : > { %8582 = vsyncadd (%p9396_p9), [#allocation6], 4294930432 }
 0x153   : > { %8584 = dma.done.wait (%p9397_p4), [#allocation9], 2080   ;;  %p9398_p3 = pmov %p9397_p4 }
 0x155   : > { %8586 = vsyncadd (%p9398_p3), [#allocation9], 4294965216  ;;  %p9399_p6 = pmov %p9398_p3 }
 0x156   : > { %p9400_p2 = pmov %p9398_p3 }
 0x157   : > { %8588 = dma.done.wait (%p9399_p6), [#allocation12], 2048  }
 0x158   : > { %8590 = vsyncadd (%p9400_p2), [#allocation12], 4294965248  ;;  %p9401_p0 = pmov %p9400_p2 }
 0x15a   : > { %8592 = dma.done.wait (%p9401_p0), [#allocation15], 3072   ;;  %p9402_p5 = pmov %p9401_p0 }
 0x15b   : > { %p9403_p10 = pmov %p9401_p0 }
 0x15c   : > { %8594 = vsyncadd (%p9402_p5), [#allocation15], 4294964224 }
 0x15d   : > { %8596 = dma.done.wait (%p9403_p10), [#allocation18], 36864   ;;  %p9404_p1 = pmov %p9401_p0 }
 0x15e   : > { %v7299_v0 = vld [vmem:[#allocation5 + $0x4] ss:$16 sps:$4 sm:$0xff]   ;;  %v7301_v1 = vld [vmem:[#allocation5 + $0xc] ss:$16 sps:$4 sm:$0xff]   ;;  %v7303_v2 = vld [vmem:[#allocation5] ss:$16 sps:$4 sm:$0xff]  }
 0x15f   : > { %8598 = vsyncadd (%p9404_p1), [#allocation18], 4294930432  ;;  %2178 = vmatprep.subr.bf16.mxu0 %v7299_v0  ;;  %v7304_v3 = vld [vmem:[#allocation5 + $0x8] ss:$16 sps:$4 sm:$0xff]   ;;  %2350 = vmatprep.subr.bf16.mxu1 %v7301_v1  ;;  %v7305_v4 = vld [vmem:[#allocation5 + $0x24] ss:$16 sps:$4 sm:$0xff]  }
 0x160   : > { %2179 = vmatpush1.bf16.msra.mxu0 %v7303_v2  ;;  %2351 = vmatpush1.bf16.msra.mxu1 %v7304_v3  ;;  %v7307_v5 = vld [vmem:[#allocation5 + $0x2c] ss:$16 sps:$4 sm:$0xff]   ;;  %v7309_v6 = vld [vmem:[#allocation5 + $0x20] ss:$16 sps:$4 sm:$0xff]   ;;  %v7310_v7 = vld [vmem:[#allocation5 + $0x28] ss:$16 sps:$4 sm:$0xff]  }
 0x161   : > { %2180 = vmatprep.subr.bf16.mxu0 %v7305_v4  ;;  %2352 = vmatprep.subr.bf16.mxu1 %v7307_v5  ;;  %v7311_v8 = vld [vmem:[#allocation5 + $0x44] ss:$16 sps:$4 sm:$0xff]   ;;  %v7313_v9 = vld [vmem:[#allocation5 + $0x4c] ss:$16 sps:$4 sm:$0xff]   ;;  %v7315_v10 = vld [vmem:[#allocation5 + $0x40] ss:$16 sps:$4 sm:$0xff]  }
 0x162   : > { %v7316_v11 = vld [vmem:[#allocation5 + $0x48] ss:$16 sps:$4 sm:$0xff]   ;;  %v7317_v12 = vld [vmem:[#allocation5 + $0x64] ss:$16 sps:$4 sm:$0xff]   ;;  %v7319_v13 = vld [vmem:[#allocation5 + $0x6c] ss:$16 sps:$4 sm:$0xff]  }
 0x163   : > { %v7321_v14 = vld [vmem:[#allocation5 + $0x60] ss:$16 sps:$4 sm:$0xff]   ;;  %v7322_v15 = vld [vmem:[#allocation5 + $0x68] ss:$16 sps:$4 sm:$0xff]   ;;  %v7323_v16 = vld [vmem:[#allocation5 + $0x84] ss:$16 sps:$4 sm:$0xff]  }
 0x164   : > { %2181 = vmatpush1.bf16.msra.mxu0 %v7309_v6  ;;  %2353 = vmatpush1.bf16.msra.mxu1 %v7310_v7  ;;  %v7325_v17 = vld [vmem:[#allocation5 + $0x8c] ss:$16 sps:$4 sm:$0xff]   ;;  %v7327_v18 = vld [vmem:[#allocation5 + $0x80] ss:$16 sps:$4 sm:$0xff]   ;;  %v7328_v19 = vld [vmem:[#allocation5 + $0x88] ss:$16 sps:$4 sm:$0xff]  }
 0x165   : > { %2182 = vmatprep.subr.bf16.mxu0 %v7311_v8  ;;  %2354 = vmatprep.subr.bf16.mxu1 %v7313_v9  ;;  %v7329_v20 = vld [vmem:[#allocation5 + $0xa4] ss:$16 sps:$4 sm:$0xff]   ;;  %v7331_v21 = vld [vmem:[#allocation5 + $0xac] ss:$16 sps:$4 sm:$0xff]   ;;  %v7333_v22 = vld [vmem:[#allocation5 + $0xa0] ss:$16 sps:$4 sm:$0xff]  }
 0x166   : > { %v7334_v23 = vld [vmem:[#allocation5 + $0xa8] ss:$16 sps:$4 sm:$0xff]   ;;  %v7335_v24 = vld [vmem:[#allocation5 + $0xc4] ss:$16 sps:$4 sm:$0xff]   ;;  %v7337_v25 = vld [vmem:[#allocation5 + $0xcc] ss:$16 sps:$4 sm:$0xff]  }
 0x167   : > { %v7339_v26 = vld [vmem:[#allocation5 + $0xc0] ss:$16 sps:$4 sm:$0xff]   ;;  %v7340_v27 = vld [vmem:[#allocation5 + $0xc8] ss:$16 sps:$4 sm:$0xff]   ;;  %v7341_v28 = vld [vmem:[#allocation5 + $0xe4] ss:$16 sps:$4 sm:$0xff]  }
 0x168   : > { %2183 = vmatpush1.bf16.msra.mxu0 %v7315_v10  ;;  %2355 = vmatpush1.bf16.msra.mxu1 %v7316_v11  ;;  %v7343_v29 = vld [vmem:[#allocation5 + $0xec] ss:$16 sps:$4 sm:$0xff]   ;;  %v7345_v30 = vld [vmem:[#allocation5 + $0xe0] ss:$16 sps:$4 sm:$0xff]   ;;  %v7346_v31 = vld [vmem:[#allocation5 + $0xe8] ss:$16 sps:$4 sm:$0xff]  }
 0x169   : > { %2184 = vmatprep.subr.bf16.mxu0 %v7317_v12  ;;  %2356 = vmatprep.subr.bf16.mxu1 %v7319_v13  ;;  %v7347_v32 = vld [vmem:[#allocation5 + $0x104] ss:$16 sps:$4 sm:$0xff]   ;;  %v7349_v33 = vld [vmem:[#allocation5 + $0x10c] ss:$16 sps:$4 sm:$0xff]   ;;  %v7351_v34 = vld [vmem:[#allocation5 + $0x100] ss:$16 sps:$4 sm:$0xff]  }
 0x16a   : > { %v7352_v35 = vld [vmem:[#allocation5 + $0x108] ss:$16 sps:$4 sm:$0xff]   ;;  %v7353_v36 = vld [vmem:[#allocation5 + $0x124] ss:$16 sps:$4 sm:$0xff]   ;;  %v7355_v37 = vld [vmem:[#allocation5 + $0x12c] ss:$16 sps:$4 sm:$0xff]  }
 0x16b   : > { %v7357_v38 = vld [vmem:[#allocation5 + $0x120] ss:$16 sps:$4 sm:$0xff]   ;;  %v7358_v39 = vld [vmem:[#allocation5 + $0x128] ss:$16 sps:$4 sm:$0xff]   ;;  %v7359_v40 = vld [vmem:[#allocation5 + $0x144] ss:$16 sps:$4 sm:$0xff]  }
 0x16c   : > { %2185 = vmatpush1.bf16.msra.mxu0 %v7321_v14  ;;  %2357 = vmatpush1.bf16.msra.mxu1 %v7322_v15  ;;  %v7361_v41 = vld [vmem:[#allocation5 + $0x14c] ss:$16 sps:$4 sm:$0xff]   ;;  %v7363_v42 = vld [vmem:[#allocation5 + $0x140] ss:$16 sps:$4 sm:$0xff]   ;;  %v7364_v43 = vld [vmem:[#allocation5 + $0x148] ss:$16 sps:$4 sm:$0xff]  }
 0x16d   : > { %2186 = vmatprep.subr.bf16.mxu0 %v7323_v16  ;;  %2358 = vmatprep.subr.bf16.mxu1 %v7325_v17  ;;  %v7365_v44 = vld [vmem:[#allocation5 + $0x164] ss:$16 sps:$4 sm:$0xff]   ;;  %v7367_v45 = vld [vmem:[#allocation5 + $0x16c] ss:$16 sps:$4 sm:$0xff]   ;;  %v7369_v46 = vld [vmem:[#allocation5 + $0x160] ss:$16 sps:$4 sm:$0xff]  }
 0x16e   : > { %v7370_v47 = vld [vmem:[#allocation5 + $0x168] ss:$16 sps:$4 sm:$0xff]   ;;  %v7371_v49 = vld [vmem:[#allocation5 + $0x184] ss:$16 sps:$4 sm:$0xff]   ;;  %v7373_v50 = vld [vmem:[#allocation5 + $0x18c] ss:$16 sps:$4 sm:$0xff]  }
 0x16f   : > { %v7397_v48 = vld [vmem:[%s9111_s14 + $0x4] ss:$28 sps:$4 sm:$0xff]   ;;  %s9405_s16 = sld [smem:[#allocation30_spill]]  ;;  %vm8640_vm0 = vmmov 0   ;;  %s9406_s29 = sld [smem:[#allocation34_spill]] }
 0x170   : > { %2187 = vmatpush1.bf16.msra.mxu0 %v7327_v18  ;;  %2359 = vmatpush1.bf16.msra.mxu1 %v7328_v19  ;;  %v7375_v51 = vld [vmem:[#allocation5 + $0x180] ss:$16 sps:$4 sm:$0xff]   ;;  %v7376_v52 = vld [vmem:[#allocation5 + $0x188] ss:$16 sps:$4 sm:$0xff]   ;;  %v7377_v53 = vld [vmem:[#allocation5 + $0x1a4] ss:$16 sps:$4 sm:$0xff]  }
 0x171   : > { %2188 = vmatprep.subr.bf16.mxu0 %v7329_v20  ;;  %2360 = vmatprep.subr.bf16.mxu1 %v7331_v21  ;;  %v7379_v54 = vld [vmem:[#allocation5 + $0x1ac] ss:$16 sps:$4 sm:$0xff]   ;;  %v7381_v55 = vld [vmem:[#allocation5 + $0x1a0] ss:$16 sps:$4 sm:$0xff]   ;;  %v7382_v56 = vld [vmem:[#allocation5 + $0x1a8] ss:$16 sps:$4 sm:$0xff]  }
 0x172   : > { %2210 = vmatprep.mubr.bf16.mxu0 %v7397_v48  ;;  %2382 = vmatprep.mubr.bf16.mxu1 %v7397_v48  ;;  %v7383_v57 = vld [vmem:[#allocation5 + $0x1c4] ss:$16 sps:$4 sm:$0xff]   ;;  %v7385_v58 = vld [vmem:[#allocation5 + $0x1cc] ss:$16 sps:$4 sm:$0xff]   ;;  %v7387_v59 = vld [vmem:[#allocation5 + $0x1c0] ss:$16 sps:$4 sm:$0xff]  }
 0x173   : > { %v7388_v60 = vld [vmem:[#allocation5 + $0x1c8] ss:$16 sps:$4 sm:$0xff]   ;;  %v7389_v61 = vld [vmem:[#allocation5 + $0x1e4] ss:$16 sps:$4 sm:$0xff]   ;;  %v7391_v62 = vld [vmem:[#allocation5 + $0x1ec] ss:$16 sps:$4 sm:$0xff]  }
 0x174   : > { %2189 = vmatpush1.bf16.msra.mxu0 %v7333_v22  ;;  %2361 = vmatpush1.bf16.msra.mxu1 %v7334_v23  ;;  %v7393_v63 = vld [vmem:[#allocation5 + $0x1e0] ss:$16 sps:$4 sm:$0xff]   ;;  %v7394_v0 = vld [vmem:[#allocation5 + $0x1e8] ss:$16 sps:$4 sm:$0xff]   ;;  %v7400_v1 = vld [vmem:[#allocation5 + $0x204] ss:$16 sps:$4 sm:$0xff]  }
 0x175   : > { %2190 = vmatprep.subr.bf16.mxu0 %v7335_v24  ;;  %2362 = vmatprep.subr.bf16.mxu1 %v7337_v25  ;;  %v7403_v2 = vld [vmem:[#allocation5 + $0x20c] ss:$16 sps:$4 sm:$0xff]   ;;  %v7398_v4 = vld [vmem:[#allocation5 + $0x200] ss:$16 sps:$4 sm:$0xff]   ;;  %v7401_v5 = vld [vmem:[#allocation5 + $0x208] ss:$16 sps:$4 sm:$0xff]  }
 0x176   : > { %v7395_v3 = vld [vmem:[%s9111_s14] ss:$28 sps:$4 sm:$0xff]   ;;  %s9407_s5 = sld [smem:[#allocation36_spill]]  ;;  %s9408_s6 = sld [smem:[#allocation37_spill]] }
 0x177   : > { %v7406_v6 = vld [vmem:[#allocation5 + $0x224] ss:$16 sps:$4 sm:$0xff]   ;;  %v7409_v7 = vld [vmem:[#allocation5 + $0x22c] ss:$16 sps:$4 sm:$0xff]   ;;  %v7404_v8 = vld [vmem:[#allocation5 + $0x220] ss:$16 sps:$4 sm:$0xff]  }
 0x178   : > { %2191 = vmatpush1.bf16.msra.mxu0 %v7339_v26  ;;  %2363 = vmatpush1.bf16.msra.mxu1 %v7340_v27  ;;  %v7407_v9 = vld [vmem:[#allocation5 + $0x228] ss:$16 sps:$4 sm:$0xff]   ;;  %v7412_v10 = vld [vmem:[#allocation5 + $0x244] ss:$16 sps:$4 sm:$0xff]   ;;  %v7415_v11 = vld [vmem:[#allocation5 + $0x24c] ss:$16 sps:$4 sm:$0xff]  }
 0x179   : > { %2192 = vmatprep.subr.bf16.mxu0 %v7341_v28  ;;  %2364 = vmatprep.subr.bf16.mxu1 %v7343_v29  ;;  %v7410_v12 = vld [vmem:[#allocation5 + $0x240] ss:$16 sps:$4 sm:$0xff]   ;;  %v7413_v13 = vld [vmem:[#allocation5 + $0x248] ss:$16 sps:$4 sm:$0xff]   ;;  %v7418_v14 = vld [vmem:[#allocation5 + $0x264] ss:$16 sps:$4 sm:$0xff]  }
 0x17a   : > { %v7421_v15 = vld [vmem:[#allocation5 + $0x26c] ss:$16 sps:$4 sm:$0xff]   ;;  %v7416_v16 = vld [vmem:[#allocation5 + $0x260] ss:$16 sps:$4 sm:$0xff]   ;;  %v7419_v17 = vld [vmem:[#allocation5 + $0x268] ss:$16 sps:$4 sm:$0xff]  }
 0x17b   : > { %v7424_v18 = vld [vmem:[#allocation5 + $0x284] ss:$16 sps:$4 sm:$0xff]   ;;  %v7427_v19 = vld [vmem:[#allocation5 + $0x28c] ss:$16 sps:$4 sm:$0xff]   ;;  %v7422_v20 = vld [vmem:[#allocation5 + $0x280] ss:$16 sps:$4 sm:$0xff]  }
 0x17c   : > { %2193 = vmatpush1.bf16.msra.mxu0 %v7345_v30  ;;  %2365 = vmatpush1.bf16.msra.mxu1 %v7346_v31  ;;  %v7425_v21 = vld [vmem:[#allocation5 + $0x288] ss:$16 sps:$4 sm:$0xff]   ;;  %v7430_v22 = vld [vmem:[#allocation5 + $0x2a4] ss:$16 sps:$4 sm:$0xff]   ;;  %v7433_v23 = vld [vmem:[#allocation5 + $0x2ac] ss:$16 sps:$4 sm:$0xff]  }
 0x17d   : > { %2194 = vmatprep.subr.bf16.mxu0 %v7347_v32  ;;  %2366 = vmatprep.subr.bf16.mxu1 %v7349_v33  ;;  %v7428_v24 = vld [vmem:[#allocation5 + $0x2a0] ss:$16 sps:$4 sm:$0xff]   ;;  %v7431_v25 = vld [vmem:[#allocation5 + $0x2a8] ss:$16 sps:$4 sm:$0xff]   ;;  %v7436_v26 = vld [vmem:[#allocation5 + $0x2c4] ss:$16 sps:$4 sm:$0xff]  }
 0x17e   : > { %v7439_v27 = vld [vmem:[#allocation5 + $0x2cc] ss:$16 sps:$4 sm:$0xff]   ;;  %v7434_v28 = vld [vmem:[#allocation5 + $0x2c0] ss:$16 sps:$4 sm:$0xff]   ;;  %v7437_v29 = vld [vmem:[#allocation5 + $0x2c8] ss:$16 sps:$4 sm:$0xff]  }
 0x17f   : > { %v7496_v30 = vld [vmem:[%s9111_s14 + $0xc] ss:$28 sps:$4 sm:$0xff]   ;;  %s9409_s26 = sld [smem:[#allocation38_spill]]  ;;  %s9410_s28 = sld [smem:[#allocation39_spill]] }
 0x180   : > { %2195 = vmatpush1.bf16.msra.mxu0 %v7351_v34  ;;  %2367 = vmatpush1.bf16.msra.mxu1 %v7352_v35  ;;  %v7442_v31 = vld [vmem:[#allocation5 + $0x2e4] ss:$16 sps:$4 sm:$0xff]   ;;  %v7445_v32 = vld [vmem:[#allocation5 + $0x2ec] ss:$16 sps:$4 sm:$0xff]   ;;  %v7440_v33 = vld [vmem:[#allocation5 + $0x2e0] ss:$16 sps:$4 sm:$0xff]  }
 0x181   : > { %2196 = vmatprep.subr.bf16.mxu0 %v7353_v36  ;;  %2368 = vmatprep.subr.bf16.mxu1 %v7355_v37  ;;  %v7443_v34 = vld [vmem:[#allocation5 + $0x2e8] ss:$16 sps:$4 sm:$0xff]   ;;  %v7448_v35 = vld [vmem:[#allocation5 + $0x304] ss:$16 sps:$4 sm:$0xff]   ;;  %v7451_v36 = vld [vmem:[#allocation5 + $0x30c] ss:$16 sps:$4 sm:$0xff]  }
 0x182   : > { %v7446_v37 = vld [vmem:[#allocation5 + $0x300] ss:$16 sps:$4 sm:$0xff]   ;;  %v7469_v48 = vld [vmem:[#allocation5 + $0x36c] ss:$16 sps:$4 sm:$0xff]   ;;  %s9411_s12 = sld [smem:[#allocation40_spill]]  ;;  %s9412_s24 = sld [smem:[#allocation41_spill]] }
 0x183   : > { %p9414_p12 = scmp.ne.s32.totalorder %s9388_s25, 0 }
 0x184   : > { %2197 = vmatpush1.bf16.msra.mxu0 %v7357_v38  ;;  %2369 = vmatpush1.bf16.msra.mxu1 %v7358_v39  ;;  %v7449_v38 = vld [vmem:[#allocation5 + $0x308] ss:$16 sps:$4 sm:$0xff]   ;;  %v7454_v39 = vld [vmem:[#allocation5 + $0x324] ss:$16 sps:$4 sm:$0xff]  }
 0x185   : > { %2198 = vmatprep.subr.bf16.mxu0 %v7359_v40  ;;  %2370 = vmatprep.subr.bf16.mxu1 %v7361_v41  ;;  %v7457_v40 = vld [vmem:[#allocation5 + $0x32c] ss:$16 sps:$4 sm:$0xff]   ;;  %v7452_v41 = vld [vmem:[#allocation5 + $0x320] ss:$16 sps:$4 sm:$0xff]  }
 0x188   : > { %2199 = vmatpush1.bf16.msra.mxu0 %v7363_v42  ;;  %2371 = vmatpush1.bf16.msra.mxu1 %v7364_v43  ;;  %v7455_v42 = vld [vmem:[#allocation5 + $0x328] ss:$16 sps:$4 sm:$0xff]   ;;  %v7460_v43 = vld [vmem:[#allocation5 + $0x344] ss:$16 sps:$4 sm:$0xff]  }
 0x189   : > { %2200 = vmatprep.subr.bf16.mxu0 %v7365_v44  ;;  %2372 = vmatprep.subr.bf16.mxu1 %v7367_v45  ;;  %v7463_v44 = vld [vmem:[#allocation5 + $0x34c] ss:$16 sps:$4 sm:$0xff]   ;;  %v7458_v45 = vld [vmem:[#allocation5 + $0x340] ss:$16 sps:$4 sm:$0xff]  }
 0x18c   : > { %2201 = vmatpush1.bf16.msra.mxu0 %v7369_v46  ;;  %2373 = vmatpush1.bf16.msra.mxu1 %v7370_v47  ;;  %v7461_v46 = vld [vmem:[#allocation5 + $0x348] ss:$16 sps:$4 sm:$0xff]   ;;  %v7466_v47 = vld [vmem:[#allocation5 + $0x364] ss:$16 sps:$4 sm:$0xff]  }
 0x18d   : > { %2202 = vmatprep.subr.bf16.mxu0 %v7371_v49  ;;  %2374 = vmatprep.subr.bf16.mxu1 %v7373_v50  ;;  %v7464_v49 = vld [vmem:[#allocation5 + $0x360] ss:$16 sps:$4 sm:$0xff]   ;;  %v7467_v50 = vld [vmem:[#allocation5 + $0x368] ss:$16 sps:$4 sm:$0xff]  }
 0x190   : > { %2203 = vmatpush1.bf16.msra.mxu0 %v7375_v51  ;;  %2375 = vmatpush1.bf16.msra.mxu1 %v7376_v52  ;;  %v7472_v51 = vld [vmem:[#allocation5 + $0x384] ss:$16 sps:$4 sm:$0xff]   ;;  %v7475_v52 = vld [vmem:[#allocation5 + $0x38c] ss:$16 sps:$4 sm:$0xff]  }
 0x191   : > { %2204 = vmatprep.subr.bf16.mxu0 %v7377_v53  ;;  %2376 = vmatprep.subr.bf16.mxu1 %v7379_v54  ;;  %v7470_v53 = vld [vmem:[#allocation5 + $0x380] ss:$16 sps:$4 sm:$0xff]   ;;  %v7473_v54 = vld [vmem:[#allocation5 + $0x388] ss:$16 sps:$4 sm:$0xff]  }
 0x194   : > { %2205 = vmatpush1.bf16.msra.mxu0 %v7381_v55  ;;  %2377 = vmatpush1.bf16.msra.mxu1 %v7382_v56  ;;  %v7478_v55 = vld [vmem:[#allocation5 + $0x3a4] ss:$16 sps:$4 sm:$0xff]   ;;  %v7481_v56 = vld [vmem:[#allocation5 + $0x3ac] ss:$16 sps:$4 sm:$0xff]  }
 0x195   : > { %2206 = vmatprep.subr.bf16.mxu0 %v7383_v57  ;;  %2378 = vmatprep.subr.bf16.mxu1 %v7385_v58  ;;  %v7476_v57 = vld [vmem:[#allocation5 + $0x3a0] ss:$16 sps:$4 sm:$0xff]   ;;  %v7479_v58 = vld [vmem:[#allocation5 + $0x3a8] ss:$16 sps:$4 sm:$0xff]  }
 0x198   : > { %2207 = vmatpush1.bf16.msra.mxu0 %v7387_v59  ;;  %2379 = vmatpush1.bf16.msra.mxu1 %v7388_v60  ;;  %v7484_v59 = vld [vmem:[#allocation5 + $0x3c4] ss:$16 sps:$4 sm:$0xff]   ;;  %v7487_v60 = vld [vmem:[#allocation5 + $0x3cc] ss:$16 sps:$4 sm:$0xff]  }
 0x199   : > { %2208 = vmatprep.subr.bf16.mxu0 %v7389_v61  ;;  %2380 = vmatprep.subr.bf16.mxu1 %v7391_v62  ;;  %v7482_v61 = vld [vmem:[#allocation5 + $0x3c0] ss:$16 sps:$4 sm:$0xff]   ;;  %v7485_v62 = vld [vmem:[#allocation5 + $0x3c8] ss:$16 sps:$4 sm:$0xff]  }
 0x19c   : > { %2209 = vmatpush1.bf16.msra.mxu0 %v7393_v63  ;;  %2381 = vmatpush1.bf16.msra.mxu1 %v7394_v0  ;;  %v7490_v63 = vld [vmem:[#allocation5 + $0x3e4] ss:$16 sps:$4 sm:$0xff]   ;;  %v7493_v0 = vld [vmem:[#allocation5 + $0x3ec] ss:$16 sps:$4 sm:$0xff]  }
 0x19d   : > { %2221 = vmatprep.subr.bf16.mxu0 %v7400_v1  ;;  %2393 = vmatprep.subr.bf16.mxu1 %v7403_v2  ;;  %v7488_v1 = vld [vmem:[#allocation5 + $0x3e0] ss:$16 sps:$4 sm:$0xff]   ;;  %v7491_v2 = vld [vmem:[#allocation5 + $0x3e8] ss:$16 sps:$4 sm:$0xff]  }
 0x19f   : > { %2211 = vmatmul.mubr.bf16.vlgmr.msra.gmra.mrb[0].mxu0 %v7395_v3  ;;  %2383 = vmatmul.mubr.bf16.vlgmr.msra.gmra.mrb[0].mxu1 %v7395_v3  ;;  %v7499_v3 = vld [vmem:[#allocation5 + $0x404] ss:$16 sps:$4 sm:$0xff]  }
 0x1a0   : > { %2222 = vmatpush1.bf16.msra.mxu0 %v7398_v4  ;;  %2394 = vmatpush1.bf16.msra.mxu1 %v7401_v5  ;;  %v7502_v4 = vld [vmem:[#allocation5 + $0x40c] ss:$16 sps:$4 sm:$0xff]  }
 0x1a1   : > { %2223 = vmatprep.subr.bf16.mxu0 %v7406_v6  ;;  %2395 = vmatprep.subr.bf16.mxu1 %v7409_v7  ;;  %v7494_v5 = vld [vmem:[%s9111_s14 + $0x8] ss:$28 sps:$4 sm:$0xff]  }
 0x1a2   : > { %2253 = vmatprep.mubr.bf16.mxu0 %v7496_v30  ;;  %2425 = vmatprep.mubr.bf16.mxu1 %v7496_v30  ;;  %v7497_v6 = vld [vmem:[#allocation5 + $0x400] ss:$16 sps:$4 sm:$0xff]   ;;  %v7500_v7 = vld [vmem:[#allocation5 + $0x408] ss:$16 sps:$4 sm:$0xff]   ;;  %v7538_v30 = vld [vmem:[#allocation5 + $0x4cc] ss:$16 sps:$4 sm:$0xff]  }
 0x1a4   : > { %2224 = vmatpush1.bf16.msra.mxu0 %v7404_v8  ;;  %2396 = vmatpush1.bf16.msra.mxu1 %v7407_v9  ;;  %v7505_v8 = vld [vmem:[#allocation5 + $0x424] ss:$16 sps:$4 sm:$0xff]   ;;  %v7508_v9 = vld [vmem:[#allocation5 + $0x42c] ss:$16 sps:$4 sm:$0xff]  }
 0x1a5   : > { %2225 = vmatprep.subr.bf16.mxu0 %v7412_v10  ;;  %2397 = vmatprep.subr.bf16.mxu1 %v7415_v11  ;;  %v7503_v10 = vld [vmem:[#allocation5 + $0x420] ss:$16 sps:$4 sm:$0xff]   ;;  %v7506_v11 = vld [vmem:[#allocation5 + $0x428] ss:$16 sps:$4 sm:$0xff]  }
 0x1a8   : > { %2226 = vmatpush1.bf16.msra.mxu0 %v7410_v12  ;;  %2398 = vmatpush1.bf16.msra.mxu1 %v7413_v13  ;;  %v7595_v12 = vld [vmem:[%s9111_s14 + $0x14] ss:$28 sps:$4 sm:$0xff]  }
 0x1a9   : > { %2227 = vmatprep.subr.bf16.mxu0 %v7418_v14  ;;  %2399 = vmatprep.subr.bf16.mxu1 %v7421_v15  ;;  %v7511_v13 = vld [vmem:[#allocation5 + $0x444] ss:$16 sps:$4 sm:$0xff]   ;;  %v7514_v14 = vld [vmem:[#allocation5 + $0x44c] ss:$16 sps:$4 sm:$0xff]   ;;  %v7509_v15 = vld [vmem:[#allocation5 + $0x440] ss:$16 sps:$4 sm:$0xff]  }
 0x1ac   : > { %2228 = vmatpush1.bf16.msra.mxu0 %v7416_v16  ;;  %2400 = vmatpush1.bf16.msra.mxu1 %v7419_v17  ;;  %v7512_v16 = vld [vmem:[#allocation5 + $0x448] ss:$16 sps:$4 sm:$0xff]   ;;  %v7517_v17 = vld [vmem:[#allocation5 + $0x464] ss:$16 sps:$4 sm:$0xff]  }
 0x1ad   : > { %2229 = vmatprep.subr.bf16.mxu0 %v7424_v18  ;;  %2401 = vmatprep.subr.bf16.mxu1 %v7427_v19  ;;  %v7520_v18 = vld [vmem:[#allocation5 + $0x46c] ss:$16 sps:$4 sm:$0xff]   ;;  %v7515_v19 = vld [vmem:[#allocation5 + $0x460] ss:$16 sps:$4 sm:$0xff]  }
 0x1b0   : > { %2230 = vmatpush1.bf16.msra.mxu0 %v7422_v20  ;;  %2402 = vmatpush1.bf16.msra.mxu1 %v7425_v21  ;;  %v7518_v20 = vld [vmem:[#allocation5 + $0x468] ss:$16 sps:$4 sm:$0xff]   ;;  %v7523_v21 = vld [vmem:[#allocation5 + $0x484] ss:$16 sps:$4 sm:$0xff]  }
 0x1b1   : > { %2231 = vmatprep.subr.bf16.mxu0 %v7430_v22  ;;  %2403 = vmatprep.subr.bf16.mxu1 %v7433_v23  ;;  %v7526_v22 = vld [vmem:[#allocation5 + $0x48c] ss:$16 sps:$4 sm:$0xff]   ;;  %v7521_v23 = vld [vmem:[#allocation5 + $0x480] ss:$16 sps:$4 sm:$0xff]  }
 0x1b4   : > { %2232 = vmatpush1.bf16.msra.mxu0 %v7428_v24  ;;  %2404 = vmatpush1.bf16.msra.mxu1 %v7431_v25  ;;  %v7524_v24 = vld [vmem:[#allocation5 + $0x488] ss:$16 sps:$4 sm:$0xff]   ;;  %v7529_v25 = vld [vmem:[#allocation5 + $0x4a4] ss:$16 sps:$4 sm:$0xff]  }
 0x1b5   : > { %2233 = vmatprep.subr.bf16.mxu0 %v7436_v26  ;;  %2405 = vmatprep.subr.bf16.mxu1 %v7439_v27  ;;  %v7532_v26 = vld [vmem:[#allocation5 + $0x4ac] ss:$16 sps:$4 sm:$0xff]   ;;  %v7527_v27 = vld [vmem:[#allocation5 + $0x4a0] ss:$16 sps:$4 sm:$0xff]  }
 0x1b8   : > { %2234 = vmatpush1.bf16.msra.mxu0 %v7434_v28  ;;  %2406 = vmatpush1.bf16.msra.mxu1 %v7437_v29  ;;  %v7530_v28 = vld [vmem:[#allocation5 + $0x4a8] ss:$16 sps:$4 sm:$0xff]   ;;  %v7535_v29 = vld [vmem:[#allocation5 + $0x4c4] ss:$16 sps:$4 sm:$0xff]  }
 0x1b9   : > { %2235 = vmatprep.subr.bf16.mxu0 %v7442_v31  ;;  %2407 = vmatprep.subr.bf16.mxu1 %v7445_v32  ;;  %v7533_v31 = vld [vmem:[#allocation5 + $0x4c0] ss:$16 sps:$4 sm:$0xff]   ;;  %v7536_v32 = vld [vmem:[#allocation5 + $0x4c8] ss:$16 sps:$4 sm:$0xff]  }
 0x1bc   : > { %2236 = vmatpush1.bf16.msra.mxu0 %v7440_v33  ;;  %2408 = vmatpush1.bf16.msra.mxu1 %v7443_v34  ;;  %v7541_v33 = vld [vmem:[#allocation5 + $0x4e4] ss:$16 sps:$4 sm:$0xff]   ;;  %v7544_v34 = vld [vmem:[#allocation5 + $0x4ec] ss:$16 sps:$4 sm:$0xff]  }
 0x1bd   : > { %2237 = vmatprep.subr.bf16.mxu0 %v7448_v35  ;;  %2409 = vmatprep.subr.bf16.mxu1 %v7451_v36  ;;  %v7539_v35 = vld [vmem:[#allocation5 + $0x4e0] ss:$16 sps:$4 sm:$0xff]   ;;  %v7542_v36 = vld [vmem:[#allocation5 + $0x4e8] ss:$16 sps:$4 sm:$0xff]  }
 0x1c0   : > { %2238 = vmatpush1.bf16.msra.mxu0 %v7446_v37  ;;  %2410 = vmatpush1.bf16.msra.mxu1 %v7449_v38  ;;  %v7547_v37 = vld [vmem:[#allocation5 + $0x504] ss:$16 sps:$4 sm:$0xff]   ;;  %v7550_v38 = vld [vmem:[#allocation5 + $0x50c] ss:$16 sps:$4 sm:$0xff]  }
 0x1c1   : > { %2239 = vmatprep.subr.bf16.mxu0 %v7454_v39  ;;  %2411 = vmatprep.subr.bf16.mxu1 %v7457_v40  ;;  %v7545_v39 = vld [vmem:[#allocation5 + $0x500] ss:$16 sps:$4 sm:$0xff]   ;;  %v7548_v40 = vld [vmem:[#allocation5 + $0x508] ss:$16 sps:$4 sm:$0xff]  }
 0x1c4   : > { %2240 = vmatpush1.bf16.msra.mxu0 %v7452_v41  ;;  %2412 = vmatpush1.bf16.msra.mxu1 %v7455_v42  ;;  %v7553_v41 = vld [vmem:[#allocation5 + $0x524] ss:$16 sps:$4 sm:$0xff]   ;;  %v7556_v42 = vld [vmem:[#allocation5 + $0x52c] ss:$16 sps:$4 sm:$0xff]  }
 0x1c5   : > { %2241 = vmatprep.subr.bf16.mxu0 %v7460_v43  ;;  %2413 = vmatprep.subr.bf16.mxu1 %v7463_v44  ;;  %v7551_v43 = vld [vmem:[#allocation5 + $0x520] ss:$16 sps:$4 sm:$0xff]   ;;  %v7554_v44 = vld [vmem:[#allocation5 + $0x528] ss:$16 sps:$4 sm:$0xff]  }
 0x1c8   : > { %2242 = vmatpush1.bf16.msra.mxu0 %v7458_v45  ;;  %2414 = vmatpush1.bf16.msra.mxu1 %v7461_v46  ;;  %v7559_v45 = vld [vmem:[#allocation5 + $0x544] ss:$16 sps:$4 sm:$0xff]   ;;  %v7562_v46 = vld [vmem:[#allocation5 + $0x54c] ss:$16 sps:$4 sm:$0xff]  }
 0x1c9   : > { %2243 = vmatprep.subr.bf16.mxu0 %v7466_v47  ;;  %2415 = vmatprep.subr.bf16.mxu1 %v7469_v48  ;;  %v7557_v47 = vld [vmem:[#allocation5 + $0x540] ss:$16 sps:$4 sm:$0xff]   ;;  %v7560_v48 = vld [vmem:[#allocation5 + $0x548] ss:$16 sps:$4 sm:$0xff]  }
 0x1cc   : > { %2244 = vmatpush1.bf16.msra.mxu0 %v7464_v49  ;;  %2416 = vmatpush1.bf16.msra.mxu1 %v7467_v50  ;;  %v7565_v49 = vld [vmem:[#allocation5 + $0x564] ss:$16 sps:$4 sm:$0xff]   ;;  %v7568_v50 = vld [vmem:[#allocation5 + $0x56c] ss:$16 sps:$4 sm:$0xff]  }
 0x1cd   : > { %2245 = vmatprep.subr.bf16.mxu0 %v7472_v51  ;;  %2417 = vmatprep.subr.bf16.mxu1 %v7475_v52  ;;  %v7563_v51 = vld [vmem:[#allocation5 + $0x560] ss:$16 sps:$4 sm:$0xff]   ;;  %v7566_v52 = vld [vmem:[#allocation5 + $0x568] ss:$16 sps:$4 sm:$0xff]  }
 0x1d0   : > { %2246 = vmatpush1.bf16.msra.mxu0 %v7470_v53  ;;  %2418 = vmatpush1.bf16.msra.mxu1 %v7473_v54  ;;  %v7571_v53 = vld [vmem:[#allocation5 + $0x584] ss:$16 sps:$4 sm:$0xff]   ;;  %v7574_v54 = vld [vmem:[#allocation5 + $0x58c] ss:$16 sps:$4 sm:$0xff]  }
 0x1d1   : > { %2247 = vmatprep.subr.bf16.mxu0 %v7478_v55  ;;  %2419 = vmatprep.subr.bf16.mxu1 %v7481_v56  ;;  %v7569_v55 = vld [vmem:[#allocation5 + $0x580] ss:$16 sps:$4 sm:$0xff]   ;;  %v7572_v56 = vld [vmem:[#allocation5 + $0x588] ss:$16 sps:$4 sm:$0xff]  }
 0x1d4   : > { %2248 = vmatpush1.bf16.msra.mxu0 %v7476_v57  ;;  %2420 = vmatpush1.bf16.msra.mxu1 %v7479_v58  ;;  %v7577_v57 = vld [vmem:[#allocation5 + $0x5a4] ss:$16 sps:$4 sm:$0xff]   ;;  %v7580_v58 = vld [vmem:[#allocation5 + $0x5ac] ss:$16 sps:$4 sm:$0xff]  }
 0x1d5   : > { %2249 = vmatprep.subr.bf16.mxu0 %v7484_v59  ;;  %2421 = vmatprep.subr.bf16.mxu1 %v7487_v60  ;;  %v7575_v59 = vld [vmem:[#allocation5 + $0x5a0] ss:$16 sps:$4 sm:$0xff]   ;;  %v7578_v60 = vld [vmem:[#allocation5 + $0x5a8] ss:$16 sps:$4 sm:$0xff]  }
 0x1d8   : > { %2250 = vmatpush1.bf16.msra.mxu0 %v7482_v61  ;;  %2422 = vmatpush1.bf16.msra.mxu1 %v7485_v62  ;;  %v7583_v61 = vld [vmem:[#allocation5 + $0x5c4] ss:$16 sps:$4 sm:$0xff]   ;;  %v7586_v62 = vld [vmem:[#allocation5 + $0x5cc] ss:$16 sps:$4 sm:$0xff]  }
 0x1d9   : > { %2251 = vmatprep.subr.bf16.mxu0 %v7490_v63  ;;  %2423 = vmatprep.subr.bf16.mxu1 %v7493_v0  ;;  %v7581_v63 = vld [vmem:[#allocation5 + $0x5c0] ss:$16 sps:$4 sm:$0xff]   ;;  %v7584_v0 = vld [vmem:[#allocation5 + $0x5c8] ss:$16 sps:$4 sm:$0xff]  }
 0x1dc   : > { %2252 = vmatpush1.bf16.msra.mxu0 %v7488_v1  ;;  %2424 = vmatpush1.bf16.msra.mxu1 %v7491_v2  ;;  %v7589_v1 = vld [vmem:[#allocation5 + $0x5e4] ss:$16 sps:$4 sm:$0xff]   ;;  %v7592_v2 = vld [vmem:[#allocation5 + $0x5ec] ss:$16 sps:$4 sm:$0xff]  }
 0x1dd   : > { %2264 = vmatprep.subr.bf16.mxu0 %v7499_v3  ;;  %2436 = vmatprep.subr.bf16.mxu1 %v7502_v4  ;;  %v7587_v3 = vld [vmem:[#allocation5 + $0x5e0] ss:$16 sps:$4 sm:$0xff]   ;;  %v7590_v4 = vld [vmem:[#allocation5 + $0x5e8] ss:$16 sps:$4 sm:$0xff]  }
 0x1df   : > { %2254 = vmatmul.mubr.bf16.vlgmr.msra.gmra.mrb[0].mxu0 %v7494_v5  ;;  %2426 = vmatmul.mubr.bf16.vlgmr.msra.gmra.mrb[0].mxu1 %v7494_v5  ;;  %v7598_v5 = vld [vmem:[#allocation5 + $0x604] ss:$16 sps:$4 sm:$0xff]  }
 0x1e0   : > { %2265 = vmatpush1.bf16.msra.mxu0 %v7497_v6  ;;  %2437 = vmatpush1.bf16.msra.mxu1 %v7500_v7  ;;  %v7601_v6 = vld [vmem:[#allocation5 + $0x60c] ss:$16 sps:$4 sm:$0xff]  }
 0x1e1   : > { %2266 = vmatprep.subr.bf16.mxu0 %v7505_v8  ;;  %2438 = vmatprep.subr.bf16.mxu1 %v7508_v9  ;;  %v7593_v7 = vld [vmem:[%s9111_s14 + $0x10] ss:$28 sps:$4 sm:$0xff]  }
 0x1e2   : > { %2296 = vmatprep.mubr.bf16.mxu0 %v7595_v12  ;;  %2468 = vmatprep.mubr.bf16.mxu1 %v7595_v12  ;;  %v7596_v8 = vld [vmem:[#allocation5 + $0x600] ss:$16 sps:$4 sm:$0xff]   ;;  %v7599_v9 = vld [vmem:[#allocation5 + $0x608] ss:$16 sps:$4 sm:$0xff]  }
 0x1e3   : > { %v7602_v12 = vld [vmem:[#allocation5 + $0x620] ss:$16 sps:$4 sm:$0xff]  }
 0x1e4   : > { %2267 = vmatpush1.bf16.msra.mxu0 %v7503_v10  ;;  %2439 = vmatpush1.bf16.msra.mxu1 %v7506_v11  ;;  %v7604_v10 = vld [vmem:[#allocation5 + $0x624] ss:$16 sps:$4 sm:$0xff]   ;;  %v7607_v11 = vld [vmem:[#allocation5 + $0x62c] ss:$16 sps:$4 sm:$0xff]  }
 0x1e5   : > { %2268 = vmatprep.subr.bf16.mxu0 %v7511_v13  ;;  %2440 = vmatprep.subr.bf16.mxu1 %v7514_v14  ;;  %v7605_v13 = vld [vmem:[#allocation5 + $0x628] ss:$16 sps:$4 sm:$0xff]   ;;  %v7610_v14 = vld [vmem:[#allocation5 + $0x644] ss:$16 sps:$4 sm:$0xff]  }
 0x1e8   : > { %2269 = vmatpush1.bf16.msra.mxu0 %v7509_v15  ;;  %2441 = vmatpush1.bf16.msra.mxu1 %v7512_v16  ;;  %v7613_v15 = vld [vmem:[#allocation5 + $0x64c] ss:$16 sps:$4 sm:$0xff]   ;;  %v7608_v16 = vld [vmem:[#allocation5 + $0x640] ss:$16 sps:$4 sm:$0xff]  }
 0x1e9   : > { %2270 = vmatprep.subr.bf16.mxu0 %v7517_v17  ;;  %2442 = vmatprep.subr.bf16.mxu1 %v7520_v18  ;;  %v7611_v17 = vld [vmem:[#allocation5 + $0x648] ss:$16 sps:$4 sm:$0xff]   ;;  %v8638_v18 = vmov 0  }
 0x1ec   : > { %2271 = vmatpush1.bf16.msra.mxu0 %v7515_v19  ;;  %2443 = vmatpush1.bf16.msra.mxu1 %v7518_v20  ;;  %v7616_v19 = vld [vmem:[#allocation5 + $0x664] ss:$16 sps:$4 sm:$0xff]   ;;  %v7619_v20 = vld [vmem:[#allocation5 + $0x66c] ss:$16 sps:$4 sm:$0xff]  }
 0x1ed   : > { %2272 = vmatprep.subr.bf16.mxu0 %v7523_v21  ;;  %2444 = vmatprep.subr.bf16.mxu1 %v7526_v22  ;;  %v7614_v21 = vld [vmem:[#allocation5 + $0x660] ss:$16 sps:$4 sm:$0xff]   ;;  %v7617_v22 = vld [vmem:[#allocation5 + $0x668] ss:$16 sps:$4 sm:$0xff]  }
 0x1f0   : > { %2273 = vmatpush1.bf16.msra.mxu0 %v7521_v23  ;;  %2445 = vmatpush1.bf16.msra.mxu1 %v7524_v24  ;;  %v7622_v23 = vld [vmem:[#allocation5 + $0x684] ss:$16 sps:$4 sm:$0xff]   ;;  %v7625_v24 = vld [vmem:[#allocation5 + $0x68c] ss:$16 sps:$4 sm:$0xff]  }
 0x1f1   : > { %2274 = vmatprep.subr.bf16.mxu0 %v7529_v25  ;;  %2446 = vmatprep.subr.bf16.mxu1 %v7532_v26  ;;  %v7620_v25 = vld [vmem:[#allocation5 + $0x680] ss:$16 sps:$4 sm:$0xff]   ;;  %v7623_v26 = vld [vmem:[#allocation5 + $0x688] ss:$16 sps:$4 sm:$0xff]  }
 0x1f4   : > { %2275 = vmatpush1.bf16.msra.mxu0 %v7527_v27  ;;  %2447 = vmatpush1.bf16.msra.mxu1 %v7530_v28  ;;  %v7628_v27 = vld [vmem:[#allocation5 + $0x6a4] ss:$16 sps:$4 sm:$0xff]   ;;  %v7631_v28 = vld [vmem:[#allocation5 + $0x6ac] ss:$16 sps:$4 sm:$0xff]  }
 0x1f5   : > { %2276 = vmatprep.subr.bf16.mxu0 %v7535_v29  ;;  %2448 = vmatprep.subr.bf16.mxu1 %v7538_v30  ;;  %v7626_v29 = vld [vmem:[#allocation5 + $0x6a0] ss:$16 sps:$4 sm:$0xff]   ;;  %v7629_v30 = vld [vmem:[#allocation5 + $0x6a8] ss:$16 sps:$4 sm:$0xff]  }
 0x1f8   : > { %2277 = vmatpush1.bf16.msra.mxu0 %v7533_v31  ;;  %2449 = vmatpush1.bf16.msra.mxu1 %v7536_v32  ;;  %v7634_v31 = vld [vmem:[#allocation5 + $0x6c4] ss:$16 sps:$4 sm:$0xff]   ;;  %v7637_v32 = vld [vmem:[#allocation5 + $0x6cc] ss:$16 sps:$4 sm:$0xff]  }
 0x1f9   : > { %2278 = vmatprep.subr.bf16.mxu0 %v7541_v33  ;;  %2450 = vmatprep.subr.bf16.mxu1 %v7544_v34  ;;  %v7632_v33 = vld [vmem:[#allocation5 + $0x6c0] ss:$16 sps:$4 sm:$0xff]   ;;  %v7635_v34 = vld [vmem:[#allocation5 + $0x6c8] ss:$16 sps:$4 sm:$0xff]  }
 0x1fc   : > { %2279 = vmatpush1.bf16.msra.mxu0 %v7539_v35  ;;  %2451 = vmatpush1.bf16.msra.mxu1 %v7542_v36  ;;  %v7640_v35 = vld [vmem:[#allocation5 + $0x6e4] ss:$16 sps:$4 sm:$0xff]   ;;  %v7643_v36 = vld [vmem:[#allocation5 + $0x6ec] ss:$16 sps:$4 sm:$0xff]  }
 0x1fd   : > { %2280 = vmatprep.subr.bf16.mxu0 %v7547_v37  ;;  %2452 = vmatprep.subr.bf16.mxu1 %v7550_v38  ;;  %v7638_v37 = vld [vmem:[#allocation5 + $0x6e0] ss:$16 sps:$4 sm:$0xff]   ;;  %v7641_v38 = vld [vmem:[#allocation5 + $0x6e8] ss:$16 sps:$4 sm:$0xff]  }
 0x200   : > { %2281 = vmatpush1.bf16.msra.mxu0 %v7545_v39  ;;  %2453 = vmatpush1.bf16.msra.mxu1 %v7548_v40  ;;  %v7647_v39 = vld [vmem:[#allocation7 + $0x4] ss:$8 sps:$4 sm:$0xff]  }
 0x201   : > { %2282 = vmatprep.subr.bf16.mxu0 %v7553_v41  ;;  %2454 = vmatprep.subr.bf16.mxu1 %v7556_v42  ;;  %v7644_v40 = vld [vmem:[%s9111_s14 + $0x18] ss:$28 sps:$4 sm:$0xff]   ;;  %s7138_s14 = smul.u32 896, %s8765_s2  ;;  %s8641_s2 = smov [#allocation20]  }
 0x202   : > { %v7645_v41 = vld [vmem:[#allocation7] ss:$8 sps:$4 sm:$0xff]   ;;  %v7650_v42 = vld [vmem:[#allocation7 + $0x14] ss:$8 sps:$4 sm:$0xff]   ;;  %s8535_s27 = sshll.u32 %s8641_s2, 4  ;;  %s8536_s27 = int_to_ptr.vmem [resolvable:$false] %s8535_s27 }
 0x204   : > { %2283 = vmatpush1.bf16.msra.mxu0 %v7551_v43  ;;  %2455 = vmatpush1.bf16.msra.mxu1 %v7554_v44  ;;  %v7648_v43 = vld [vmem:[#allocation7 + $0x10] ss:$8 sps:$4 sm:$0xff]   ;;  %v7653_v44 = vld [vmem:[#allocation7 + $0x24] ss:$8 sps:$4 sm:$0xff]  }
 0x205   : > { %2284 = vmatprep.subr.bf16.mxu0 %v7559_v45  ;;  %2456 = vmatprep.subr.bf16.mxu1 %v7562_v46  ;;  %v7651_v45 = vld [vmem:[#allocation7 + $0x20] ss:$8 sps:$4 sm:$0xff]   ;;  %v7656_v46 = vld [vmem:[#allocation7 + $0x34] ss:$8 sps:$4 sm:$0xff]  }
 0x208   : > { %2285 = vmatpush1.bf16.msra.mxu0 %v7557_v47  ;;  %2457 = vmatpush1.bf16.msra.mxu1 %v7560_v48  ;;  %v7654_v47 = vld [vmem:[#allocation7 + $0x30] ss:$8 sps:$4 sm:$0xff]   ;;  %v7659_v48 = vld [vmem:[#allocation7 + $0x44] ss:$8 sps:$4 sm:$0xff]  }
 0x209   : > { %2286 = vmatprep.subr.bf16.mxu0 %v7565_v49  ;;  %2458 = vmatprep.subr.bf16.mxu1 %v7568_v50  ;;  %v7657_v49 = vld [vmem:[#allocation7 + $0x40] ss:$8 sps:$4 sm:$0xff]   ;;  %v7662_v50 = vld [vmem:[#allocation7 + $0x54] ss:$8 sps:$4 sm:$0xff]  }
 0x20c   : > { %2287 = vmatpush1.bf16.msra.mxu0 %v7563_v51  ;;  %2459 = vmatpush1.bf16.msra.mxu1 %v7566_v52  ;;  %v7660_v51 = vld [vmem:[#allocation7 + $0x50] ss:$8 sps:$4 sm:$0xff]   ;;  %v7665_v52 = vld [vmem:[#allocation7 + $0x64] ss:$8 sps:$4 sm:$0xff]  }
 0x20d   : > { %2288 = vmatprep.subr.bf16.mxu0 %v7571_v53  ;;  %2460 = vmatprep.subr.bf16.mxu1 %v7574_v54  ;;  %v7663_v53 = vld [vmem:[#allocation7 + $0x60] ss:$8 sps:$4 sm:$0xff]   ;;  %v7668_v54 = vld [vmem:[#allocation7 + $0x74] ss:$8 sps:$4 sm:$0xff]  }
 0x210   : > { %2289 = vmatpush1.bf16.msra.mxu0 %v7569_v55  ;;  %2461 = vmatpush1.bf16.msra.mxu1 %v7572_v56  ;;  %v7666_v55 = vld [vmem:[#allocation7 + $0x70] ss:$8 sps:$4 sm:$0xff]   ;;  %v7671_v56 = vld [vmem:[#allocation7 + $0x84] ss:$8 sps:$4 sm:$0xff]  }
 0x211   : > { %2290 = vmatprep.subr.bf16.mxu0 %v7577_v57  ;;  %2462 = vmatprep.subr.bf16.mxu1 %v7580_v58  ;;  %v7669_v57 = vld [vmem:[#allocation7 + $0x80] ss:$8 sps:$4 sm:$0xff]   ;;  %v7674_v58 = vld [vmem:[#allocation7 + $0x94] ss:$8 sps:$4 sm:$0xff]  }
 0x214   : > { %2291 = vmatpush1.bf16.msra.mxu0 %v7575_v59  ;;  %2463 = vmatpush1.bf16.msra.mxu1 %v7578_v60  ;;  %v7672_v59 = vld [vmem:[#allocation7 + $0x90] ss:$8 sps:$4 sm:$0xff]   ;;  %v7677_v60 = vld [vmem:[#allocation7 + $0xa4] ss:$8 sps:$4 sm:$0xff]  }
 0x215   : > { %2292 = vmatprep.subr.bf16.mxu0 %v7583_v61  ;;  %2464 = vmatprep.subr.bf16.mxu1 %v7586_v62  ;;  %v7675_v61 = vld [vmem:[#allocation7 + $0xa0] ss:$8 sps:$4 sm:$0xff]   ;;  %v7680_v62 = vld [vmem:[#allocation7 + $0xb4] ss:$8 sps:$4 sm:$0xff]  }
 0x218   : > { %2293 = vmatpush1.bf16.msra.mxu0 %v7581_v63  ;;  %2465 = vmatpush1.bf16.msra.mxu1 %v7584_v0  ;;  %v7678_v63 = vld [vmem:[#allocation7 + $0xb0] ss:$8 sps:$4 sm:$0xff]   ;;  %v7683_v0 = vld [vmem:[#allocation7 + $0xc4] ss:$8 sps:$4 sm:$0xff]  }
 0x219   : > { %2294 = vmatprep.subr.bf16.mxu0 %v7589_v1  ;;  %2466 = vmatprep.subr.bf16.mxu1 %v7592_v2  ;;  %v7681_v1 = vld [vmem:[#allocation7 + $0xc0] ss:$8 sps:$4 sm:$0xff]   ;;  %v7686_v2 = vld [vmem:[#allocation7 + $0xd4] ss:$8 sps:$4 sm:$0xff]  }
 0x21c   : > { %2295 = vmatpush1.bf16.msra.mxu0 %v7587_v3  ;;  %2467 = vmatpush1.bf16.msra.mxu1 %v7590_v4  ;;  %v7684_v3 = vld [vmem:[#allocation7 + $0xd0] ss:$8 sps:$4 sm:$0xff]   ;;  %v7689_v4 = vld [vmem:[#allocation7 + $0xe4] ss:$8 sps:$4 sm:$0xff]  }
 0x21d   : > { %2307 = vmatprep.subr.bf16.mxu0 %v7598_v5  ;;  %2479 = vmatprep.subr.bf16.mxu1 %v7601_v6  ;;  %v7687_v5 = vld [vmem:[#allocation7 + $0xe0] ss:$8 sps:$4 sm:$0xff]   ;;  %v7692_v6 = vld [vmem:[#allocation7 + $0xf4] ss:$8 sps:$4 sm:$0xff]  }
 0x21f   : > { %2297 = vmatmul.mubr.bf16.vlgmr.msra.gmra.mrb[0].mxu0 %v7593_v7  ;;  %2469 = vmatmul.mubr.bf16.vlgmr.msra.gmra.mrb[0].mxu1 %v7593_v7  ;;  %v7690_v7 = vld [vmem:[#allocation7 + $0xf0] ss:$8 sps:$4 sm:$0xff]  }
 0x220   : > { %2308 = vmatpush1.bf16.msra.mxu0 %v7596_v8  ;;  %2480 = vmatpush1.bf16.msra.mxu1 %v7599_v9  ;;  %v7695_v8 = vld [vmem:[#allocation7 + $0x104] ss:$8 sps:$4 sm:$0xff]  }
 0x221   : > { %2309 = vmatprep.subr.bf16.mxu0 %v7604_v10  ;;  %2481 = vmatprep.subr.bf16.mxu1 %v7607_v11  ;;  %v7741_v9 = vld [vmem:[#allocation10 + $0x40] sm:$0xff]   ;;  %v7743_v11 = vld [vmem:[#allocation10 + $0x48] sm:$0xff]  }
 0x222   : > { %2339 = vmatprep.mubr.bf16.mxu0 %v8638_v18  ;;  %2511 = vmatprep.mubr.bf16.mxu1 %v8638_v18  ;;  %v7742_v10 = vld [vmem:[#allocation10] sm:$0xff]  }
 0x224   : > { %2310 = vmatpush1.bf16.msra.mxu0 %v7602_v12  ;;  %2482 = vmatpush1.bf16.msra.mxu1 %v7605_v13  ;;  %v7744_v12 = vld [vmem:[#allocation10 + $0x8] sm:$0xff]   ;;  %v7745_v13 = vld [vmem:[#allocation10 + $0x50] sm:$0xff]  }
 0x225   : > { %2311 = vmatprep.subr.bf16.mxu0 %v7610_v14  ;;  %2483 = vmatprep.subr.bf16.mxu1 %v7613_v15  ;;  %v7746_v14 = vld [vmem:[#allocation10 + $0x10] sm:$0xff]   ;;  %v7747_v15 = vld [vmem:[#allocation10 + $0x58] sm:$0xff]  }
 0x228   : > { %2312 = vmatpush1.bf16.msra.mxu0 %v7608_v16  ;;  %2484 = vmatpush1.bf16.msra.mxu1 %v7611_v17  ;;  %v7748_v16 = vld [vmem:[#allocation10 + $0x18] sm:$0xff]   ;;  %v7749_v17 = vld [vmem:[#allocation10 + $0x60] sm:$0xff]  }
 0x229   : > { %2313 = vmatprep.subr.bf16.mxu0 %v7616_v19  ;;  %2485 = vmatprep.subr.bf16.mxu1 %v7619_v20  ;;  %v7750_v19 = vld [vmem:[#allocation10 + $0x20] sm:$0xff]   ;;  %v7751_v20 = vld [vmem:[#allocation10 + $0x68] sm:$0xff]  }
 0x22c   : > { %2314 = vmatpush1.bf16.msra.mxu0 %v7614_v21  ;;  %2486 = vmatpush1.bf16.msra.mxu1 %v7617_v22  ;;  %v1002_v21 = vlaneseq }
 0x22d   : > { %2315 = vmatprep.subr.bf16.mxu0 %v7622_v23  ;;  %2487 = vmatprep.subr.bf16.mxu1 %v7625_v24 }
 0x22e   : > { %v9146_v22 = vshrl.u32 %v1002_v21, 7  ;;  %v7729_v21 = vld [vmem:[#allocation7 + $0x1c0] ss:$8 sps:$4 sm:$0xff]  }
 0x230   : > { %2316 = vmatpush1.bf16.msra.mxu0 %v7620_v25  ;;  %2488 = vmatpush1.bf16.msra.mxu1 %v7623_v26  ;;  %v9149_v23 = vsub.s32 0, %v9146_v22  ;;  %v9152_v24 = vsub.s32 2, %v9146_v22  ;;  %v1000_v25 = vld [vmem:[%s9405_s16] sm:$0xf]  ;;  %v9158_v26 = vsub.s32 1, %v9146_v22  ;;  %s9413_s16 = sld [smem:[#allocation42_spill]] }
 0x231   : > { %2317 = vmatprep.subr.bf16.mxu0 %v7628_v27  ;;  %2489 = vmatprep.subr.bf16.mxu1 %v7631_v28  ;;  %v9161_v27 = vsub.s32 3, %v9146_v22 }
 0x232   : > { %v1005_v28 = vrot.slane %v1000_v25, %v9149_v23 }
 0x234   : > { %2318 = vmatpush1.bf16.msra.mxu0 %v7626_v29  ;;  %2490 = vmatpush1.bf16.msra.mxu1 %v7629_v30  ;;  %v1013_v29 = vrot.slane %v1000_v25, %v9152_v24  ;;  %v1009_v30 = vrot.slane %v1000_v25, %v9158_v26 }
 0x235   : > { %2319 = vmatprep.subr.bf16.mxu0 %v7634_v31  ;;  %2491 = vmatprep.subr.bf16.mxu1 %v7637_v32  ;;  %v1017_v31 = vrot.slane %v1000_v25, %v9161_v27  ;;  %v7734_v25 = vld [vmem:[#allocation7 + $0x1d4] ss:$8 sps:$4 sm:$0xff]  }
 0x236   : > { %s9279_s19 = scalar_lea.hbm %s9413_s16, %s7138_s14 }
 0x238   : > { %2320 = vmatpush1.bf16.msra.mxu0 %v7632_v33  ;;  %2492 = vmatpush1.bf16.msra.mxu1 %v7635_v34 }
 0x239   : > { %2321 = vmatprep.subr.bf16.mxu0 %v7640_v35  ;;  %2493 = vmatprep.subr.bf16.mxu1 %v7643_v36 }
 0x23c   : > { %2322 = vmatpush1.bf16.msra.mxu0 %v7638_v37  ;;  %2494 = vmatpush1.bf16.msra.mxu1 %v7641_v38 }
 0x23d   : > { %2930 = vmatprep.subr.bf16.mxu0 %v7647_v39  ;;  %6918 = vmatprep.subr.bf16.mxu1 %v7741_v9  ;;  %v7716_v9 = vld [vmem:[#allocation7 + $0x174] ss:$8 sps:$4 sm:$0xff]  }
 0x23f   : > { %2340 = vmatmul.mubr.bf16.vlgmr.msra.gmra.mrb[0].mxu0 %v7644_v40  ;;  %2512 = vmatmul.mubr.bf16.vlgmr.msra.gmra.mrb[0].mxu1 %v7644_v40 }
 0x240   : > { %2931 = vmatpush1.bf16.msra.mxu0 %v7645_v41  ;;  %6919 = vmatpush3.bf16.msra.mxu1 %v7742_v10  ;;  %v7714_v10 = vld [vmem:[#allocation7 + $0x170] ss:$8 sps:$4 sm:$0xff]  }
 0x241   : > { %2932 = vmatprep.subr.bf16.mxu0 %v7650_v42  ;;  %6920 = vmatprep.subr.bf16.mxu1 %v7743_v11  ;;  %v7719_v11 = vld [vmem:[#allocation7 + $0x184] ss:$8 sps:$4 sm:$0xff]  }
 0x244   : > { %2933 = vmatpush1.bf16.msra.mxu0 %v7648_v43  ;;  %6921 = vmatpush3.bf16.msra.mxu1 %v7744_v12  ;;  %v7717_v12 = vld [vmem:[#allocation7 + $0x180] ss:$8 sps:$4 sm:$0xff]  }
 0x245   : > { %2934 = vmatprep.subr.bf16.mxu0 %v7653_v44  ;;  %6922 = vmatprep.subr.bf16.mxu1 %v7745_v13  ;;  %v7722_v13 = vld [vmem:[#allocation7 + $0x194] ss:$8 sps:$4 sm:$0xff]  }
 0x248   : > { %2935 = vmatpush1.bf16.msra.mxu0 %v7651_v45  ;;  %6923 = vmatpush3.bf16.msra.mxu1 %v7746_v14  ;;  %v7720_v14 = vld [vmem:[#allocation7 + $0x190] ss:$8 sps:$4 sm:$0xff]  }
 0x249   : > { %2936 = vmatprep.subr.bf16.mxu0 %v7656_v46  ;;  %6924 = vmatprep.subr.bf16.mxu1 %v7747_v15  ;;  %v7725_v15 = vld [vmem:[#allocation7 + $0x1a4] ss:$8 sps:$4 sm:$0xff]  }
 0x24c   : > { %2937 = vmatpush1.bf16.msra.mxu0 %v7654_v47  ;;  %6925 = vmatpush3.bf16.msra.mxu1 %v7748_v16  ;;  %v7723_v16 = vld [vmem:[#allocation7 + $0x1a0] ss:$8 sps:$4 sm:$0xff]  }
 0x24d   : > { %2938 = vmatprep.subr.bf16.mxu0 %v7659_v48  ;;  %6926 = vmatprep.subr.bf16.mxu1 %v7749_v17  ;;  %v7728_v17 = vld [vmem:[#allocation7 + $0x1b4] ss:$8 sps:$4 sm:$0xff]  }
 0x250   : > { %2939 = vmatpush1.bf16.msra.mxu0 %v7657_v49  ;;  %6927 = vmatpush3.bf16.msra.mxu1 %v7750_v19  ;;  %v7726_v19 = vld [vmem:[#allocation7 + $0x1b0] ss:$8 sps:$4 sm:$0xff]  }
 0x251   : > { %2940 = vmatprep.subr.bf16.mxu0 %v7662_v50  ;;  %6928 = vmatprep.subr.bf16.mxu1 %v7751_v20  ;;  %v7731_v20 = vld [vmem:[#allocation7 + $0x1c4] ss:$8 sps:$4 sm:$0xff]  }
 0x254   : > { %2941 = vmatpush1.bf16.msra.mxu0 %v7660_v51 }
 0x255   : > { %2942 = vmatprep.subr.bf16.mxu0 %v7665_v52 }
 0x258   : > { %2943 = vmatpush1.bf16.msra.mxu0 %v7663_v53 }
 0x259   : > { %2944 = vmatprep.subr.bf16.mxu0 %v7668_v54 }
 0x25c   : > { %2945 = vmatpush1.bf16.msra.mxu0 %v7666_v55 }
 0x25d   : > { %2946 = vmatprep.subr.bf16.mxu0 %v7671_v56 }
 0x260   : > { %2947 = vmatpush1.bf16.msra.mxu0 %v7669_v57 }
 0x261   : > { %2948 = vmatprep.subr.bf16.mxu0 %v7674_v58 }
 0x264   : > { %2949 = vmatpush1.bf16.msra.mxu0 %v7672_v59 }
 0x265   : > { %2950 = vmatprep.subr.bf16.mxu0 %v7677_v60  ;;  %v7693_v60 = vld [vmem:[#allocation7 + $0x100] ss:$8 sps:$4 sm:$0xff]  }
 0x268   : > { %2951 = vmatpush1.bf16.msra.mxu0 %v7675_v61  ;;  %v7698_v61 = vld [vmem:[#allocation7 + $0x114] ss:$8 sps:$4 sm:$0xff]  }
 0x269   : > { %2952 = vmatprep.subr.bf16.mxu0 %v7680_v62  ;;  %v7696_v62 = vld [vmem:[#allocation7 + $0x110] ss:$8 sps:$4 sm:$0xff]  }
 0x26c   : > { %2953 = vmatpush1.bf16.msra.mxu0 %v7678_v63  ;;  %v7701_v63 = vld [vmem:[#allocation7 + $0x124] ss:$8 sps:$4 sm:$0xff]  }
 0x26d   : > { %2954 = vmatprep.subr.bf16.mxu0 %v7683_v0  ;;  %v7699_v0 = vld [vmem:[#allocation7 + $0x120] ss:$8 sps:$4 sm:$0xff]  }
 0x270   : > { %2955 = vmatpush1.bf16.msra.mxu0 %v7681_v1  ;;  %v7704_v1 = vld [vmem:[#allocation7 + $0x134] ss:$8 sps:$4 sm:$0xff]  }
 0x271   : > { %2956 = vmatprep.subr.bf16.mxu0 %v7686_v2  ;;  %v7702_v2 = vld [vmem:[#allocation7 + $0x130] ss:$8 sps:$4 sm:$0xff]  }
 0x274   : > { %2957 = vmatpush1.bf16.msra.mxu0 %v7684_v3  ;;  %v7707_v3 = vld [vmem:[#allocation7 + $0x144] ss:$8 sps:$4 sm:$0xff]  }
 0x275   : > { %2958 = vmatprep.subr.bf16.mxu0 %v7689_v4  ;;  %v7705_v4 = vld [vmem:[#allocation7 + $0x140] ss:$8 sps:$4 sm:$0xff]  }
 0x278   : > { %2959 = vmatpush1.bf16.msra.mxu0 %v7687_v5  ;;  %v7710_v5 = vld [vmem:[#allocation7 + $0x154] ss:$8 sps:$4 sm:$0xff]  }
 0x279   : > { %2960 = vmatprep.subr.bf16.mxu0 %v7692_v6  ;;  %v7708_v6 = vld [vmem:[#allocation7 + $0x150] ss:$8 sps:$4 sm:$0xff]  }
 0x27c   : > { %2961 = vmatpush1.bf16.msra.mxu0 %v7690_v7  ;;  %v7713_v7 = vld [vmem:[#allocation7 + $0x164] ss:$8 sps:$4 sm:$0xff]  }
 0x27d   : > { %2973 = vmatprep.subr.bf16.mxu0 %v7695_v8  ;;  %v7711_v8 = vld [vmem:[#allocation7 + $0x160] ss:$8 sps:$4 sm:$0xff]  }
 0x312   : > { %v2341_v32 = vpop.f32.mrb[0].mxu0  ;;  %v2513_v33 = vpop.f32.mrb[0].mxu1 }
 0x313   : > { %v7071_v34 = vadd.f32 %v2341_v32, %v1005_v28  ;;  %v7075_v35 = vadd.f32 %v2513_v33, %v1013_v29  ;;  %v2343_v36 = vpop.f32.mrb[1].mxu0  ;;  %v2515_v37 = vpop.f32.mrb[1].mxu1  ;;  %v7738_v32 = vld [vmem:[#allocation7 + $0x1f0] ss:$8 sps:$4 sm:$0xff]  }
 0x314   : > { %v7072_v38 = vadd.f32 %v2343_v36, %v1009_v30  ;;  %v7076_v39 = vadd.f32 %v2515_v37, %v1017_v31  ;;  %v2345_v40 = vpop.f32.mrb[2].mxu0  ;;  %v2517_v41 = vpop.f32.mrb[2].mxu1  ;;  %v7752_v33 = vld [vmem:[#allocation10 + $0x28] sm:$0xff]   ;;  %v7755_v36 = vld [vmem:[#allocation10 + $0x78] sm:$0xff]  }
 0x315   : > { %v7073_v42 = vadd.f32 %v2345_v40, %v1005_v28  ;;  %v7077_v43 = vadd.f32 %v2517_v41, %v1013_v29  ;;  %v2347_v44 = vpop.f32.mrb[3].mxu0  ;;  %v2519_v45 = vpop.f32.mrb[3].mxu1  ;;  %v2522_v48 = vmax.f32 %v7071_v34, 0.0  ;;  %v2524_v49 = vmax.f32 %v7075_v35, 0.0  ;;  %v7732_v28 = vld [vmem:[#allocation7 + $0x1d0] ss:$8 sps:$4 sm:$0xff]   ;;  %6929 = vmatpush3.bf16.msra.mxu1 %v7752_v33 }
 0x316   : > { %v7074_v46 = vadd.f32 %v2347_v44, %v1009_v30  ;;  %v7078_v47 = vadd.f32 %v2519_v45, %v1017_v31  ;;  %v2523_v52 = vmax.f32 %v7072_v38, 0.0  ;;  %v2525_v53 = vmax.f32 %v7076_v39, 0.0  ;;  %v7737_v29 = vld [vmem:[#allocation7 + $0x1e4] ss:$8 sps:$4 sm:$0xff]   ;;  %v7735_v30 = vld [vmem:[#allocation7 + $0x1e0] ss:$8 sps:$4 sm:$0xff]  }
 0x317   : > { %v2526_v50 = vmax.f32 %v7073_v42, 0.0  ;;  %v2528_v51 = vmax.f32 %v7077_v43, 0.0  ;;  %v7740_v31 = vld [vmem:[#allocation7 + $0x1f4] ss:$8 sps:$4 sm:$0xff]   ;;  %v8639_v38 = vmov 0.0  }
 0x318   : > { %v2527_v54 = vmax.f32 %v7074_v46, 0.0  ;;  %v2529_v55 = vmax.f32 %v7078_v47, 0.0  ;;  %v7753_v34 = vld [vmem:[#allocation10 + $0x70] sm:$0xff]   ;;  %v7756_v37 = vld [vmem:[#allocation10 + $0x38] sm:$0xff]  }
 0x319   : > { %v2530_v56 = vpack.c.bf16 %v2526_v50, %v2522_v48  ;;  %v9167_v57 = vpack.c.bf16 %v2528_v51, %v2524_v49  ;;  %v7754_v35 = vld [vmem:[#allocation10 + $0x30] sm:$0xff]   ;;  %6930 = vmatprep.subr.bf16.mxu1 %v7753_v34  ;;  %v2598_v39 = vld [vmem:[#allocation8] sm:$0x3]  ;;  %v7773_v34 = vld [vmem:[#allocation14] sm:$0xff]  }
 0x31a   : > { %v2531_v58 = vpack.c.bf16 %v2527_v54, %v2523_v52  ;;  %v2533_v59 = vpack.c.bf16 %v2529_v55, %v2525_v53  ;;  %6931 = vmatpush3.bf16.msra.mxu1 %v7754_v35  ;;  %v2603_v40 = vrot.slane %v2598_v39, %v9149_v23  ;;  %v2607_v41 = vrot.slane %v2598_v39, %v9158_v26  ;;  %v7757_v55 = vld [vmem:[#allocation11] sm:$0xff]   ;;  %v7776_v39 = vld [vmem:[#allocation14 + $0x18] sm:$0xff]  }
 0x31b   : > { %6932 = vmatprep.subr.bf16.mxu1 %v7755_v36  ;;  %v7774_v36 = vld [vmem:[#allocation14 + $0x8] sm:$0xff]  }
 0x31c   : > { %2962 = vmatprep.mubr.bf16.mxu0 %v2531_v58  ;;  %v7760_v58 = vld [vmem:[#allocation11 + $0x18] sm:$0xff]  }
 0x31d   : > { %2963 = vmatmul.mubr.bf16.vlgmr.msra.gmra.mrb[4].mxu0 %v2530_v56  ;;  %v7758_v56 = vld [vmem:[#allocation11 + $0x8] sm:$0xff]  }
 0x31e   : > { %2974 = vmatpush1.bf16.msra.mxu0 %v7693_v60  ;;  %3005 = vmatprep.mubr.bf16.mxu0 %v2533_v59  ;;  %v7761_v59 = vld [vmem:[#allocation11 + $0x20] sm:$0xff]   ;;  %v7762_v60 = vld [vmem:[#allocation11 + $0x28] sm:$0xff]  }
 0x31f   : > { %2975 = vmatprep.subr.bf16.mxu0 %v7698_v61  ;;  %6933 = vmatpush3.bf16.msra.mxu1 %v7756_v37  ;;  %v7763_v61 = vld [vmem:[#allocation11 + $0x30] sm:$0xff]  }
 0x320   : > { %7011 = vmatprep.subr.bf16.mxu1 %v8639_v38  ;;  %v7775_v37 = vld [vmem:[#allocation14 + $0x10] sm:$0xff]  }
 0x322   : > { %2976 = vmatpush1.bf16.msra.mxu0 %v7696_v62  ;;  %v7764_v62 = vld [vmem:[#allocation11 + $0x38] sm:$0xff]  }
 0x323   : > { %2977 = vmatprep.subr.bf16.mxu0 %v7701_v63 }
 0x326   : > { %2978 = vmatpush1.bf16.msra.mxu0 %v7699_v0  ;;  %v6549_v0 = vld [vmem:[%s9406_s29] ss:$0 sm:$0xff] }
 0x327   : > { %2979 = vmatprep.subr.bf16.mxu0 %v7704_v1 }
 0x32a   : > { %2980 = vmatpush1.bf16.msra.mxu0 %v7702_v2 }
 0x32b   : > { %2981 = vmatprep.subr.bf16.mxu0 %v7707_v3 }
 0x32e   : > { %2982 = vmatpush1.bf16.msra.mxu0 %v7705_v4 }
 0x32f   : > { %2983 = vmatprep.subr.bf16.mxu0 %v7710_v5 }
 0x332   : > { %2984 = vmatpush1.bf16.msra.mxu0 %v7708_v6 }
 0x333   : > { %2985 = vmatprep.subr.bf16.mxu0 %v7713_v7 }
 0x336   : > { %2986 = vmatpush1.bf16.msra.mxu0 %v7711_v8 }
 0x337   : > { %2987 = vmatprep.subr.bf16.mxu0 %v7716_v9 }
 0x33a   : > { %2988 = vmatpush1.bf16.msra.mxu0 %v7714_v10  ;;  %v7765_v10 = vld [vmem:[#allocation13] sm:$0xff]  }
 0x33b   : > { %2989 = vmatprep.subr.bf16.mxu0 %v7719_v11 }
 0x33e   : > { %2990 = vmatpush1.bf16.msra.mxu0 %v7717_v12  ;;  %v7766_v12 = vld [vmem:[#allocation13 + $0x8] sm:$0xff]  }
 0x33f   : > { %2991 = vmatprep.subr.bf16.mxu0 %v7722_v13  ;;  %v7767_v13 = vld [vmem:[#allocation13 + $0x10] sm:$0xff]  }
 0x342   : > { %2992 = vmatpush1.bf16.msra.mxu0 %v7720_v14  ;;  %v7768_v14 = vld [vmem:[#allocation13 + $0x18] sm:$0xff]  }
 0x343   : > { %2993 = vmatprep.subr.bf16.mxu0 %v7725_v15  ;;  %v7769_v15 = vld [vmem:[#allocation13 + $0x20] sm:$0xff]  }
 0x346   : > { %2994 = vmatpush1.bf16.msra.mxu0 %v7723_v16  ;;  %v7770_v16 = vld [vmem:[#allocation13 + $0x28] sm:$0xff]  }
 0x347   : > { %2995 = vmatprep.subr.bf16.mxu0 %v7728_v17  ;;  %v7771_v17 = vld [vmem:[#allocation13 + $0x30] sm:$0xff]  }
 0x34a   : > { %2996 = vmatpush1.bf16.msra.mxu0 %v7726_v19  ;;  %v7772_v19 = vld [vmem:[#allocation13 + $0x38] sm:$0xff]  }
 0x34b   : > { %2997 = vmatprep.subr.bf16.mxu0 %v7731_v20  ;;  %v6566_v20 = vld [vmem:[%s9407_s5] ss:$0 sm:$0xff] }
 0x34e   : > { %2998 = vmatpush1.bf16.msra.mxu0 %v7729_v21 }
 0x34f   : > { %2999 = vmatprep.subr.bf16.mxu0 %v7734_v25 }
 0x352   : > { %3000 = vmatpush1.bf16.msra.mxu0 %v7732_v28 }
 0x353   : > { %3001 = vmatprep.subr.bf16.mxu0 %v7737_v29 }
 0x356   : > { %3002 = vmatpush1.bf16.msra.mxu0 %v7735_v30 }
 0x357   : > { %3003 = vmatprep.subr.bf16.mxu0 %v7740_v31 }
 0x35a   : > { %3004 = vmatpush1.bf16.msra.mxu0 %v7738_v32 }
 0x35d   : > { %3006 = vmatmul.mubr.bf16.vlgmr.msra.gmra.mrb[4].mxu0 %v9167_v57  ;;  %v7759_v57 = vld [vmem:[#allocation11 + $0x10] sm:$0xff]  }
 0x35e   : > { %3686 = vmatprep.mubr.bf16.mxu0 %v8638_v18 }
 0x430   : > { %v3007_v42 = vpop.f32.mrb[4].mxu0 }
 0x431   : > { %v7079_v18 = vadd.f32 %v3007_v42, %v2603_v40  ;;  %v3009_v43 = vpop.f32.mrb[5].mxu0  ;;  %v7779_v42 = vld [vmem:[#allocation14 + $0x30] sm:$0xff]  }
 0x432   : > { %v7080_v44 = vadd.f32 %v3009_v43, %v2607_v41  ;;  %v3011_v45 = vpop.f32.mrb[6].mxu0  ;;  %v7781_v43 = vld [vmem:[#allocation16] ss:$8 sps:$4 sm:$0xff]  }
 0x433   : > { %v7081_v46 = vadd.f32 %v3011_v45, %v2603_v40  ;;  %v3013_v47 = vpop.f32.mrb[7].mxu0  ;;  %v3016_v49 = vmax.f32 %v7079_v18, 0.0  ;;  %v7777_v40 = vld [vmem:[#allocation14 + $0x20] sm:$0xff]   ;;  %v7780_v18 = vld [vmem:[#allocation14 + $0x38] sm:$0xff]  }
 0x434   : > { %v7082_v48 = vadd.f32 %v3013_v47, %v2607_v41  ;;  %v3017_v51 = vmax.f32 %v7080_v44, 0.0  ;;  %v7778_v41 = vld [vmem:[#allocation14 + $0x28] sm:$0xff]   ;;  %v7786_v45 = vld [vmem:[#allocation16 + $0x14] ss:$8 sps:$4 sm:$0xff]  }
 0x435   : > { %v3018_v50 = vmax.f32 %v7081_v46, 0.0  ;;  %v7783_v44 = vld [vmem:[#allocation16 + $0x4] ss:$8 sps:$4 sm:$0xff]   ;;  %v7784_v46 = vld [vmem:[#allocation16 + $0x10] ss:$8 sps:$4 sm:$0xff]  }
 0x436   : > { %v3019_v52 = vmax.f32 %v7082_v48, 0.0  ;;  %3654 = vmatprep.subr.bf16.mxu0 %v7783_v44  ;;  %v7789_v47 = vld [vmem:[#allocation16 + $0x24] ss:$8 sps:$4 sm:$0xff]   ;;  %v7787_v48 = vld [vmem:[#allocation16 + $0x20] ss:$8 sps:$4 sm:$0xff]  }
 0x437   : > { %v3020_v53 = vpack.c.bf16 %v3018_v50, %v3016_v49  ;;  %3655 = vmatpush1.bf16.msra.mxu0 %v7781_v43  ;;  %v7792_v49 = vld [vmem:[#allocation16 + $0x34] ss:$8 sps:$4 sm:$0xff]   ;;  %v7790_v50 = vld [vmem:[#allocation16 + $0x30] ss:$8 sps:$4 sm:$0xff]  }
 0x438   : > { %v3021_v54 = vpack.c.bf16 %v3019_v52, %v3017_v51  ;;  %3656 = vmatprep.subr.bf16.mxu0 %v7786_v45  ;;  %v7795_v51 = vld [vmem:[#allocation16 + $0x44] ss:$8 sps:$4 sm:$0xff]   ;;  %v7798_v52 = vld [vmem:[#allocation16 + $0x54] ss:$8 sps:$4 sm:$0xff]  }
 0x43a   : > { %3189 = vmatprep.mubr.bf16.mxu1 %v3021_v54  ;;  %v6575_v54 = vld [vmem:[%s9408_s6] ss:$0 sm:$0xff]  ;;  %s9260_s6 = scalar_lea.vmem [#allocation20], %s7137_s22 }
 0x43b   : > { %3190 = vmatmul.mubr.bf16.vlgmr.msra.gmra.mrb[4].mxu1 %v3020_v53  ;;  %3657 = vmatpush1.bf16.msra.mxu0 %v7784_v46  ;;  %v7796_v53 = vld [vmem:[#allocation16 + $0x50] ss:$8 sps:$4 sm:$0xff]   ;;  %s6059_s22 = sshll.u32 %s9260_s6, 4  ;;  %s9273_s22 = int_to_ptr.vmem [resolvable:$true] %s6059_s22 }
 0x43c   : > { %7012 = vmatpush3.bf16.msra.mxu1 %v7757_v55  ;;  %7027 = vmatprep.mubr.msk.bf16.mxu1 %vm8640_vm0, %v8639_v38  ;;  %s8531_s29 = scalar_lea.vmem %s9273_s22, 896  ;;  %p8538_p7 = scmp.lt.s32.totalorder %s9273_s22, %s8536_s27 }
 0x43d   : > { %7013 = vmatprep.subr.bf16.mxu1 %v8639_v38  ;;  %3658 = vmatprep.subr.bf16.mxu0 %v7789_v47  ;;  %p8532_p11 = scmp.ne.s32.totalorder %s9273_s22, %s8531_s29 }
 0x43f   : > { %3659 = vmatpush1.bf16.msra.mxu0 %v7787_v48  ;;  %v7808_v48 = vld [vmem:[#allocation17 + $0x8] ss:$16 sps:$4 sm:$0xff]   ;;  %p8533_p13 = pnand %p8532_p11, %p9414_p12 }
 0x440   : > { %7014 = vmatpush3.bf16.msra.mxu1 %v7758_v56  ;;  %3660 = vmatprep.subr.bf16.mxu0 %v7792_v49 }
 0x441   : > { %7015 = vmatprep.subr.bf16.mxu1 %v8639_v38  ;;  %p8534_p8 = pneg %p8533_p13 }
 0x443   : > { %3661 = vmatpush1.bf16.msra.mxu0 %v7790_v50  ;;  %v7816_v50 = vld [vmem:[#allocation17 + $0x2c] ss:$16 sps:$4 sm:$0xff]  }
 0x444   : > { %7016 = vmatpush3.bf16.msra.mxu1 %v7759_v57  ;;  %3662 = vmatprep.subr.bf16.mxu0 %v7795_v51  ;;  %v7814_v51 = vld [vmem:[#allocation17 + $0x28] ss:$16 sps:$4 sm:$0xff]  }
 0x445   : > { %7017 = vmatprep.subr.bf16.mxu1 %v8639_v38 }
 0x448   : > { %7018 = vmatpush3.bf16.msra.mxu1 %v7760_v58 }
 0x449   : > { %7019 = vmatprep.subr.bf16.mxu1 %v8639_v38 }
 0x44c   : > { %7020 = vmatpush3.bf16.msra.mxu1 %v7761_v59 }
 0x44d   : > { %7021 = vmatprep.subr.bf16.mxu1 %v8639_v38 }
 0x450   : > { %7022 = vmatpush3.bf16.msra.mxu1 %v7762_v60 }
 0x451   : > { %7023 = vmatprep.subr.bf16.mxu1 %v8639_v38 }
 0x454   : > { %7024 = vmatpush3.bf16.msra.mxu1 %v7763_v61 }
 0x455   : > { %7025 = vmatprep.subr.bf16.mxu1 %v8639_v38 }
 0x458   : > { %7026 = vmatpush3.bf16.msra.mxu1 %v7764_v62 }
 0x459   : > { %7031 = vmatprep.subr.bf16.mxu1 %v8639_v38 }
 0x50e   : > { %v6934_v63 = vpop.f32.mrb[4].mxu1 }
 0x50f   : > { %v6935_v1 = vpop.f32.mrb[5].mxu1 }
 0x510   : > { %v6936_v2 = vadd.f32 %v6935_v1, %v6934_v63  ;;  %v6937_v3 = vpop.f32.mrb[6].mxu1  ;;  %v7799_v1 = vld [vmem:[#allocation16 + $0x60] ss:$8 sps:$4 sm:$0xff]  }
 0x511   : > { %v6938_v4 = vpop.f32.mrb[7].mxu1 }
 0x512   : > { %v3192_v5 = vadd.f32 %v6936_v2, %v6549_v0  ;;  %v6939_v6 = vadd.f32 %v6938_v4, %v6937_v3  ;;  %v7804_v2 = vld [vmem:[#allocation16 + $0x74] ss:$8 sps:$4 sm:$0xff]   ;;  %v7802_v3 = vld [vmem:[#allocation16 + $0x70] ss:$8 sps:$4 sm:$0xff]  }
 0x513   : > { %v7805_v4 = vld [vmem:[#allocation17] ss:$16 sps:$4 sm:$0xff]  }
 0x514   : > { %v3195_v7 = vadd.f32 %v6939_v6, %v6549_v0  ;;  %v3198_v8 = vmax.f32 %v3192_v5, 0.0  ;;  %v7801_v0 = vld [vmem:[#allocation16 + $0x64] ss:$8 sps:$4 sm:$0xff]  }
 0x515   : > { %v7807_v5 = vld [vmem:[#allocation17 + $0x4] ss:$16 sps:$4 sm:$0xff]   ;;  %v7810_v6 = vld [vmem:[#allocation17 + $0xc] ss:$16 sps:$4 sm:$0xff]  }
 0x516   : > { %v3199_v9 = vmax.f32 %v3195_v7, 0.0  ;;  %v7813_v7 = vld [vmem:[#allocation17 + $0x24] ss:$16 sps:$4 sm:$0xff]  }
 0x518   : > { %v3200_v11 = vpack.c.bf16 %v3199_v9, %v3198_v8  ;;  %v7811_v8 = vld [vmem:[#allocation17 + $0x20] ss:$16 sps:$4 sm:$0xff]   ;;  %v7819_v9 = vld [vmem:[#allocation17 + $0x44] ss:$16 sps:$4 sm:$0xff]  }
 0x51a   : > { %7028 = vmatmul.mubr.bf16.vlgmr.msra.gmra.mrb[8].mxu1 %v3200_v11  ;;  %v7825_v11 = vld [vmem:[#allocation17 + $0x64] ss:$16 sps:$4 sm:$0xff]  }
 0x51b   : > { %7032 = vmatpush3.bf16.msra.mxu1 %v7765_v10  ;;  %7047 = vmatprep.mubr.msk.bf16.mxu1 %vm8640_vm0, %v8639_v38  ;;  %v7817_v10 = vld [vmem:[#allocation17 + $0x40] ss:$16 sps:$4 sm:$0xff]  }
 0x51c   : > { %7033 = vmatprep.subr.bf16.mxu1 %v8639_v38 }
 0x51f   : > { %7034 = vmatpush3.bf16.msra.mxu1 %v7766_v12  ;;  %v7823_v12 = vld [vmem:[#allocation17 + $0x60] ss:$16 sps:$4 sm:$0xff]  }
 0x520   : > { %7035 = vmatprep.subr.bf16.mxu1 %v8639_v38 }
 0x523   : > { %7036 = vmatpush3.bf16.msra.mxu1 %v7767_v13  ;;  %v7831_v13 = vld [vmem:[#allocation17 + $0x84] ss:$16 sps:$4 sm:$0xff]  }
 0x524   : > { %7037 = vmatprep.subr.bf16.mxu1 %v8639_v38 }
 0x527   : > { %7038 = vmatpush3.bf16.msra.mxu1 %v7768_v14  ;;  %v7829_v14 = vld [vmem:[#allocation17 + $0x80] ss:$16 sps:$4 sm:$0xff]  }
 0x528   : > { %7039 = vmatprep.subr.bf16.mxu1 %v8639_v38 }
 0x52b   : > { %7040 = vmatpush3.bf16.msra.mxu1 %v7769_v15  ;;  %v7837_v15 = vld [vmem:[#allocation17 + $0xa4] ss:$16 sps:$4 sm:$0xff]  }
 0x52c   : > { %7041 = vmatprep.subr.bf16.mxu1 %v8639_v38 }
 0x52f   : > { %7042 = vmatpush3.bf16.msra.mxu1 %v7770_v16  ;;  %v7835_v16 = vld [vmem:[#allocation17 + $0xa0] ss:$16 sps:$4 sm:$0xff]  }
 0x530   : > { %7043 = vmatprep.subr.bf16.mxu1 %v8639_v38 }
 0x533   : > { %7044 = vmatpush3.bf16.msra.mxu1 %v7771_v17  ;;  %v7843_v17 = vld [vmem:[#allocation17 + $0xc4] ss:$16 sps:$4 sm:$0xff]  }
 0x534   : > { %7045 = vmatprep.subr.bf16.mxu1 %v8639_v38 }
 0x537   : > { %7046 = vmatpush3.bf16.msra.mxu1 %v7772_v19  ;;  %v7841_v19 = vld [vmem:[#allocation17 + $0xc0] ss:$16 sps:$4 sm:$0xff]  }
 0x538   : > { %7051 = vmatprep.subr.bf16.mxu1 %v8639_v38 }
 0x5ed   : > { %v3306_v21 = vpop.f32.mrb[8].mxu1 }
 0x5ee   : > { %v3307_v25 = vadd.f32 %v6566_v20, %v3306_v21  ;;  %v7029_v28 = vpop.f32.mrb[9].mxu1  ;;  %v7847_v21 = vld [vmem:[#allocation17 + $0xe0] ss:$16 sps:$4 sm:$0xff]  }
 0x5ef   : > { %v3309_v29 = vpop.f32.mrb[10].mxu1  ;;  %v7853_v28 = vld [vmem:[#allocation17 + $0x100] ss:$16 sps:$4 sm:$0xff]  }
 0x5f0   : > { %v3310_v30 = vadd.f32 %v6566_v20, %v3309_v29  ;;  %v7030_v31 = vpop.f32.mrb[11].mxu1  ;;  %v3313_v32 = vmax.f32 %v3307_v25, 0.0  ;;  %v7849_v20 = vld [vmem:[#allocation17 + $0xe4] ss:$16 sps:$4 sm:$0xff]  }
 0x5f1   : > { %v7855_v25 = vld [vmem:[#allocation17 + $0x104] ss:$16 sps:$4 sm:$0xff]  }
 0x5f2   : > { %v3314_v33 = vmax.f32 %v3310_v30, 0.0  ;;  %v7861_v29 = vld [vmem:[#allocation17 + $0x124] ss:$16 sps:$4 sm:$0xff]   ;;  %v7859_v30 = vld [vmem:[#allocation17 + $0x120] ss:$16 sps:$4 sm:$0xff]  }
 0x5f3   : > { %v7867_v31 = vld [vmem:[#allocation17 + $0x144] ss:$16 sps:$4 sm:$0xff]  }
 0x5f4   : > { %v3315_v35 = vpack.c.bf16 %v3314_v33, %v3313_v32  ;;  %v7865_v32 = vld [vmem:[#allocation17 + $0x140] ss:$16 sps:$4 sm:$0xff]   ;;  %v7873_v33 = vld [vmem:[#allocation17 + $0x164] ss:$16 sps:$4 sm:$0xff]  }
 0x5f6   : > { %7048 = vmatmul.mubr.bf16.vlgmr.msra.gmra.mrb[12].mxu1 %v3315_v35  ;;  %v7879_v35 = vld [vmem:[#allocation17 + $0x184] ss:$16 sps:$4 sm:$0xff]  }
 0x5f7   : > { %7052 = vmatpush3.bf16.msra.mxu1 %v7773_v34  ;;  %7067 = vmatprep.mubr.msk.bf16.mxu1 %vm8640_vm0, %v8639_v38  ;;  %v7871_v34 = vld [vmem:[#allocation17 + $0x160] ss:$16 sps:$4 sm:$0xff]  }
 0x5f8   : > { %7053 = vmatprep.subr.bf16.mxu1 %v8639_v38 }
 0x5fb   : > { %7054 = vmatpush3.bf16.msra.mxu1 %v7774_v36  ;;  %v7877_v36 = vld [vmem:[#allocation17 + $0x180] ss:$16 sps:$4 sm:$0xff]  }
 0x5fc   : > { %7055 = vmatprep.subr.bf16.mxu1 %v8639_v38 }
 0x5ff   : > { %7056 = vmatpush3.bf16.msra.mxu1 %v7775_v37  ;;  %v7885_v37 = vld [vmem:[#allocation17 + $0x1a4] ss:$16 sps:$4 sm:$0xff]  }
 0x600   : > { %7057 = vmatprep.subr.bf16.mxu1 %v8639_v38 }
 0x603   : > { %7058 = vmatpush3.bf16.msra.mxu1 %v7776_v39  ;;  %v7883_v39 = vld [vmem:[#allocation17 + $0x1a0] ss:$16 sps:$4 sm:$0xff]  }
 0x604   : > { %7059 = vmatprep.subr.bf16.mxu1 %v8639_v38 }
 0x607   : > { %7060 = vmatpush3.bf16.msra.mxu1 %v7777_v40  ;;  %v6584_v40 = vld [vmem:[%s9409_s26] ss:$0 sm:$0xff] }
 0x608   : > { %7061 = vmatprep.subr.bf16.mxu1 %v8639_v38 }
 0x60b   : > { %7062 = vmatpush3.bf16.msra.mxu1 %v7778_v41 }
 0x60c   : > { %7063 = vmatprep.subr.bf16.mxu1 %v8639_v38 }
 0x60f   : > { %7064 = vmatpush3.bf16.msra.mxu1 %v7779_v42 }
 0x610   : > { %7065 = vmatprep.subr.bf16.mxu1 %v8639_v38  ;;  %v7793_v38 = vld [vmem:[#allocation16 + $0x40] ss:$8 sps:$4 sm:$0xff]  }
 0x611   : > { %3663 = vmatpush1.bf16.msra.mxu0 %v7793_v38  ;;  %v7822_v38 = vld [vmem:[#allocation17 + $0x4c] ss:$16 sps:$4 sm:$0xff]  }
 0x612   : > { %3664 = vmatprep.subr.bf16.mxu0 %v7798_v52  ;;  %v7820_v52 = vld [vmem:[#allocation17 + $0x48] ss:$16 sps:$4 sm:$0xff]  }
 0x613   : > { %7066 = vmatpush3.bf16.msra.mxu1 %v7780_v18 }
 0x614   : > { %4109 = vmatprep.subr.bf16.mxu1 %v7807_v5  ;;  %v7876_v5 = vld [vmem:[#allocation17 + $0x16c] ss:$16 sps:$4 sm:$0xff]  }
 0x615   : > { %3665 = vmatpush1.bf16.msra.mxu0 %v7796_v53  ;;  %v7828_v53 = vld [vmem:[#allocation17 + $0x6c] ss:$16 sps:$4 sm:$0xff]  }
 0x616   : > { %3666 = vmatprep.subr.bf16.mxu0 %v7801_v0  ;;  %v7856_v0 = vld [vmem:[#allocation17 + $0x108] ss:$16 sps:$4 sm:$0xff]  }
 0x619   : > { %3667 = vmatpush1.bf16.msra.mxu0 %v7799_v1  ;;  %v7864_v1 = vld [vmem:[#allocation17 + $0x12c] ss:$16 sps:$4 sm:$0xff]  }
 0x61a   : > { %3668 = vmatprep.subr.bf16.mxu0 %v7804_v2  ;;  %v7862_v2 = vld [vmem:[#allocation17 + $0x128] ss:$16 sps:$4 sm:$0xff]  }
 0x61d   : > { %3669 = vmatpush1.bf16.msra.mxu0 %v7802_v3  ;;  %v7870_v3 = vld [vmem:[#allocation17 + $0x14c] ss:$16 sps:$4 sm:$0xff]  }
 0x61e   : > { %4152 = vmatprep.subr.bf16.mxu0 %v7810_v6  ;;  %v7874_v6 = vld [vmem:[#allocation17 + $0x168] ss:$16 sps:$4 sm:$0xff]  }
 0x6c9   : > { %v3421_v55 = vpop.f32.mrb[12].mxu1 }
 0x6ca   : > { %v3422_v56 = vadd.f32 %v6575_v54, %v3421_v55  ;;  %v7049_v57 = vpop.f32.mrb[13].mxu1  ;;  %v7834_v55 = vld [vmem:[#allocation17 + $0x8c] ss:$16 sps:$4 sm:$0xff]  }
 0x6cb   : > { %v3424_v58 = vpop.f32.mrb[14].mxu1  ;;  %v7840_v57 = vld [vmem:[#allocation17 + $0xac] ss:$16 sps:$4 sm:$0xff]  }
 0x6cc   : > { %v3425_v59 = vadd.f32 %v6575_v54, %v3424_v58  ;;  %v7050_v60 = vpop.f32.mrb[15].mxu1  ;;  %v3428_v61 = vmax.f32 %v3422_v56, 0.0  ;;  %v7826_v54 = vld [vmem:[#allocation17 + $0x68] ss:$16 sps:$4 sm:$0xff]  }
 0x6cd   : > { %v7832_v56 = vld [vmem:[#allocation17 + $0x88] ss:$16 sps:$4 sm:$0xff]  }
 0x6ce   : > { %v3429_v62 = vmax.f32 %v3425_v59, 0.0  ;;  %v7838_v58 = vld [vmem:[#allocation17 + $0xa8] ss:$16 sps:$4 sm:$0xff]   ;;  %v7846_v59 = vld [vmem:[#allocation17 + $0xcc] ss:$16 sps:$4 sm:$0xff]  }
 0x6cf   : > { %v7844_v60 = vld [vmem:[#allocation17 + $0xc8] ss:$16 sps:$4 sm:$0xff]  }
 0x6d0   : > { %v3430_v63 = vpack.c.bf16 %v3429_v62, %v3428_v61  ;;  %v7852_v61 = vld [vmem:[#allocation17 + $0xec] ss:$16 sps:$4 sm:$0xff]   ;;  %v7850_v62 = vld [vmem:[#allocation17 + $0xe8] ss:$16 sps:$4 sm:$0xff]  }
 0x6d2   : > { %7068 = vmatmul.mubr.bf16.vlgmr.msra.gmra.mrb[16].mxu1 %v3430_v63  ;;  %v7858_v63 = vld [vmem:[#allocation17 + $0x10c] ss:$16 sps:$4 sm:$0xff]  }
 0x6d3   : > { %4110 = vmatpush1.bf16.msra.mxu1 %v7805_v4  ;;  %v7868_v4 = vld [vmem:[#allocation17 + $0x148] ss:$16 sps:$4 sm:$0xff]  }
 0x6d4   : > { %4111 = vmatprep.subr.bf16.mxu1 %v7813_v7  ;;  %v7882_v7 = vld [vmem:[#allocation17 + $0x18c] ss:$16 sps:$4 sm:$0xff]  }
 0x6d7   : > { %4112 = vmatpush1.bf16.msra.mxu1 %v7811_v8  ;;  %v7880_v8 = vld [vmem:[#allocation17 + $0x188] ss:$16 sps:$4 sm:$0xff]  }
 0x6d8   : > { %4113 = vmatprep.subr.bf16.mxu1 %v7819_v9  ;;  %v7888_v9 = vld [vmem:[#allocation17 + $0x1ac] ss:$16 sps:$4 sm:$0xff]  }
 0x6db   : > { %4114 = vmatpush1.bf16.msra.mxu1 %v7817_v10  ;;  %v7886_v10 = vld [vmem:[#allocation17 + $0x1a8] ss:$16 sps:$4 sm:$0xff]  }
 0x6dc   : > { %4115 = vmatprep.subr.bf16.mxu1 %v7825_v11  ;;  %v7891_v11 = vld [vmem:[#allocation17 + $0x1c4] ss:$16 sps:$4 sm:$0xff]  }
 0x6df   : > { %4116 = vmatpush1.bf16.msra.mxu1 %v7823_v12  ;;  %v7894_v12 = vld [vmem:[#allocation17 + $0x1cc] ss:$16 sps:$4 sm:$0xff]  }
 0x6e0   : > { %4117 = vmatprep.subr.bf16.mxu1 %v7831_v13  ;;  %v7889_v13 = vld [vmem:[#allocation17 + $0x1c0] ss:$16 sps:$4 sm:$0xff]  }
 0x6e3   : > { %4118 = vmatpush1.bf16.msra.mxu1 %v7829_v14  ;;  %v7892_v14 = vld [vmem:[#allocation17 + $0x1c8] ss:$16 sps:$4 sm:$0xff]  }
 0x6e4   : > { %4119 = vmatprep.subr.bf16.mxu1 %v7837_v15  ;;  %v7897_v15 = vld [vmem:[#allocation17 + $0x1e4] ss:$16 sps:$4 sm:$0xff]  }
 0x6e7   : > { %4120 = vmatpush1.bf16.msra.mxu1 %v7835_v16  ;;  %v7900_v16 = vld [vmem:[#allocation17 + $0x1ec] ss:$16 sps:$4 sm:$0xff]  }
 0x6e8   : > { %4121 = vmatprep.subr.bf16.mxu1 %v7843_v17  ;;  %v7895_v17 = vld [vmem:[#allocation17 + $0x1e0] ss:$16 sps:$4 sm:$0xff]  }
 0x6eb   : > { %4122 = vmatpush1.bf16.msra.mxu1 %v7841_v19  ;;  %v7898_v19 = vld [vmem:[#allocation17 + $0x1e8] ss:$16 sps:$4 sm:$0xff]  }
 0x6ec   : > { %4123 = vmatprep.subr.bf16.mxu1 %v7849_v20  ;;  %v7903_v20 = vld [vmem:[#allocation19 + $0x4] ss:$28 sps:$4 sm:$0xff]  }
 0x6ef   : > { %4124 = vmatpush1.bf16.msra.mxu1 %v7847_v21  ;;  %v7906_v21 = vld [vmem:[#allocation19 + $0xc] ss:$28 sps:$4 sm:$0xff]  }
 0x6f0   : > { %4125 = vmatprep.subr.bf16.mxu1 %v7855_v25  ;;  %v3562_v25 = vld [vmem:[%s9410_s28] sm:$0x3]  ;;  %s6045_s28 = scalar_lea.sflag [#allocation4], %s9105_s1 }
 0x6f3   : > { %4126 = vmatpush1.bf16.msra.mxu1 %v7853_v28  ;;  %v3567_v28 = vrot.slane %v3562_v25, %v9149_v23 }
 0x6f4   : > { %4127 = vmatprep.subr.bf16.mxu1 %v7861_v29  ;;  %v3571_v29 = vrot.slane %v3562_v25, %v9158_v26  ;;  %v7969_v25 = vld [vmem:[#allocation19 + $0x26c] ss:$28 sps:$4 sm:$0xff]  }
 0x6f7   : > { %4128 = vmatpush1.bf16.msra.mxu1 %v7859_v30 }
 0x6f8   : > { %4129 = vmatprep.subr.bf16.mxu1 %v7867_v31 }
 0x6fb   : > { %4130 = vmatpush1.bf16.msra.mxu1 %v7865_v32 }
 0x6fc   : > { %4131 = vmatprep.subr.bf16.mxu1 %v7873_v33 }
 0x6ff   : > { %4132 = vmatpush1.bf16.msra.mxu1 %v7871_v34 }
 0x700   : > { %4133 = vmatprep.subr.bf16.mxu1 %v7879_v35 }
 0x703   : > { %4134 = vmatpush1.bf16.msra.mxu1 %v7877_v36 }
 0x704   : > { %4135 = vmatprep.subr.bf16.mxu1 %v7885_v37 }
 0x707   : > { %4136 = vmatpush1.bf16.msra.mxu1 %v7883_v39 }
 0x708   : > { %4137 = vmatprep.subr.bf16.mxu1 %v7891_v11  ;;  %v7949_v11 = vld [vmem:[#allocation19 + $0x1c0] ss:$28 sps:$4 sm:$0xff]  }
 0x70b   : > { %4138 = vmatpush1.bf16.msra.mxu1 %v7889_v13  ;;  %v7957_v13 = vld [vmem:[#allocation19 + $0x1fc] ss:$28 sps:$4 sm:$0xff]  }
 0x70c   : > { %4139 = vmatprep.subr.bf16.mxu1 %v7897_v15  ;;  %v7955_v15 = vld [vmem:[#allocation19 + $0x1f8] ss:$28 sps:$4 sm:$0xff]  }
 0x70f   : > { %4140 = vmatpush1.bf16.msra.mxu1 %v7895_v17  ;;  %v7963_v17 = vld [vmem:[#allocation19 + $0x234] ss:$28 sps:$4 sm:$0xff]  }
 0x710   : > { %5652 = vmatprep.subr.bf16.mxu1 %v7903_v20  ;;  %v7961_v20 = vld [vmem:[#allocation19 + $0x230] ss:$28 sps:$4 sm:$0xff]  }
 0x7a5   : > { %v3536_v41 = vpop.f32.mrb[16].mxu1 }
 0x7a6   : > { %v3537_v42 = vadd.f32 %v6584_v40, %v3536_v41  ;;  %v7069_v18 = vpop.f32.mrb[17].mxu1 }
 0x7a7   : > { %v3539_v43 = vpop.f32.mrb[18].mxu1 }
 0x7a8   : > { %v3540_v44 = vadd.f32 %v6584_v40, %v3539_v43  ;;  %v7070_v45 = vpop.f32.mrb[19].mxu1  ;;  %v3543_v46 = vmax.f32 %v3537_v42, 0.0 }
 0x7a9   : > { %v7904_v45 = vld [vmem:[#allocation19 + $0x8] ss:$28 sps:$4 sm:$0xff]  }
 0x7aa   : > { %v3544_v47 = vmax.f32 %v3540_v44, 0.0  ;;  %v7901_v44 = vld [vmem:[#allocation19] ss:$28 sps:$4 sm:$0xff]  }
 0x7ac   : > { %v3545_v49 = vpack.c.bf16 %v3544_v47, %v3543_v46  ;;  %v7909_v46 = vld [vmem:[#allocation19 + $0x3c] ss:$28 sps:$4 sm:$0xff]   ;;  %v7912_v47 = vld [vmem:[#allocation19 + $0x44] ss:$28 sps:$4 sm:$0xff]  }
 0x7ae   : > { %3687 = vmatmul.mubr.bf16.vlgmr.msra.gmra.mrb[8].mxu0 %v3545_v49  ;;  %v7910_v49 = vld [vmem:[#allocation19 + $0x40] ss:$28 sps:$4 sm:$0xff]  }
 0x7af   : > { %4153 = vmatpush1.bf16.msra.mxu0 %v7808_v48  ;;  %v7907_v48 = vld [vmem:[#allocation19 + $0x38] ss:$28 sps:$4 sm:$0xff]  }
 0x7b0   : > { %4154 = vmatprep.subr.bf16.mxu0 %v7816_v50  ;;  %v7915_v50 = vld [vmem:[#allocation19 + $0x74] ss:$28 sps:$4 sm:$0xff]  }
 0x7b3   : > { %4155 = vmatpush1.bf16.msra.mxu0 %v7814_v51  ;;  %v7918_v51 = vld [vmem:[#allocation19 + $0x7c] ss:$28 sps:$4 sm:$0xff]  }
 0x7b4   : > { %4156 = vmatprep.subr.bf16.mxu0 %v7822_v38  ;;  %v7913_v38 = vld [vmem:[#allocation19 + $0x70] ss:$28 sps:$4 sm:$0xff]  }
 0x7b7   : > { %4157 = vmatpush1.bf16.msra.mxu0 %v7820_v52  ;;  %v7916_v52 = vld [vmem:[#allocation19 + $0x78] ss:$28 sps:$4 sm:$0xff]  }
 0x7b8   : > { %4158 = vmatprep.subr.bf16.mxu0 %v7828_v53  ;;  %v7921_v53 = vld [vmem:[#allocation19 + $0xac] ss:$28 sps:$4 sm:$0xff]  }
 0x7bb   : > { %4159 = vmatpush1.bf16.msra.mxu0 %v7826_v54  ;;  %v7924_v54 = vld [vmem:[#allocation19 + $0xb4] ss:$28 sps:$4 sm:$0xff]  }
 0x7bc   : > { %4160 = vmatprep.subr.bf16.mxu0 %v7834_v55  ;;  %v7919_v55 = vld [vmem:[#allocation19 + $0xa8] ss:$28 sps:$4 sm:$0xff]  }
 0x7bf   : > { %4161 = vmatpush1.bf16.msra.mxu0 %v7832_v56  ;;  %v7922_v56 = vld [vmem:[#allocation19 + $0xb0] ss:$28 sps:$4 sm:$0xff]  }
 0x7c0   : > { %4162 = vmatprep.subr.bf16.mxu0 %v7840_v57  ;;  %v7927_v57 = vld [vmem:[#allocation19 + $0xe4] ss:$28 sps:$4 sm:$0xff]  }
 0x7c3   : > { %4163 = vmatpush1.bf16.msra.mxu0 %v7838_v58  ;;  %v7930_v58 = vld [vmem:[#allocation19 + $0xec] ss:$28 sps:$4 sm:$0xff]  }
 0x7c4   : > { %4164 = vmatprep.subr.bf16.mxu0 %v7846_v59  ;;  %v7925_v59 = vld [vmem:[#allocation19 + $0xe0] ss:$28 sps:$4 sm:$0xff]  }
 0x7c7   : > { %4165 = vmatpush1.bf16.msra.mxu0 %v7844_v60  ;;  %v7928_v60 = vld [vmem:[#allocation19 + $0xe8] ss:$28 sps:$4 sm:$0xff]  }
 0x7c8   : > { %4166 = vmatprep.subr.bf16.mxu0 %v7852_v61  ;;  %v7933_v61 = vld [vmem:[#allocation19 + $0x11c] ss:$28 sps:$4 sm:$0xff]  }
 0x7cb   : > { %4167 = vmatpush1.bf16.msra.mxu0 %v7850_v62  ;;  %v7936_v62 = vld [vmem:[#allocation19 + $0x124] ss:$28 sps:$4 sm:$0xff]  }
 0x7cc   : > { %4168 = vmatprep.subr.bf16.mxu0 %v7858_v63  ;;  %v7931_v63 = vld [vmem:[#allocation19 + $0x118] ss:$28 sps:$4 sm:$0xff]  }
 0x7cf   : > { %4169 = vmatpush1.bf16.msra.mxu0 %v7856_v0  ;;  %v7934_v0 = vld [vmem:[#allocation19 + $0x120] ss:$28 sps:$4 sm:$0xff]  }
 0x7d0   : > { %4170 = vmatprep.subr.bf16.mxu0 %v7864_v1  ;;  %v7939_v1 = vld [vmem:[#allocation19 + $0x154] ss:$28 sps:$4 sm:$0xff]  }
 0x7d3   : > { %4171 = vmatpush1.bf16.msra.mxu0 %v7862_v2  ;;  %v7942_v2 = vld [vmem:[#allocation19 + $0x15c] ss:$28 sps:$4 sm:$0xff]  }
 0x7d4   : > { %4172 = vmatprep.subr.bf16.mxu0 %v7870_v3  ;;  %v7937_v3 = vld [vmem:[#allocation19 + $0x150] ss:$28 sps:$4 sm:$0xff]  }
 0x7d7   : > { %4173 = vmatpush1.bf16.msra.mxu0 %v7868_v4  ;;  %v7940_v4 = vld [vmem:[#allocation19 + $0x158] ss:$28 sps:$4 sm:$0xff]  }
 0x7d8   : > { %4174 = vmatprep.subr.bf16.mxu0 %v7876_v5  ;;  %v7945_v5 = vld [vmem:[#allocation19 + $0x18c] ss:$28 sps:$4 sm:$0xff]  }
 0x7db   : > { %4175 = vmatpush1.bf16.msra.mxu0 %v7874_v6  ;;  %v7948_v6 = vld [vmem:[#allocation19 + $0x194] ss:$28 sps:$4 sm:$0xff]  }
 0x7dc   : > { %4176 = vmatprep.subr.bf16.mxu0 %v7882_v7  ;;  %v7943_v7 = vld [vmem:[#allocation19 + $0x188] ss:$28 sps:$4 sm:$0xff]  }
 0x7df   : > { %4177 = vmatpush1.bf16.msra.mxu0 %v7880_v8  ;;  %v7946_v8 = vld [vmem:[#allocation19 + $0x190] ss:$28 sps:$4 sm:$0xff]  }
 0x7e0   : > { %4178 = vmatprep.subr.bf16.mxu0 %v7888_v9  ;;  %v7951_v9 = vld [vmem:[#allocation19 + $0x1c4] ss:$28 sps:$4 sm:$0xff]  }
 0x7e3   : > { %4179 = vmatpush1.bf16.msra.mxu0 %v7886_v10  ;;  %v7954_v10 = vld [vmem:[#allocation19 + $0x1cc] ss:$28 sps:$4 sm:$0xff]  }
 0x7e4   : > { %4180 = vmatprep.subr.bf16.mxu0 %v7894_v12  ;;  %v7952_v12 = vld [vmem:[#allocation19 + $0x1c8] ss:$28 sps:$4 sm:$0xff]  }
 0x7e7   : > { %4181 = vmatpush1.bf16.msra.mxu0 %v7892_v14  ;;  %v7960_v14 = vld [vmem:[#allocation19 + $0x204] ss:$28 sps:$4 sm:$0xff]  }
 0x7e8   : > { %4182 = vmatprep.subr.bf16.mxu0 %v7900_v16  ;;  %v7958_v16 = vld [vmem:[#allocation19 + $0x200] ss:$28 sps:$4 sm:$0xff]  }
 0x7eb   : > { %4183 = vmatpush1.bf16.msra.mxu0 %v7898_v19  ;;  %v7966_v19 = vld [vmem:[#allocation19 + $0x23c] ss:$28 sps:$4 sm:$0xff]  }
 0x7ec   : > { %5738 = vmatprep.subr.bf16.mxu0 %v7906_v21  ;;  %v7964_v21 = vld [vmem:[#allocation19 + $0x238] ss:$28 sps:$4 sm:$0xff]  }
 0x881   : > { %v3688_v30 = vpop.f32.mrb[8].mxu0 }
 0x882   : > { %v3689_v31 = vadd.f32 %v3688_v30, %v3567_v28  ;;  %v3690_v32 = vpop.f32.mrb[9].mxu0  ;;  %v7970_v30 = vld [vmem:[#allocation19 + $0x270] ss:$28 sps:$4 sm:$0xff]  }
 0x883   : > { %v3691_v33 = vadd.f32 %v3690_v32, %v3571_v29  ;;  %v3692_v34 = vpop.f32.mrb[10].mxu0  ;;  %v7978_v32 = vld [vmem:[#allocation19 + $0x2ac] ss:$28 sps:$4 sm:$0xff]  }
 0x884   : > { %v3693_v35 = vadd.f32 %v3692_v34, %v3567_v28  ;;  %v3694_v36 = vpop.f32.mrb[11].mxu0  ;;  %v3697_v39 = vmax.f32 %v3689_v31, 0.0  ;;  %v7972_v28 = vld [vmem:[#allocation19 + $0x274] ss:$28 sps:$4 sm:$0xff]   ;;  %v7975_v31 = vld [vmem:[#allocation19 + $0x2a4] ss:$28 sps:$4 sm:$0xff]  }
 0x885   : > { %v3695_v37 = vadd.f32 %v3694_v36, %v3571_v29  ;;  %v3698_v41 = vmax.f32 %v3691_v33, 0.0  ;;  %v7967_v29 = vld [vmem:[#allocation19 + $0x268] ss:$28 sps:$4 sm:$0xff]   ;;  %v7973_v33 = vld [vmem:[#allocation19 + $0x2a0] ss:$28 sps:$4 sm:$0xff]  }
 0x886   : > { %v3699_v40 = vmax.f32 %v3693_v35, 0.0  ;;  %v7976_v34 = vld [vmem:[#allocation19 + $0x2a8] ss:$28 sps:$4 sm:$0xff]   ;;  %v7981_v35 = vld [vmem:[#allocation19 + $0x2dc] ss:$28 sps:$4 sm:$0xff]  }
 0x887   : > { %v3700_v42 = vmax.f32 %v3695_v37, 0.0  ;;  %v7984_v36 = vld [vmem:[#allocation19 + $0x2e4] ss:$28 sps:$4 sm:$0xff]   ;;  %v7979_v37 = vld [vmem:[#allocation19 + $0x2d8] ss:$28 sps:$4 sm:$0xff]  }
 0x888   : > { %v3701_v18 = vpack.c.bf16 %v3699_v40, %v3697_v39  ;;  %v7982_v39 = vld [vmem:[#allocation19 + $0x2e0] ss:$28 sps:$4 sm:$0xff]   ;;  %v7987_v40 = vld [vmem:[#allocation19 + $0x314] ss:$28 sps:$4 sm:$0xff]  }
 0x889   : > { %v3702_v43 = vpack.c.bf16 %v3700_v42, %v3698_v41  ;;  %v7990_v41 = vld [vmem:[#allocation19 + $0x31c] ss:$28 sps:$4 sm:$0xff]   ;;  %v7985_v42 = vld [vmem:[#allocation19 + $0x310] ss:$28 sps:$4 sm:$0xff]  }
 0x88b   : > { %4141 = vmatprep.mubr.bf16.mxu1 %v3702_v43  ;;  %4184 = vmatprep.mubr.bf16.mxu0 %v3702_v43  ;;  %v7993_v43 = vld [vmem:[#allocation19 + $0x34c] ss:$28 sps:$4 sm:$0xff]  }
 0x88c   : > { %4142 = vmatmul.mubr.bf16.vlgmr.msra.gmra.mrb[20].mxu1 %v3701_v18  ;;  %4185 = vmatmul.mubr.bf16.vlgmr.msra.gmra.mrb[12].mxu0 %v3701_v18  ;;  %v7988_v18 = vld [vmem:[#allocation19 + $0x318] ss:$28 sps:$4 sm:$0xff]  }
 0x88d   : > { %5653 = vmatpush1.bf16.msra.mxu1 %v7901_v44  ;;  %5739 = vmatpush1.bf16.msra.mxu0 %v7904_v45  ;;  %v7996_v44 = vld [vmem:[#allocation19 + $0x354] ss:$28 sps:$4 sm:$0xff]   ;;  %v7991_v45 = vld [vmem:[#allocation19 + $0x348] ss:$28 sps:$4 sm:$0xff]  }
 0x88e   : > { %5654 = vmatprep.subr.bf16.mxu1 %v7909_v46  ;;  %5740 = vmatprep.subr.bf16.mxu0 %v7912_v47  ;;  %v7994_v46 = vld [vmem:[#allocation19 + $0x350] ss:$28 sps:$4 sm:$0xff]   ;;  %v7999_v47 = vld [vmem:[#allocation19 + $0x384] ss:$28 sps:$4 sm:$0xff]  }
 0x891   : > { %5655 = vmatpush1.bf16.msra.mxu1 %v7907_v48  ;;  %5741 = vmatpush1.bf16.msra.mxu0 %v7910_v49  ;;  %v8002_v48 = vld [vmem:[#allocation19 + $0x38c] ss:$28 sps:$4 sm:$0xff]  }
 0x892   : > { %5656 = vmatprep.subr.bf16.mxu1 %v7915_v50  ;;  %5742 = vmatprep.subr.bf16.mxu0 %v7918_v51  ;;  %v3767_v49 = vld [vmem:[%s9411_s12] sm:$0xf]  ;;  %s8537_s12 = scalar_lea.vmem %s8536_s27, 1792 }
 0x893   : > { %v3772_v50 = vrot.slane %v3767_v49, %v9149_v23  ;;  %v3780_v51 = vrot.slane %v3767_v49, %v9152_v24  ;;  %p8539_p9 = scmp.lt.s32.totalorder %s8537_s12, %s8531_s29 }
 0x895   : > { %5657 = vmatpush1.bf16.msra.mxu1 %v7913_v38  ;;  %5743 = vmatpush1.bf16.msra.mxu0 %v7916_v52  ;;  %v3776_v38 = vrot.slane %v3767_v49, %v9158_v26  ;;  %v3784_v52 = vrot.slane %v3767_v49, %v9161_v27  ;;  %v8041_v49 = vld [vmem:[#allocation19 + $0x50c] ss:$28 sps:$4 sm:$0xff]   ;;  %p8540_p4 = por %p8539_p9, %p8538_p7 }
 0x896   : > { %5658 = vmatprep.subr.bf16.mxu1 %v7921_v53  ;;  %5744 = vmatprep.subr.bf16.mxu0 %v7924_v54 }
 0x897   : > { %p8541_p3 = pnand %p8540_p4, %p8534_p8 }
 0x899   : > { %5659 = vmatpush1.bf16.msra.mxu1 %v7919_v55  ;;  %5745 = vmatpush1.bf16.msra.mxu0 %v7922_v56 }
 0x89a   : > { %5660 = vmatprep.subr.bf16.mxu1 %v7927_v57  ;;  %5746 = vmatprep.subr.bf16.mxu0 %v7930_v58 }
 0x89d   : > { %5661 = vmatpush1.bf16.msra.mxu1 %v7925_v59  ;;  %5747 = vmatpush1.bf16.msra.mxu0 %v7928_v60 }
 0x89e   : > { %5662 = vmatprep.subr.bf16.mxu1 %v7933_v61  ;;  %5748 = vmatprep.subr.bf16.mxu0 %v7936_v62 }
 0x8a1   : > { %5663 = vmatpush1.bf16.msra.mxu1 %v7931_v63  ;;  %5749 = vmatpush1.bf16.msra.mxu0 %v7934_v0 }
 0x8a2   : > { %5664 = vmatprep.subr.bf16.mxu1 %v7939_v1  ;;  %5750 = vmatprep.subr.bf16.mxu0 %v7942_v2 }
 0x8a5   : > { %5665 = vmatpush1.bf16.msra.mxu1 %v7937_v3  ;;  %5751 = vmatpush1.bf16.msra.mxu0 %v7940_v4 }
 0x8a6   : > { %5666 = vmatprep.subr.bf16.mxu1 %v7945_v5  ;;  %5752 = vmatprep.subr.bf16.mxu0 %v7948_v6 }
 0x8a9   : > { %5667 = vmatpush1.bf16.msra.mxu1 %v7943_v7  ;;  %5753 = vmatpush1.bf16.msra.mxu0 %v7946_v8 }
 0x8aa   : > { %5668 = vmatprep.subr.bf16.mxu1 %v7951_v9  ;;  %5754 = vmatprep.subr.bf16.mxu0 %v7954_v10 }
 0x8ad   : > { %5669 = vmatpush1.bf16.msra.mxu1 %v7949_v11  ;;  %5755 = vmatpush1.bf16.msra.mxu0 %v7952_v12 }
 0x8ae   : > { %5670 = vmatprep.subr.bf16.mxu1 %v7957_v13  ;;  %5756 = vmatprep.subr.bf16.mxu0 %v7960_v14 }
 0x8b1   : > { %5671 = vmatpush1.bf16.msra.mxu1 %v7955_v15  ;;  %5757 = vmatpush1.bf16.msra.mxu0 %v7958_v16 }
 0x8b2   : > { %5672 = vmatprep.subr.bf16.mxu1 %v7963_v17  ;;  %5758 = vmatprep.subr.bf16.mxu0 %v7966_v19  ;;  %v7997_v17 = vld [vmem:[#allocation19 + $0x380] ss:$28 sps:$4 sm:$0xff]   ;;  %v8000_v19 = vld [vmem:[#allocation19 + $0x388] ss:$28 sps:$4 sm:$0xff]  }
 0x8b5   : > { %5673 = vmatpush1.bf16.msra.mxu1 %v7961_v20  ;;  %5759 = vmatpush1.bf16.msra.mxu0 %v7964_v21  ;;  %v8005_v20 = vld [vmem:[#allocation19 + $0x3bc] ss:$28 sps:$4 sm:$0xff]   ;;  %v8008_v21 = vld [vmem:[#allocation19 + $0x3c4] ss:$28 sps:$4 sm:$0xff]  }
 0x8b6   : > { %5674 = vmatprep.subr.bf16.mxu1 %v7969_v25  ;;  %5760 = vmatprep.subr.bf16.mxu0 %v7972_v28  ;;  %v8003_v25 = vld [vmem:[#allocation19 + $0x3b8] ss:$28 sps:$4 sm:$0xff]   ;;  %v8006_v28 = vld [vmem:[#allocation19 + $0x3c0] ss:$28 sps:$4 sm:$0xff]  }
 0x8b9   : > { %5675 = vmatpush1.bf16.msra.mxu1 %v7967_v29  ;;  %5761 = vmatpush1.bf16.msra.mxu0 %v7970_v30  ;;  %v8011_v29 = vld [vmem:[#allocation19 + $0x3f4] ss:$28 sps:$4 sm:$0xff]   ;;  %v8014_v30 = vld [vmem:[#allocation19 + $0x3fc] ss:$28 sps:$4 sm:$0xff]  }
 0x8ba   : > { %5676 = vmatprep.subr.bf16.mxu1 %v7975_v31  ;;  %5762 = vmatprep.subr.bf16.mxu0 %v7978_v32  ;;  %v8009_v31 = vld [vmem:[#allocation19 + $0x3f0] ss:$28 sps:$4 sm:$0xff]   ;;  %v8012_v32 = vld [vmem:[#allocation19 + $0x3f8] ss:$28 sps:$4 sm:$0xff]  }
 0x8bd   : > { %5677 = vmatpush1.bf16.msra.mxu1 %v7973_v33  ;;  %5763 = vmatpush1.bf16.msra.mxu0 %v7976_v34  ;;  %v8017_v33 = vld [vmem:[#allocation19 + $0x42c] ss:$28 sps:$4 sm:$0xff]   ;;  %v8020_v34 = vld [vmem:[#allocation19 + $0x434] ss:$28 sps:$4 sm:$0xff]  }
 0x8be   : > { %5678 = vmatprep.subr.bf16.mxu1 %v7981_v35  ;;  %5764 = vmatprep.subr.bf16.mxu0 %v7984_v36  ;;  %v8015_v35 = vld [vmem:[#allocation19 + $0x428] ss:$28 sps:$4 sm:$0xff]   ;;  %v8018_v36 = vld [vmem:[#allocation19 + $0x430] ss:$28 sps:$4 sm:$0xff]  }
 0x8c1   : > { %5679 = vmatpush1.bf16.msra.mxu1 %v7979_v37  ;;  %5765 = vmatpush1.bf16.msra.mxu0 %v7982_v39  ;;  %v8023_v37 = vld [vmem:[#allocation19 + $0x464] ss:$28 sps:$4 sm:$0xff]   ;;  %v8026_v39 = vld [vmem:[#allocation19 + $0x46c] ss:$28 sps:$4 sm:$0xff]  }
 0x8c2   : > { %5680 = vmatprep.subr.bf16.mxu1 %v7987_v40  ;;  %5766 = vmatprep.subr.bf16.mxu0 %v7990_v41  ;;  %v8021_v40 = vld [vmem:[#allocation19 + $0x460] ss:$28 sps:$4 sm:$0xff]   ;;  %v8024_v41 = vld [vmem:[#allocation19 + $0x468] ss:$28 sps:$4 sm:$0xff]  }
 0x8c5   : > { %5681 = vmatpush1.bf16.msra.mxu1 %v7985_v42  ;;  %5767 = vmatpush1.bf16.msra.mxu0 %v7988_v18  ;;  %v8029_v42 = vld [vmem:[#allocation19 + $0x49c] ss:$28 sps:$4 sm:$0xff]   ;;  %v8032_v18 = vld [vmem:[#allocation19 + $0x4a4] ss:$28 sps:$4 sm:$0xff]  }
 0x8c6   : > { %5682 = vmatprep.subr.bf16.mxu1 %v7993_v43  ;;  %5768 = vmatprep.subr.bf16.mxu0 %v7996_v44  ;;  %v8027_v43 = vld [vmem:[#allocation19 + $0x498] ss:$28 sps:$4 sm:$0xff]   ;;  %v8030_v44 = vld [vmem:[#allocation19 + $0x4a0] ss:$28 sps:$4 sm:$0xff]  }
 0x8c9   : > { %5683 = vmatpush1.bf16.msra.mxu1 %v7991_v45  ;;  %5769 = vmatpush1.bf16.msra.mxu0 %v7994_v46  ;;  %v8035_v45 = vld [vmem:[#allocation19 + $0x4d4] ss:$28 sps:$4 sm:$0xff]   ;;  %v8038_v46 = vld [vmem:[#allocation19 + $0x4dc] ss:$28 sps:$4 sm:$0xff]  }
 0x8ca   : > { %5695 = vmatprep.subr.bf16.mxu1 %v7999_v47  ;;  %5781 = vmatprep.subr.bf16.mxu0 %v8002_v48  ;;  %v8033_v47 = vld [vmem:[#allocation19 + $0x4d0] ss:$28 sps:$4 sm:$0xff]   ;;  %v8036_v48 = vld [vmem:[#allocation19 + $0x4d8] ss:$28 sps:$4 sm:$0xff]  }
 0x95f   : > { %v4143_v53 = vpop.f32.mrb[20].mxu1  ;;  %v4186_v54 = vpop.f32.mrb[12].mxu0 }
 0x960   : > { %v4144_v55 = vadd.f32 %v4143_v53, %v3772_v50  ;;  %v4187_v56 = vadd.f32 %v4186_v54, %v3780_v51  ;;  %v4145_v57 = vpop.f32.mrb[21].mxu1  ;;  %v4188_v58 = vpop.f32.mrb[13].mxu0  ;;  %v8050_v53 = vld [vmem:[#allocation19 + $0x54c] ss:$28 sps:$4 sm:$0xff]   ;;  %v8045_v54 = vld [vmem:[#allocation19 + $0x540] ss:$28 sps:$4 sm:$0xff]  }
 0x961   : > { %v4146_v59 = vadd.f32 %v4145_v57, %v3776_v38  ;;  %v4189_v60 = vadd.f32 %v4188_v58, %v3784_v52  ;;  %v4147_v61 = vpop.f32.mrb[22].mxu1  ;;  %v4190_v62 = vpop.f32.mrb[14].mxu0  ;;  %v8056_v57 = vld [vmem:[#allocation19 + $0x584] ss:$28 sps:$4 sm:$0xff]   ;;  %v8051_v58 = vld [vmem:[#allocation19 + $0x578] ss:$28 sps:$4 sm:$0xff]  }
 0x962   : > { %v4148_v63 = vadd.f32 %v4147_v61, %v3772_v50  ;;  %v4191_v0 = vadd.f32 %v4190_v62, %v3780_v51  ;;  %v4149_v1 = vpop.f32.mrb[23].mxu1  ;;  %v4192_v2 = vpop.f32.mrb[15].mxu0  ;;  %v4195_v5 = vmax.f32 %v4144_v55, 0.0  ;;  %v4197_v6 = vmax.f32 %v4187_v56, 0.0  ;;  %v8044_v50 = vld [vmem:[#allocation19 + $0x514] ss:$28 sps:$4 sm:$0xff]  }
 0x963   : > { %v4150_v3 = vadd.f32 %v4149_v1, %v3776_v38  ;;  %v4193_v4 = vadd.f32 %v4192_v2, %v3784_v52  ;;  %v4196_v9 = vmax.f32 %v4146_v59, 0.0  ;;  %v4198_v10 = vmax.f32 %v4189_v60, 0.0  ;;  %v8039_v51 = vld [vmem:[#allocation19 + $0x508] ss:$28 sps:$4 sm:$0xff]   ;;  %v8042_v38 = vld [vmem:[#allocation19 + $0x510] ss:$28 sps:$4 sm:$0xff]  }
 0x964   : > { %v4199_v7 = vmax.f32 %v4148_v63, 0.0  ;;  %v4201_v8 = vmax.f32 %v4191_v0, 0.0  ;;  %v8047_v52 = vld [vmem:[#allocation19 + $0x544] ss:$28 sps:$4 sm:$0xff]   ;;  %v8053_v56 = vld [vmem:[#allocation19 + $0x57c] ss:$28 sps:$4 sm:$0xff]  }
 0x965   : > { %v4200_v11 = vmax.f32 %v4150_v3, 0.0  ;;  %v4202_v12 = vmax.f32 %v4193_v4, 0.0  ;;  %v8048_v55 = vld [vmem:[#allocation19 + $0x548] ss:$28 sps:$4 sm:$0xff]   ;;  %v8054_v59 = vld [vmem:[#allocation19 + $0x580] ss:$28 sps:$4 sm:$0xff]  }
 0x966   : > { %v9227_v13 = vpack.c.bf16 %v4199_v7, %v4195_v5  ;;  %v9229_v14 = vpack.c.bf16 %v4201_v8, %v4197_v6  ;;  %v8059_v60 = vld [vmem:[#allocation19 + $0x5b4] ss:$28 sps:$4 sm:$0xff]   ;;  %v8062_v61 = vld [vmem:[#allocation19 + $0x5bc] ss:$28 sps:$4 sm:$0xff]   ;;  %v8065_v0 = vld [vmem:[#allocation19 + $0x5ec] ss:$28 sps:$4 sm:$0xff]  }
 0x967   : > { %v9231_v15 = vpack.c.bf16 %v4200_v11, %v4196_v9  ;;  %v9233_v16 = vpack.c.bf16 %v4202_v12, %v4198_v10  ;;  %v8057_v62 = vld [vmem:[#allocation19 + $0x5b0] ss:$28 sps:$4 sm:$0xff]   ;;  %v8060_v63 = vld [vmem:[#allocation19 + $0x5b8] ss:$28 sps:$4 sm:$0xff]   ;;  %v8063_v2 = vld [vmem:[#allocation19 + $0x5e8] ss:$28 sps:$4 sm:$0xff]  }
 0x968   : > { %v8068_v1 = vld [vmem:[#allocation19 + $0x5f4] ss:$28 sps:$4 sm:$0xff]   ;;  %v8071_v4 = vld [vmem:[#allocation19 + $0x624] ss:$28 sps:$4 sm:$0xff]   ;;  %v8074_v5 = vld [vmem:[#allocation19 + $0x62c] ss:$28 sps:$4 sm:$0xff]  }
 0x969   : > { %5684 = vmatprep.mubr.bf16.mxu1 %v9231_v15  ;;  %5770 = vmatprep.mubr.bf16.mxu0 %v9231_v15  ;;  %v8066_v3 = vld [vmem:[#allocation19 + $0x5f0] ss:$28 sps:$4 sm:$0xff]   ;;  %v8069_v6 = vld [vmem:[#allocation19 + $0x620] ss:$28 sps:$4 sm:$0xff]   ;;  %v8072_v7 = vld [vmem:[#allocation19 + $0x628] ss:$28 sps:$4 sm:$0xff]  }
 0x96a   : > { %5685 = vmatmul.mubr.bf16.vlgmr.msra.gmra.mrb[24].mxu1 %v9227_v13  ;;  %5771 = vmatmul.mubr.bf16.vlgmr.msra.gmra.mrb[16].mxu0 %v9227_v13  ;;  %v8077_v8 = vld [vmem:[#allocation19 + $0x65c] ss:$28 sps:$4 sm:$0xff]   ;;  %v8080_v9 = vld [vmem:[#allocation19 + $0x664] ss:$28 sps:$4 sm:$0xff]   ;;  %v8083_v12 = vld [vmem:[#allocation19 + $0x694] ss:$28 sps:$4 sm:$0xff]  }
 0x96b   : > { %5696 = vmatpush1.bf16.msra.mxu1 %v7997_v17  ;;  %5782 = vmatpush1.bf16.msra.mxu0 %v8000_v19  ;;  %v8075_v10 = vld [vmem:[#allocation19 + $0x658] ss:$28 sps:$4 sm:$0xff]   ;;  %v8078_v11 = vld [vmem:[#allocation19 + $0x660] ss:$28 sps:$4 sm:$0xff]   ;;  %v8081_v19 = vld [vmem:[#allocation19 + $0x690] ss:$28 sps:$4 sm:$0xff]  }
 0x96c   : > { %5727 = vmatprep.mubr.bf16.mxu1 %v9233_v16  ;;  %5813 = vmatprep.mubr.bf16.mxu0 %v9233_v16  ;;  %v8086_v17 = vld [vmem:[#allocation19 + $0x69c] ss:$28 sps:$4 sm:$0xff]  }
 0x96d   : > { %5697 = vmatprep.subr.bf16.mxu1 %v8005_v20  ;;  %5783 = vmatprep.subr.bf16.mxu0 %v8008_v21  ;;  %v8084_v20 = vld [vmem:[#allocation19 + $0x698] ss:$28 sps:$4 sm:$0xff]   ;;  %v8089_v21 = vld [vmem:[#allocation19 + $0x6cc] ss:$28 sps:$4 sm:$0xff]  }
 0x96f   : > { %5698 = vmatpush1.bf16.msra.mxu1 %v8003_v25  ;;  %5784 = vmatpush1.bf16.msra.mxu0 %v8006_v28  ;;  %v8092_v25 = vld [vmem:[#allocation19 + $0x6d4] ss:$28 sps:$4 sm:$0xff]   ;;  %v8087_v28 = vld [vmem:[#allocation19 + $0x6c8] ss:$28 sps:$4 sm:$0xff]  }
 0x970   : > { %5699 = vmatprep.subr.bf16.mxu1 %v8011_v29  ;;  %5785 = vmatprep.subr.bf16.mxu0 %v8014_v30  ;;  %v8090_v29 = vld [vmem:[#allocation19 + $0x6d0] ss:$28 sps:$4 sm:$0xff]  }
 0x971   : > { %v8095_v30 = vld [vmem:[#allocation19 + $0x14] ss:$28 sps:$4 sm:$0xff]  }
 0x973   : > { %5700 = vmatpush1.bf16.msra.mxu1 %v8009_v31  ;;  %5786 = vmatpush1.bf16.msra.mxu0 %v8012_v32  ;;  %v8096_v31 = vld [vmem:[#allocation19 + $0x1d8] ss:$28 sps:$4 sm:$0xff]   ;;  %v8093_v32 = vld [vmem:[#allocation19 + $0x10] ss:$28 sps:$4 sm:$0xff]  }
 0x974   : > { %5701 = vmatprep.subr.bf16.mxu1 %v8017_v33  ;;  %5787 = vmatprep.subr.bf16.mxu0 %v8020_v34  ;;  %v8097_v33 = vld [vmem:[#allocation19 + $0x18] ss:$28 sps:$4 sm:$0xff]   ;;  %v8100_v34 = vld [vmem:[#allocation19 + $0x4c] ss:$28 sps:$4 sm:$0xff]  }
 0x977   : > { %5702 = vmatpush1.bf16.msra.mxu1 %v8015_v35  ;;  %5788 = vmatpush1.bf16.msra.mxu0 %v8018_v36  ;;  %v8101_v35 = vld [vmem:[#allocation19 + $0x210] ss:$28 sps:$4 sm:$0xff]   ;;  %v8098_v36 = vld [vmem:[#allocation19 + $0x48] ss:$28 sps:$4 sm:$0xff]  }
 0x978   : > { %5703 = vmatprep.subr.bf16.mxu1 %v8023_v37  ;;  %5789 = vmatprep.subr.bf16.mxu0 %v8026_v39  ;;  %v8102_v37 = vld [vmem:[#allocation19 + $0x50] ss:$28 sps:$4 sm:$0xff]   ;;  %v8105_v39 = vld [vmem:[#allocation19 + $0x84] ss:$28 sps:$4 sm:$0xff]  }
 0x97b   : > { %5704 = vmatpush1.bf16.msra.mxu1 %v8021_v40  ;;  %5790 = vmatpush1.bf16.msra.mxu0 %v8024_v41  ;;  %v8106_v40 = vld [vmem:[#allocation19 + $0x248] ss:$28 sps:$4 sm:$0xff]   ;;  %v8103_v41 = vld [vmem:[#allocation19 + $0x80] ss:$28 sps:$4 sm:$0xff]  }
 0x97c   : > { %5705 = vmatprep.subr.bf16.mxu1 %v8029_v42  ;;  %5791 = vmatprep.subr.bf16.mxu0 %v8032_v18  ;;  %v8107_v42 = vld [vmem:[#allocation19 + $0x88] ss:$28 sps:$4 sm:$0xff]   ;;  %v8110_v18 = vld [vmem:[#allocation19 + $0xbc] ss:$28 sps:$4 sm:$0xff]  }
 0x97f   : > { %5706 = vmatpush1.bf16.msra.mxu1 %v8027_v43  ;;  %5792 = vmatpush1.bf16.msra.mxu0 %v8030_v44  ;;  %v8111_v43 = vld [vmem:[#allocation19 + $0x280] ss:$28 sps:$4 sm:$0xff]   ;;  %v8108_v44 = vld [vmem:[#allocation19 + $0xb8] ss:$28 sps:$4 sm:$0xff]  }
 0x980   : > { %5707 = vmatprep.subr.bf16.mxu1 %v8035_v45  ;;  %5793 = vmatprep.subr.bf16.mxu0 %v8038_v46  ;;  %v8112_v45 = vld [vmem:[#allocation19 + $0xc0] ss:$28 sps:$4 sm:$0xff]   ;;  %v8115_v46 = vld [vmem:[#allocation19 + $0xf4] ss:$28 sps:$4 sm:$0xff]  }
 0x983   : > { %5708 = vmatpush1.bf16.msra.mxu1 %v8033_v47  ;;  %5794 = vmatpush1.bf16.msra.mxu0 %v8036_v48  ;;  %v8113_v47 = vld [vmem:[#allocation19 + $0xf0] ss:$28 sps:$4 sm:$0xff]   ;;  %v8117_v48 = vld [vmem:[#allocation19 + $0xf8] ss:$28 sps:$4 sm:$0xff]  }
 0x984   : > { %5709 = vmatprep.subr.bf16.mxu1 %v8041_v49  ;;  %5795 = vmatprep.subr.bf16.mxu0 %v8044_v50  ;;  %v8120_v49 = vld [vmem:[#allocation19 + $0x12c] ss:$28 sps:$4 sm:$0xff]  }
 0x985   : > { %v8121_v50 = vld [vmem:[#allocation19 + $0x2f0] ss:$28 sps:$4 sm:$0xff]  }
 0x987   : > { %5710 = vmatpush1.bf16.msra.mxu1 %v8039_v51  ;;  %5796 = vmatpush1.bf16.msra.mxu0 %v8042_v38  ;;  %v8118_v51 = vld [vmem:[#allocation19 + $0x128] ss:$28 sps:$4 sm:$0xff]   ;;  %v8122_v38 = vld [vmem:[#allocation19 + $0x130] ss:$28 sps:$4 sm:$0xff]  }
 0x988   : > { %5711 = vmatprep.subr.bf16.mxu1 %v8047_v52  ;;  %5797 = vmatprep.subr.bf16.mxu0 %v8050_v53  ;;  %v8125_v52 = vld [vmem:[#allocation19 + $0x164] ss:$28 sps:$4 sm:$0xff]  }
 0x989   : > { %v8126_v53 = vld [vmem:[#allocation19 + $0x328] ss:$28 sps:$4 sm:$0xff]  }
 0x98b   : > { %5712 = vmatpush1.bf16.msra.mxu1 %v8045_v54  ;;  %5798 = vmatpush1.bf16.msra.mxu0 %v8048_v55  ;;  %v8123_v54 = vld [vmem:[#allocation19 + $0x160] ss:$28 sps:$4 sm:$0xff]   ;;  %v8127_v55 = vld [vmem:[#allocation19 + $0x168] ss:$28 sps:$4 sm:$0xff]  }
 0x98c   : > { %5713 = vmatprep.subr.bf16.mxu1 %v8053_v56  ;;  %5799 = vmatprep.subr.bf16.mxu0 %v8056_v57  ;;  %v8130_v56 = vld [vmem:[#allocation19 + $0x19c] ss:$28 sps:$4 sm:$0xff]  }
 0x98d   : > { %v8131_v57 = vld [vmem:[#allocation19 + $0x360] ss:$28 sps:$4 sm:$0xff]  }
 0x98f   : > { %5714 = vmatpush1.bf16.msra.mxu1 %v8051_v58  ;;  %5800 = vmatpush1.bf16.msra.mxu0 %v8054_v59  ;;  %v8128_v58 = vld [vmem:[#allocation19 + $0x198] ss:$28 sps:$4 sm:$0xff]   ;;  %v8132_v59 = vld [vmem:[#allocation19 + $0x1a0] ss:$28 sps:$4 sm:$0xff]  }
 0x990   : > { %5715 = vmatprep.subr.bf16.mxu1 %v8059_v60  ;;  %5801 = vmatprep.subr.bf16.mxu0 %v8062_v61  ;;  %v8135_v60 = vld [vmem:[#allocation19 + $0x1d4] ss:$28 sps:$4 sm:$0xff]  }
 0x991   : > { %v8136_v61 = vld [vmem:[#allocation19 + $0x558] ss:$28 sps:$4 sm:$0xff]  }
 0x993   : > { %5716 = vmatpush1.bf16.msra.mxu1 %v8057_v62  ;;  %5802 = vmatpush1.bf16.msra.mxu0 %v8060_v63  ;;  %v8133_v62 = vld [vmem:[#allocation19 + $0x1d0] ss:$28 sps:$4 sm:$0xff]   ;;  %v8137_v63 = vld [vmem:[#allocation19 + $0x398] ss:$28 sps:$4 sm:$0xff]  }
 0x994   : > { %5717 = vmatprep.subr.bf16.mxu1 %v8065_v0  ;;  %5803 = vmatprep.subr.bf16.mxu0 %v8068_v1  ;;  %v8140_v0 = vld [vmem:[#allocation19 + $0x20c] ss:$28 sps:$4 sm:$0xff]  }
 0x995   : > { %v8141_v1 = vld [vmem:[#allocation19 + $0x590] ss:$28 sps:$4 sm:$0xff]  }
 0x997   : > { %5718 = vmatpush1.bf16.msra.mxu1 %v8063_v2  ;;  %5804 = vmatpush1.bf16.msra.mxu0 %v8066_v3  ;;  %v8138_v2 = vld [vmem:[#allocation19 + $0x208] ss:$28 sps:$4 sm:$0xff]   ;;  %v8142_v3 = vld [vmem:[#allocation19 + $0x3d0] ss:$28 sps:$4 sm:$0xff]  }
 0x998   : > { %5719 = vmatprep.subr.bf16.mxu1 %v8071_v4  ;;  %5805 = vmatprep.subr.bf16.mxu0 %v8074_v5  ;;  %v8145_v4 = vld [vmem:[#allocation19 + $0x244] ss:$28 sps:$4 sm:$0xff]  }
 0x999   : > { %v8146_v5 = vld [vmem:[#allocation19 + $0x5c8] ss:$28 sps:$4 sm:$0xff]  }
 0x99b   : > { %5720 = vmatpush1.bf16.msra.mxu1 %v8069_v6  ;;  %5806 = vmatpush1.bf16.msra.mxu0 %v8072_v7  ;;  %v8143_v6 = vld [vmem:[#allocation19 + $0x240] ss:$28 sps:$4 sm:$0xff]   ;;  %v8147_v7 = vld [vmem:[#allocation19 + $0x408] ss:$28 sps:$4 sm:$0xff]  }
 0x99c   : > { %5721 = vmatprep.subr.bf16.mxu1 %v8077_v8  ;;  %5807 = vmatprep.subr.bf16.mxu0 %v8080_v9  ;;  %v8150_v8 = vld [vmem:[#allocation19 + $0x27c] ss:$28 sps:$4 sm:$0xff]  }
 0x99d   : > { %v8151_v9 = vld [vmem:[#allocation19 + $0x600] ss:$28 sps:$4 sm:$0xff]  }
 0x99f   : > { %5722 = vmatpush1.bf16.msra.mxu1 %v8075_v10  ;;  %5808 = vmatpush1.bf16.msra.mxu0 %v8078_v11  ;;  %v8148_v10 = vld [vmem:[#allocation19 + $0x278] ss:$28 sps:$4 sm:$0xff]   ;;  %v8152_v11 = vld [vmem:[#allocation19 + $0x440] ss:$28 sps:$4 sm:$0xff]  }
 0x9a0   : > { %5723 = vmatprep.subr.bf16.mxu1 %v8083_v12  ;;  %5809 = vmatprep.subr.bf16.mxu0 %v8086_v17  ;;  %v8155_v12 = vld [vmem:[#allocation19 + $0x2b4] ss:$28 sps:$4 sm:$0xff]  }
 0x9a1   : > { %v8156_v17 = vld [vmem:[#allocation19 + $0x638] ss:$28 sps:$4 sm:$0xff]  }
 0x9a3   : > { %5724 = vmatpush1.bf16.msra.mxu1 %v8081_v19  ;;  %5810 = vmatpush1.bf16.msra.mxu0 %v8084_v20  ;;  %v8153_v19 = vld [vmem:[#allocation19 + $0x2b0] ss:$28 sps:$4 sm:$0xff]   ;;  %v8157_v20 = vld [vmem:[#allocation19 + $0x478] ss:$28 sps:$4 sm:$0xff]  }
 0x9a4   : > { %5725 = vmatprep.subr.bf16.mxu1 %v8089_v21  ;;  %5811 = vmatprep.subr.bf16.mxu0 %v8092_v25  ;;  %v8160_v21 = vld [vmem:[#allocation19 + $0x2ec] ss:$28 sps:$4 sm:$0xff]  }
 0x9a5   : > { %v8161_v25 = vld [vmem:[#allocation19 + $0x670] ss:$28 sps:$4 sm:$0xff]  }
 0x9a7   : > { %5726 = vmatpush1.bf16.msra.mxu1 %v8087_v28  ;;  %5812 = vmatpush1.bf16.msra.mxu0 %v8090_v29  ;;  %v8158_v28 = vld [vmem:[#allocation19 + $0x2e8] ss:$28 sps:$4 sm:$0xff]   ;;  %v8162_v29 = vld [vmem:[#allocation19 + $0x4b0] ss:$28 sps:$4 sm:$0xff]  }
 0x9a8   : > { %5824 = vmatprep.subr.bf16.mxu1 %v8095_v30  ;;  %6967 = vmatprep.subr.bf16.mxu0 %v8096_v31  ;;  %v8165_v30 = vld [vmem:[#allocation19 + $0x324] ss:$28 sps:$4 sm:$0xff]  }
 0x9a9   : > { %v8166_v31 = vld [vmem:[#allocation19 + $0x6a8] ss:$28 sps:$4 sm:$0xff]  }
 0x9aa   : > { %5728 = vmatmul.mubr.bf16.vlgmr.msra.gmra.mrb[24].mxu1 %v9229_v14  ;;  %5814 = vmatmul.mubr.bf16.vlgmr.msra.gmra.mrb[16].mxu0 %v9229_v14 }
 0x9ab   : > { %5825 = vmatpush1.bf16.msra.mxu1 %v8093_v32  ;;  %5856 = vmatprep.mubr.bf16.mxu1 %v9231_v15  ;;  %v8163_v32 = vld [vmem:[#allocation19 + $0x320] ss:$28 sps:$4 sm:$0xff]  }
 0x9ac   : > { %6968 = vmatpush3.bf16.msra.mxu0 %v8097_v33  ;;  %5942 = vmatprep.mubr.bf16.mxu0 %v9231_v15  ;;  %v8116_v15 = vld [vmem:[#allocation19 + $0x2b8] ss:$28 sps:$4 sm:$0xff]   ;;  %v8167_v33 = vld [vmem:[#allocation19 + $0x4e8] ss:$28 sps:$4 sm:$0xff]  }
 0x9ad   : > { %5826 = vmatprep.subr.bf16.mxu1 %v8100_v34  ;;  %6969 = vmatprep.subr.bf16.mxu0 %v8101_v35  ;;  %v8170_v34 = vld [vmem:[#allocation19 + $0x35c] ss:$28 sps:$4 sm:$0xff]  }
 0x9ae   : > { %v8171_v35 = vld [vmem:[#allocation19 + $0x6e0] ss:$28 sps:$4 sm:$0xff]  }
 0x9af   : > { %5827 = vmatpush1.bf16.msra.mxu1 %v8098_v36  ;;  %v8168_v36 = vld [vmem:[#allocation19 + $0x358] ss:$28 sps:$4 sm:$0xff]  }
 0x9b0   : > { %6970 = vmatpush3.bf16.msra.mxu0 %v8102_v37  ;;  %5828 = vmatprep.subr.bf16.mxu1 %v8105_v39  ;;  %v8172_v37 = vld [vmem:[#allocation19 + $0x520] ss:$28 sps:$4 sm:$0xff]   ;;  %v8175_v39 = vld [vmem:[#allocation19 + $0x394] ss:$28 sps:$4 sm:$0xff]  }
 0x9b1   : > { %6971 = vmatprep.subr.bf16.mxu0 %v8106_v40  ;;  %v8173_v40 = vld [vmem:[#allocation19 + $0x390] ss:$28 sps:$4 sm:$0xff]  }
 0x9b3   : > { %5829 = vmatpush1.bf16.msra.mxu1 %v8103_v41  ;;  %v8178_v41 = vld [vmem:[#allocation19 + $0x3cc] ss:$28 sps:$4 sm:$0xff]  }
 0x9b4   : > { %6972 = vmatpush3.bf16.msra.mxu0 %v8107_v42  ;;  %5830 = vmatprep.subr.bf16.mxu1 %v8110_v18  ;;  %v8176_v42 = vld [vmem:[#allocation19 + $0x3c8] ss:$28 sps:$4 sm:$0xff]  }
 0x9b5   : > { %6973 = vmatprep.subr.bf16.mxu0 %v8111_v43  ;;  %v8181_v18 = vld [vmem:[#allocation19 + $0x404] ss:$28 sps:$4 sm:$0xff]  }
 0x9b6   : > { %v8179_v43 = vld [vmem:[#allocation19 + $0x400] ss:$28 sps:$4 sm:$0xff]  }
 0x9b7   : > { %5831 = vmatpush1.bf16.msra.mxu1 %v8108_v44  ;;  %v8184_v44 = vld [vmem:[#allocation19 + $0x43c] ss:$28 sps:$4 sm:$0xff]  }
 0x9b8   : > { %6974 = vmatpush3.bf16.msra.mxu0 %v8112_v45  ;;  %5832 = vmatprep.subr.bf16.mxu1 %v8115_v46  ;;  %v8182_v45 = vld [vmem:[#allocation19 + $0x438] ss:$28 sps:$4 sm:$0xff]  }
 0x9b9   : > { %6975 = vmatprep.subr.bf16.mxu0 %v8116_v15  ;;  %v8187_v46 = vld [vmem:[#allocation19 + $0x474] ss:$28 sps:$4 sm:$0xff]  }
 0x9ba   : > { %v8185_v15 = vld [vmem:[#allocation19 + $0x470] ss:$28 sps:$4 sm:$0xff]  }
 0x9bb   : > { %5833 = vmatpush1.bf16.msra.mxu1 %v8113_v47  ;;  %v8188_v47 = vld [vmem:[#allocation19 + $0x4a8] ss:$28 sps:$4 sm:$0xff]  }
 0x9bc   : > { %6976 = vmatpush3.bf16.msra.mxu0 %v8117_v48  ;;  %5834 = vmatprep.subr.bf16.mxu1 %v8120_v49  ;;  %v8193_v48 = vld [vmem:[#allocation19 + $0x4e4] ss:$28 sps:$4 sm:$0xff]   ;;  %v8196_v49 = vld [vmem:[#allocation19 + $0x51c] ss:$28 sps:$4 sm:$0xff]  }
 0x9bd   : > { %6977 = vmatprep.subr.bf16.mxu0 %v8121_v50  ;;  %v8194_v50 = vld [vmem:[#allocation19 + $0x518] ss:$28 sps:$4 sm:$0xff]  }
 0x9bf   : > { %5835 = vmatpush1.bf16.msra.mxu1 %v8118_v51  ;;  %v8199_v51 = vld [vmem:[#allocation19 + $0x554] ss:$28 sps:$4 sm:$0xff]  }
 0x9c0   : > { %6978 = vmatpush3.bf16.msra.mxu0 %v8122_v38  ;;  %5836 = vmatprep.subr.bf16.mxu1 %v8125_v52  ;;  %v8197_v38 = vld [vmem:[#allocation19 + $0x550] ss:$28 sps:$4 sm:$0xff]  }
 0x9c1   : > { %6979 = vmatprep.subr.bf16.mxu0 %v8126_v53  ;;  %v8202_v52 = vld [vmem:[#allocation19 + $0x58c] ss:$28 sps:$4 sm:$0xff]  }
 0x9c2   : > { %v8200_v53 = vld [vmem:[#allocation19 + $0x588] ss:$28 sps:$4 sm:$0xff]  }
 0x9c3   : > { %5837 = vmatpush1.bf16.msra.mxu1 %v8123_v54  ;;  %v8205_v54 = vld [vmem:[#allocation19 + $0x5c4] ss:$28 sps:$4 sm:$0xff]  }
 0x9c4   : > { %6980 = vmatpush3.bf16.msra.mxu0 %v8127_v55  ;;  %5838 = vmatprep.subr.bf16.mxu1 %v8130_v56  ;;  %v8203_v55 = vld [vmem:[#allocation19 + $0x5c0] ss:$28 sps:$4 sm:$0xff]  }
 0x9c5   : > { %6981 = vmatprep.subr.bf16.mxu0 %v8131_v57  ;;  %v8208_v56 = vld [vmem:[#allocation19 + $0x5fc] ss:$28 sps:$4 sm:$0xff]  }
 0x9c6   : > { %v8206_v57 = vld [vmem:[#allocation19 + $0x5f8] ss:$28 sps:$4 sm:$0xff]  }
 0x9c7   : > { %5839 = vmatpush1.bf16.msra.mxu1 %v8128_v58  ;;  %v8211_v58 = vld [vmem:[#allocation19 + $0x634] ss:$28 sps:$4 sm:$0xff]  }
 0x9c8   : > { %6982 = vmatpush3.bf16.msra.mxu0 %v8132_v59  ;;  %5840 = vmatprep.subr.bf16.mxu1 %v8135_v60  ;;  %v8209_v59 = vld [vmem:[#allocation19 + $0x630] ss:$28 sps:$4 sm:$0xff]  }
 0x9c9   : > { %6989 = vmatprep.subr.bf16.mxu0 %v8136_v61  ;;  %v8214_v60 = vld [vmem:[#allocation19 + $0x66c] ss:$28 sps:$4 sm:$0xff]  }
 0x9ca   : > { %v8212_v61 = vld [vmem:[#allocation19 + $0x668] ss:$28 sps:$4 sm:$0xff]  }
 0x9cb   : > { %5943 = vmatmul.mubr.bf16.vlgmr.msra.gmra.mrb[20].mxu0 %v9227_v13  ;;  %5841 = vmatpush1.bf16.msra.mxu1 %v8133_v62  ;;  %v8217_v62 = vld [vmem:[#allocation19 + $0x6a4] ss:$28 sps:$4 sm:$0xff]  }
 0x9cc   : > { %6990 = vmatpush3.bf16.msra.mxu0 %v8137_v63  ;;  %5983 = vmatprep.mubr.bf16.mxu0 %v9233_v16  ;;  %v8215_v63 = vld [vmem:[#allocation19 + $0x6a0] ss:$28 sps:$4 sm:$0xff]  }
 0x9cd   : > { %5842 = vmatprep.subr.bf16.mxu1 %v8140_v0  ;;  %6991 = vmatprep.subr.bf16.mxu0 %v8141_v1  ;;  %v8220_v0 = vld [vmem:[#allocation19 + $0x6dc] ss:$28 sps:$4 sm:$0xff]  }
 0x9ce   : > { %v8218_v1 = vld [vmem:[#allocation19 + $0x6d8] ss:$28 sps:$4 sm:$0xff]  }
 0x9cf   : > { %5843 = vmatpush1.bf16.msra.mxu1 %v8138_v2  ;;  %v4463_v2 = vld [vmem:[%s9412_s24] sm:$0xff] }
 0x9d0   : > { %6992 = vmatpush3.bf16.msra.mxu0 %v8142_v3  ;;  %5844 = vmatprep.subr.bf16.mxu1 %v8145_v4  ;;  %v4468_v3 = vrot.slane %v4463_v2, %v9149_v23  ;;  %v4476_v4 = vrot.slane %v4463_v2, %v9152_v24 }
 0x9d1   : > { %6993 = vmatprep.subr.bf16.mxu0 %v8146_v5  ;;  %v4472_v5 = vrot.slane %v4463_v2, %v9158_v26 }
 0x9d3   : > { %5845 = vmatpush1.bf16.msra.mxu1 %v8143_v6  ;;  %v4480_v6 = vrot.slane %v4463_v2, %v9161_v27 }
 0x9d4   : > { %6994 = vmatpush3.bf16.msra.mxu0 %v8147_v7  ;;  %5846 = vmatprep.subr.bf16.mxu1 %v8150_v8 }
 0x9d5   : > { %6995 = vmatprep.subr.bf16.mxu0 %v8151_v9 }
 0x9d7   : > { %5847 = vmatpush1.bf16.msra.mxu1 %v8148_v10 }
 0x9d8   : > { %6996 = vmatpush3.bf16.msra.mxu0 %v8152_v11  ;;  %5848 = vmatprep.subr.bf16.mxu1 %v8155_v12 }
 0x9d9   : > { %6997 = vmatprep.subr.bf16.mxu0 %v8156_v17 }
 0x9db   : > { %5849 = vmatpush1.bf16.msra.mxu1 %v8153_v19 }
 0x9dc   : > { %6998 = vmatpush3.bf16.msra.mxu0 %v8157_v20  ;;  %5850 = vmatprep.subr.bf16.mxu1 %v8160_v21 }
 0x9dd   : > { %6999 = vmatprep.subr.bf16.mxu0 %v8161_v25 }
 0x9df   : > { %5851 = vmatpush1.bf16.msra.mxu1 %v8158_v28 }
 0x9e0   : > { %7000 = vmatpush3.bf16.msra.mxu0 %v8162_v29  ;;  %5852 = vmatprep.subr.bf16.mxu1 %v8165_v30 }
 0x9e1   : > { %7001 = vmatprep.subr.bf16.mxu0 %v8166_v31 }
 0x9e3   : > { %5853 = vmatpush1.bf16.msra.mxu1 %v8163_v32 }
 0x9e4   : > { %7002 = vmatpush3.bf16.msra.mxu0 %v8167_v33  ;;  %5854 = vmatprep.subr.bf16.mxu1 %v8170_v34 }
 0x9e5   : > { %7003 = vmatprep.subr.bf16.mxu0 %v8171_v35 }
 0x9e7   : > { %5855 = vmatpush1.bf16.msra.mxu1 %v8168_v36 }
 0x9e8   : > { %7004 = vmatpush3.bf16.msra.mxu0 %v8172_v37  ;;  %5867 = vmatprep.subr.bf16.mxu1 %v8175_v39  ;;  %v4491_v39 = vsub.s32 6, %v9146_v22 }
 0x9ea   : > { %5857 = vmatmul.mubr.bf16.vlgmr.msra.gmra.mrb[28].mxu1 %v9227_v13  ;;  %v8190_v13 = vld [vmem:[#allocation19 + $0x4ac] ss:$28 sps:$4 sm:$0xff]  }
 0x9eb   : > { %5984 = vmatmul.mubr.bf16.vlgmr.msra.gmra.mrb[24].mxu0 %v9229_v14  ;;  %5868 = vmatpush1.bf16.msra.mxu1 %v8173_v40  ;;  %v4492_v40 = vrot.slane %v4463_v2, %v4491_v39 }
 0x9ec   : > { %5899 = vmatprep.mubr.bf16.mxu1 %v9233_v16  ;;  %5869 = vmatprep.subr.bf16.mxu1 %v8178_v41  ;;  %v8191_v16 = vld [vmem:[#allocation19 + $0x4e0] ss:$28 sps:$4 sm:$0xff]  }
 0x9ef   : > { %5870 = vmatpush1.bf16.msra.mxu1 %v8176_v42 }
 0x9f0   : > { %5871 = vmatprep.subr.bf16.mxu1 %v8181_v18 }
 0x9f3   : > { %5872 = vmatpush1.bf16.msra.mxu1 %v8179_v43 }
 0x9f4   : > { %5873 = vmatprep.subr.bf16.mxu1 %v8184_v44 }
 0x9f7   : > { %5874 = vmatpush1.bf16.msra.mxu1 %v8182_v45 }
 0x9f8   : > { %5875 = vmatprep.subr.bf16.mxu1 %v8187_v46 }
 0x9fb   : > { %5876 = vmatpush1.bf16.msra.mxu1 %v8185_v15 }
 0x9fc   : > { %5877 = vmatprep.subr.bf16.mxu1 %v8190_v13 }
 0x9ff   : > { %5878 = vmatpush1.bf16.msra.mxu1 %v8188_v47 }
 0xa00   : > { %5879 = vmatprep.subr.bf16.mxu1 %v8193_v48 }
 0xa03   : > { %5880 = vmatpush1.bf16.msra.mxu1 %v8191_v16 }
 0xa04   : > { %5881 = vmatprep.subr.bf16.mxu1 %v8196_v49  ;;  %v4483_v49 = vsub.s32 4, %v9146_v22 }
 0xa07   : > { %5882 = vmatpush1.bf16.msra.mxu1 %v8194_v50  ;;  %v4487_v50 = vsub.s32 5, %v9146_v22 }
 0xa08   : > { %5883 = vmatprep.subr.bf16.mxu1 %v8199_v51  ;;  %v4484_v51 = vrot.slane %v4463_v2, %v4483_v49 }
 0xa0b   : > { %5884 = vmatpush1.bf16.msra.mxu1 %v8197_v38  ;;  %v4488_v38 = vrot.slane %v4463_v2, %v4487_v50 }
 0xa0c   : > { %5885 = vmatprep.subr.bf16.mxu1 %v8202_v52 }
 0xa0f   : > { %5886 = vmatpush1.bf16.msra.mxu1 %v8200_v53 }
 0xa10   : > { %5887 = vmatprep.subr.bf16.mxu1 %v8205_v54 }
 0xa13   : > { %5888 = vmatpush1.bf16.msra.mxu1 %v8203_v55 }
 0xa14   : > { %5889 = vmatprep.subr.bf16.mxu1 %v8208_v56 }
 0xa17   : > { %5890 = vmatpush1.bf16.msra.mxu1 %v8206_v57 }
 0xa18   : > { %5891 = vmatprep.subr.bf16.mxu1 %v8211_v58 }
 0xa1b   : > { %5892 = vmatpush1.bf16.msra.mxu1 %v8209_v59 }
 0xa1c   : > { %5893 = vmatprep.subr.bf16.mxu1 %v8214_v60 }
 0xa1f   : > { %5894 = vmatpush1.bf16.msra.mxu1 %v8212_v61 }
 0xa20   : > { %5895 = vmatprep.subr.bf16.mxu1 %v8217_v62 }
 0xa23   : > { %5896 = vmatpush1.bf16.msra.mxu1 %v8215_v63 }
 0xa24   : > { %5897 = vmatprep.subr.bf16.mxu1 %v8220_v0 }
 0xa27   : > { %5898 = vmatpush1.bf16.msra.mxu1 %v8218_v1 }
 0xa2a   : > { %5900 = vmatmul.mubr.bf16.vlgmr.msra.gmra.mrb[28].mxu1 %v9229_v14 }
 0xa7d   : > { %v5729_v7 = vpop.f32.mrb[24].mxu1  ;;  %v5815_v8 = vpop.f32.mrb[16].mxu0 }
 0xa7e   : > { %v7083_v9 = vadd.f32 %v5729_v7, %v4468_v3  ;;  %v7087_v10 = vadd.f32 %v5815_v8, %v4476_v4  ;;  %v5731_v11 = vpop.f32.mrb[25].mxu1  ;;  %v5817_v12 = vpop.f32.mrb[17].mxu0 }
 0xa7f   : > { %v7084_v14 = vadd.f32 %v5731_v11, %v4472_v5  ;;  %v7088_v17 = vadd.f32 %v5817_v12, %v4480_v6  ;;  %v5733_v19 = vpop.f32.mrb[26].mxu1  ;;  %v5819_v20 = vpop.f32.mrb[18].mxu0 }
 0xa80   : > { %v7085_v21 = vadd.f32 %v5733_v19, %v4468_v3  ;;  %v7089_v25 = vadd.f32 %v5819_v20, %v4476_v4  ;;  %v5735_v23 = vpop.f32.mrb[27].mxu1  ;;  %v5821_v28 = vpop.f32.mrb[19].mxu0 }
 0xa81   : > { %v6910_v24 = vpack.c.bf16 %v7084_v14, %v7083_v9  ;;  %v6911_v29 = vpack.c.bf16 %v7088_v17, %v7087_v10  ;;  %v7086_v26 = vadd.f32 %v5735_v23, %v4472_v5  ;;  %v7090_v30 = vadd.f32 %v5821_v28, %v4480_v6 }
 0xa83   : > { %6036 = vst [vmem:[%s9260_s6] sm:$0xff] %v6910_v24  ;;  %6037 = vst [vmem:[%s9260_s6 + $0x8] sm:$0xff] %v6911_v29  ;;  %v6914_v27 = vpack.c.bf16 %v7086_v26, %v7085_v21  ;;  %v6915_v31 = vpack.c.bf16 %v7090_v30, %v7089_v25 }
 0xa85   : > { %6040 = vst [vmem:[%s9260_s6 + $0x1c] sm:$0xff] %v6914_v27  ;;  %6041 = vst [vmem:[%s9260_s6 + $0x24] sm:$0xff] %v6915_v31 }
 0xa9e   : > { %v6983_v32 = vpop.f32.mrb[20].mxu0 }
 0xa9f   : > { %v6984_v33 = vpop.f32.mrb[21].mxu0 }
 0xaa0   : > { %v6985_v34 = vadd.f32 %v6984_v33, %v6983_v32  ;;  %v6986_v35 = vpop.f32.mrb[22].mxu0 }
 0xaa1   : > { %v6987_v36 = vpop.f32.mrb[23].mxu0 }
 0xaa2   : > { %v6988_v37 = vadd.f32 %v6987_v36, %v6986_v35  ;;  %v5945_v18 = vadd.f32 %v6985_v34, %v4492_v40 }
 0xaa4   : > { %v5948_v46 = vadd.f32 %v6988_v37, %v4492_v40 }
 0xabe   : > { %v7005_v41 = vpop.f32.mrb[24].mxu0 }
 0xabf   : > { %v7006_v42 = vpop.f32.mrb[25].mxu0 }
 0xac0   : > { %v7007_v43 = vadd.f32 %v7006_v42, %v7005_v41  ;;  %v7008_v44 = vpop.f32.mrb[26].mxu0 }
 0xac1   : > { %v7009_v45 = vpop.f32.mrb[27].mxu0 }
 0xac2   : > { %v5986_v15 = vadd.f32 %v7007_v43, %v5945_v18  ;;  %v7010_v13 = vadd.f32 %v7009_v45, %v7008_v44 }
 0xac4   : > { %v6913_v47 = vpack.c.bf16 %v5986_v15, %v5986_v15  ;;  %v5989_v48 = vadd.f32 %v7010_v13, %v5948_v46 }
 0xac6   : > { %6039 = vst [vmem:[%s9260_s6 + $0x18] sm:$0xf] %v6913_v47  ;;  %v6917_v16 = vpack.c.bf16 %v5989_v48, %v5989_v48 }
 0xac8   : > { %6043 = vst [vmem:[%s9260_s6 + $0x34] sm:$0xf] %v6917_v16 }
 0xafd   : > { %v5901_v52 = vpop.f32.mrb[28].mxu1 }
 0xafe   : > { %v7091_v53 = vadd.f32 %v5901_v52, %v4484_v51  ;;  %v5903_v54 = vpop.f32.mrb[29].mxu1 }
 0xaff   : > { %v7092_v55 = vadd.f32 %v5903_v54, %v4488_v38  ;;  %v5905_v56 = vpop.f32.mrb[30].mxu1 }
 0xb00   : > { %v7093_v57 = vadd.f32 %v5905_v56, %v4484_v51  ;;  %v5907_v58 = vpop.f32.mrb[31].mxu1 }
 0xb01   : > { %v6912_v22 = vpack.c.bf16 %v7092_v55, %v7091_v53  ;;  %v7094_v59 = vadd.f32 %v5907_v58, %v4488_v38 }
 0xb03   : > { %6038 = vst [vmem:[%s9260_s6 + $0x10] sm:$0xff] %v6912_v22  ;;  %v6916_v60 = vpack.c.bf16 %v7094_v59, %v7093_v57 }
 0xb05   : > { %6042 = vst [vmem:[%s9260_s6 + $0x2c] sm:$0xff] %v6916_v60 }
 0xb06   : > { %8544 = shalt.err (!%p8541_p3)
}
 0xb07   : > { %s8545_s5 = scalar_lea.hbm %s9279_s19, 896  ;;  %s8549_s6 = scalar_lea.hbm %s9413_s16, 1792 }
 0xb08   : > { %p8546_p6 = scmp.ne.s32.totalorder %s9279_s19, %s8545_s5  ;;  %p8550_p5 = scmp.lt.u32.totalorder %s9279_s19, %s9413_s16 }
 0xb09   : > { %p8551_p10 = scmp.lt.u32.totalorder %s8549_s6, %s8545_s5  ;;  %p8553_p11 = scmp.lt.u32.totalorder %s8545_s5, %s9279_s19 }
 0xb0a   : > { %p8547_p2 = pnand %p8546_p6, %p9414_p12 }
 0xb0b   : > { %p8552_p1 = por %p8551_p10, %p8550_p5 }
 0xb0c   : > { %p8548_p0 = pneg %p8547_p2 }
 0xb0d   : > { %p8554_p13 = por %p8553_p11, %p8552_p1 }
 0xb0f   : > { %p8555_p8 = pnand %p8554_p13, %p8548_p0 }
 0xb11   : > { %8558 = shalt.err (!%p8555_p8)
}
 0xb12   : > { %s8642_s26 = smov 448   ;;  %s8643_s29 = smov 28  }
 0xb13   : > { %7181 = dma.vmem_to_hbm [thread:$0]  (%p9414_p12), %s9273_s22, 896, %s9279_s19, %s6045_s28, %s8642_s26, %s8642_s26, %s8643_s29  }
 0xb14 PF: > { %s6074_s2 = sand.u32 1, %s8605_s0   ;;  %p9415_p7 = scmp.ne.s32.totalorder %s9389_s18, 0 }
 0xb15   : > { %p9416_p9 = scmp.ge.s32.totalorder %s8617_s21, 2  ;;  %s6075_s27 = scalar_lea.sflag [#allocation4], %s6074_s2 }
 0xb17   : > { %p7219_p4 = pnand %p9416_p9, %p9415_p7 }
 0xb19   : > { %8600 = dma.done.wait (!%p7219_p4), %s6075_s27, 896  }
 0xb1a   : > { %8602 = vsyncadd (!%p7219_p4), %s6075_s27, 4294966400  ;;  %p37_p3 = scmp.ge.s32.totalorder %s9029_s4, 4   ;;  %s9417_s0 = smov %s8609_s30 }
 0xb1b   : > { %s9418_s30 = smov %s8613_s20  ;;  %s9419_s20 = smov %s9040_s3 }
 0xb1c   : > { %s9420_s21 = smov %s9029_s4  ;;  %39 = sbr.rel (!%p37_p3) target bundleno = 26 (0x1a), region = 181 }
 0xb23   :  { %6080 = vsyncpa [#allocation3], 1 }
 0xb24   :  { %6082 = vsyncpa [#allocation3 + $0x1], 1 }
 0xb25   :  { %6083 = vsyncpa [#allocation6], 1 }
 0xb26   :  { %6084 = vsyncpa [#allocation9], 1 }
 0xb27   :  { %6085 = vsyncpa [#allocation12], 1 }
 0xb28   :  { %6086 = vsyncpa [#allocation15], 1 }
 0xb29   :  { %6087 = vsyncpa [#allocation18], 1 }
 0xb2a   :  { %6088 = vsyncpa [#allocation4], 1 }
 0xb2b   :  { %6090 = vsyncpa [#allocation4 + $0x1], 1 }

</bundles_post_ra>
